<compile_context>
chip_gen: v7x
topology: tpu7x:2x2x1
jax: 0.10.0
libtpu: 0.0.40
codegen_flags: <defaults>
</compile_context>

<pallas_src>
import jax
import jax.numpy as jnp
from jax.experimental import pallas as pl
from jax.experimental.pallas import tpu as pltpu

EPS = 1e-5


def conv1x1_bn_kernel(w_ref, x_ref, gamma_ref, beta_ref, o_ref):
    # w_ref:     (TC, Cin)  bf16  -- pre-cast weight tile, native (Cout, Cin) layout
    # x_ref:     (Cin, M)   f32   -- whole flattened activation (constant block
    #                               index -> fetched once per core)
    # gamma_ref: (TC, 1)    f32
    # beta_ref:  (TC, 1)    f32
    # o_ref:     (TC, M)    f32
    # In-kernel bf16 cast of the activation (hides under the weight DMA).
    x_bf = x_ref[...].astype(jnp.bfloat16)

    # 1x1 conv == matmul over the channel dimension (MXU, f32 accumulation).
    y = jnp.dot(w_ref[...], x_bf, preferred_element_type=jnp.float32)  # (TC, M)

    # BatchNorm (training mode): per-channel batch statistics over the M axis.
    mean = jnp.mean(y, axis=-1, keepdims=True)                       # (TC, 1)
    var = jnp.mean((y - mean) * (y - mean), axis=-1, keepdims=True)  # biased var
    inv = jax.lax.rsqrt(var + EPS)

    # Fold the BN affine into one per-channel scale/shift.
    scale = gamma_ref[...] * inv
    shift = beta_ref[...] - mean * scale
    o_ref[...] = y * scale + shift


def prepare_params(weight, gamma, beta):
    """One-time parameter prep.  Keep this OFF the per-call path: the weight is
    stored pre-cast to bf16 so the generation-time graph never touches the f32
    copy (the per-call cast was ~3-4x the kernel's own HBM traffic)."""
    Cout = weight.shape[0]
    w_bf = weight.astype(jnp.bfloat16)                 # native (Cout, Cin) layout
    gamma2d = gamma.reshape(Cout, 1).astype(jnp.float32)
    beta2d = beta.reshape(Cout, 1).astype(jnp.float32)
    return w_bf, gamma2d, beta2d


def _pick_cout_tile(cout):
    """v7x has 2 TensorCores per chip -> one Cout tile per core.
    v5e/v6e are single-TC -> one grid step (avoids per-step overhead)."""
    try:
        kind = jax.devices()[0].device_kind.lower()
    except Exception:
        kind = ""
    if "v7" in kind and cout % 2 == 0 and (cout // 2) % 8 == 0:
        return cout // 2     # e.g. 384 -> 192, grid=(2,), one tile per TC
    return cout              # grid=(1,)


def conv1x1_bn(x_nchw, w_bf, gamma2d, beta2d):
    """x_nchw: (N, Cin, H, W) f32; w_bf: (Cout, Cin) bf16 (pre-cast);
    gamma2d/beta2d: (Cout, 1) f32."""
    N, Cin, H, W = x_nchw.shape
    Cout = w_bf.shape[0]
    M = N * H * W

    # X^T in (Cin, M) layout.  For N == 1 this is a free reshape (no transpose).
    if N == 1:
        xT = x_nchw.reshape(Cin, M)
    else:
        # TODO(synk): for N > 1 this transpose is materialized; module uses N=1.
        xT = jnp.transpose(x_nchw, (1, 0, 2, 3)).reshape(Cin, M)

    cout_tile = _pick_cout_tile(Cout)
    assert Cout % cout_tile == 0, (Cout, cout_tile)
    grid = (Cout // cout_tile,)

    cost = pl.CostEstimate(
        flops=2 * Cout * Cin * M,
        transcendentals=Cout,
        bytes_accessed=(Cout * Cin * 2      # bf16 weight
                        + Cin * M * 4       # f32 activation
                        + 2 * Cout * 4      # gamma + beta
                        + Cout * M * 4),    # f32 output
    )

    outT = pl.pallas_call(
        conv1x1_bn_kernel,
        out_shape=jax.ShapeDtypeStruct((Cout, M), jnp.float32),
        grid=grid,
        in_specs=[
            pl.BlockSpec((cout_tile, Cin), lambda i: (i, 0)),   # weight tile
            pl.BlockSpec((Cin, M), lambda i: (0, 0)),           # x, fetched once
            pl.BlockSpec((cout_tile, 1), lambda i: (i, 0)),     # gamma tile
            pl.BlockSpec((cout_tile, 1), lambda i: (i, 0)),     # beta tile
        ],
        out_specs=pl.BlockSpec((cout_tile, M), lambda i: (i, 0)),
        compiler_params=pltpu.CompilerParams(
            dimension_semantics=("parallel",)),
        cost_estimate=cost,
    )(w_bf, xT, gamma2d, beta2d)

    # (Cout, M) -> NCHW (free reshape for N == 1).
    if N == 1:
        return outT.reshape(1, Cout, H, W)
    return jnp.transpose(outT.reshape(Cout, N, H, W), (1, 0, 2, 2 + 1))


def reference(x_nchw, weight, gamma, beta, cast_bf16=False):
    # Pure-JAX reference of the same semantics (PyTorch conv1x1 + training BN).
    N, Cin, H, W = x_nchw.shape
    Cout = weight.shape[0]
    x2d = jnp.transpose(x_nchw, (0, 2, 3, 1)).reshape(-1, Cin)
    w = weight
    if cast_bf16:
        x2d = x2d.astype(jnp.bfloat16)
        w = w.astype(jnp.bfloat16)
    y = jnp.dot(x2d, w.T, preferred_element_type=jnp.float32)
    mean = jnp.mean(y, axis=0, keepdims=True)
    var = jnp.mean((y - mean) ** 2, axis=0, keepdims=True)
    y = (y - mean) / jnp.sqrt(var + EPS) * gamma + beta
    return jnp.transpose(y.reshape(N, H, W, Cout), (0, 3, 1, 2)).astype(jnp.float32)


if __name__ == "__main__":
    key = jax.random.PRNGKey(0)
    k_x, k_w = jax.random.split(key)

    N, Cin, H, W, Cout = 1, 2304, 7, 7, 384

    x = jax.random.normal(k_x, (N, Cin, H, W), dtype=jnp.float32)
    # Conv2d weight (Cout, Cin) for a 1x1 kernel; deterministic init.
    weight = jax.random.normal(k_w, (Cout, Cin), dtype=jnp.float32) * 0.02
    # BatchNorm2d default init: weight=1, bias=0.
    gamma = jnp.ones((Cout,), dtype=jnp.float32)
    beta = jnp.zeros((Cout,), dtype=jnp.float32)

    # One-time parameter preparation (hoisted off the per-call path).
    w_bf, gamma2d, beta2d = prepare_params(weight, gamma, beta)

    fwd = jax.jit(conv1x1_bn)
    out = jax.block_until_ready(fwd(x, w_bf, gamma2d, beta2d))
    assert out.shape == (N, Cout, H, W), out.shape

    # Tight check vs a reference using identical bf16 operand rounding.
    ref_bf = jax.block_until_ready(reference(x, weight, gamma, beta, cast_bf16=True))
    assert jnp.allclose(out, ref_bf, atol=2e-3, rtol=2e-3), "mismatch vs bf16-matched reference"

    # Loose sanity check vs the full-f32 (PyTorch-exact) reference.
    ref_f32 = jax.block_until_ready(reference(x, weight, gamma, beta, cast_bf16=False))
    assert jnp.allclose(out, ref_f32, atol=5e-2, rtol=5e-2), "mismatch vs f32 reference"

    print("KERNEL_OK")
</pallas_src>

<mosaic_0001>
module attributes {stable_mosaic.version = 11 : i64} {
  func.func @conv1x1_bn_kernel(%arg0: i32, %arg1: memref<384x2304xbf16, #tpu.memory_space<vmem>>, %arg2: memref<2304x49xf32, #tpu.memory_space<vmem>>, %arg3: memref<384x1xf32, #tpu.memory_space<vmem>>, %arg4: memref<384x1xf32, #tpu.memory_space<vmem>>, %arg5: memref<384x49xf32, #tpu.memory_space<vmem>>) attributes {dimension_semantics = [#tpu.dimension_semantics<parallel>], iteration_bounds = array<i64: 1>, scalar_prefetch = 0 : i64, scratch_operands = 0 : i64, tpu.core_type = #tpu.core_type<tc>, window_params = [{transform_indices = @transform_0, window_bounds = array<i64: 384, 2304>}, {pipeline_mode = #tpu.pipeline_mode<synchronous>, transform_indices = @transform_1, window_bounds = array<i64: 2304, 49>}, {transform_indices = @transform_2, window_bounds = array<i64: 384, 1>}, {transform_indices = @transform_3, window_bounds = array<i64: 384, 1>}, {transform_indices = @transform_4, window_bounds = array<i64: 384, 49>}]} {
    %c0 = arith.constant 0 : index
    %c0_0 = arith.constant 0 : index
    %0 = vector.load %arg2[%c0, %c0_0] : memref<2304x49xf32, #tpu.memory_space<vmem>>, vector<2304x49xf32>
    %1 = arith.truncf %0 : vector<2304x49xf32> to vector<2304x49xbf16>
    %c0_1 = arith.constant 0 : index
    %c0_2 = arith.constant 0 : index
    %2 = vector.load %arg1[%c0_1, %c0_2] : memref<384x2304xbf16, #tpu.memory_space<vmem>>, vector<384x2304xbf16>
    %cst = arith.constant dense<0.000000e+00> : vector<384x49xf32>
    %3 = tpu.matmul %2, %1, %cst {dimension_numbers = #tpu.dot_dimension_numbers<[1], [0], [0], [1], [0, 0, 1, 1], [], []>} : vector<384x2304xbf16>, vector<2304x49xbf16>, vector<384x49xf32> -> vector<384x49xf32>
    %cst_3 = arith.constant dense<0.000000e+00> : vector<384xf32>
    %4 = vector.multi_reduction <add>, %3, %cst_3 [1] : vector<384x49xf32> to vector<384xf32>
    %5 = vector.shape_cast %4 : vector<384xf32> to vector<384x1xf32>
    %cst_4 = arith.constant 4.900000e+01 : f32
    %6 = vector.broadcast %cst_4 : f32 to vector<384x1xf32>
    %7 = arith.divf %5, %6 : vector<384x1xf32>
    %8 = vector.broadcast %7 : vector<384x1xf32> to vector<384x49xf32>
    %9 = arith.subf %3, %8 : vector<384x49xf32>
    %10 = vector.broadcast %7 : vector<384x1xf32> to vector<384x49xf32>
    %11 = arith.subf %3, %10 : vector<384x49xf32>
    %12 = arith.mulf %9, %11 : vector<384x49xf32>
    %cst_5 = arith.constant dense<0.000000e+00> : vector<384xf32>
    %13 = vector.multi_reduction <add>, %12, %cst_5 [1] : vector<384x49xf32> to vector<384xf32>
    %14 = vector.shape_cast %13 : vector<384xf32> to vector<384x1xf32>
    %cst_6 = arith.constant 4.900000e+01 : f32
    %15 = vector.broadcast %cst_6 : f32 to vector<384x1xf32>
    %16 = arith.divf %14, %15 : vector<384x1xf32>
    %cst_7 = arith.constant 9.99999974E-6 : f32
    %17 = vector.broadcast %cst_7 : f32 to vector<384x1xf32>
    %18 = arith.addf %16, %17 : vector<384x1xf32>
    %19 = math.rsqrt %18 : vector<384x1xf32>
    %c0_8 = arith.constant 0 : index
    %c0_9 = arith.constant 0 : index
    %20 = vector.load %arg3[%c0_8, %c0_9] : memref<384x1xf32, #tpu.memory_space<vmem>>, vector<384x1xf32>
    %21 = arith.mulf %20, %19 : vector<384x1xf32>
    %c0_10 = arith.constant 0 : index
    %c0_11 = arith.constant 0 : index
    %22 = vector.load %arg4[%c0_10, %c0_11] : memref<384x1xf32, #tpu.memory_space<vmem>>, vector<384x1xf32>
    %23 = arith.mulf %7, %21 : vector<384x1xf32>
    %24 = arith.subf %22, %23 : vector<384x1xf32>
    %25 = vector.broadcast %21 : vector<384x1xf32> to vector<384x49xf32>
    %26 = arith.mulf %3, %25 : vector<384x49xf32>
    %27 = vector.broadcast %24 : vector<384x1xf32> to vector<384x49xf32>
    %28 = arith.addf %26, %27 : vector<384x49xf32>
    %c0_12 = arith.constant 0 : index
    %c0_13 = arith.constant 0 : index
    %29 = vector.load %arg5[%c0_12, %c0_13] : memref<384x49xf32, #tpu.memory_space<vmem>>, vector<384x49xf32>
    tpu.vector_store %arg5[%c0_12, %c0_13], %28 {strides = array<i32>} : memref<384x49xf32, #tpu.memory_space<vmem>>, vector<384x49xf32>,
    return
  }
  func.func @transform_0(%arg0: i32) -> (i32, i32) {
    %c0_i32 = arith.constant 0 : i32
    %c0_i32_0 = arith.constant 0 : i32
    return %arg0, %c0_i32 : i32, i32
  }
  func.func @transform_1(%arg0: i32) -> (i32, i32) {
    %c0_i32 = arith.constant 0 : i32
    %c0_i32_0 = arith.constant 0 : i32
    %c0_i32_1 = arith.constant 0 : i32
    return %c0_i32, %c0_i32_0 : i32, i32
  }
  func.func @transform_2(%arg0: i32) -> (i32, i32) {
    %c0_i32 = arith.constant 0 : i32
    %c0_i32_0 = arith.constant 0 : i32
    return %arg0, %c0_i32 : i32, i32
  }
  func.func @transform_3(%arg0: i32) -> (i32, i32) {
    %c0_i32 = arith.constant 0 : i32
    %c0_i32_0 = arith.constant 0 : i32
    return %arg0, %c0_i32 : i32, i32
  }
  func.func @transform_4(%arg0: i32) -> (i32, i32) {
    %c0_i32 = arith.constant 0 : i32
    %c0_i32_0 = arith.constant 0 : i32
    return %arg0, %c0_i32 : i32, i32
  }
}

</mosaic_0001>

<bundles_post_ra>
// kernel: conv1x1_bn.1
= control target key start
LH: loop header
LB: loop body
LE: loop exit
PB: predicated region body
PF: predicated region fallthrough
CT: control target
= control target key end

     0   :  { %v8444_v0 = vmov 0   ;;  %vm5067_vm0 = vcmask 400384   ;;  %s12075_s1 = inlined_call_operand.vmem [shape: f32[2304,49], index: 1, kind: input, shape index: {}]   ;;  %s12076_s0 = inlined_call_operand.vmem [shape: bf16[384,2304], index: 0, kind: input, shape index: {}]   ;;  %s12077_s2 = inlined_call_operand.vmem [shape: f32[384,1], index: 2, kind: input, shape index: {}]   ;;  %s12078_s3 = inlined_call_operand.vmem [shape: f32[384,1], index: 3, kind: input, shape index: {}]   ;;  %s12079_s4 = inlined_call_operand.vmem [shape: f32[384,49], index: 4, kind: output, shape index: {}]  }
   0x1   :  { %3042 = vmatprep.subr.bf16.mxu1 %v8444_v0  ;;  %3942 = vmatprep.subr.bf16.mxu0 %v8444_v0  ;;  %v18_v1 = vld [vmem:[%s12075_s1] sm:$0xff]  ;;  %v19_v2 = vld [vmem:[%s12075_s1 + $0x8] sm:$0xff]  ;;  %v20_v6 = vld [vmem:[%s12075_s1 + $0x10] sm:$0xff] }
   0x2   :  { %v146_v3 = vld [vmem:[%s12075_s1 + $0x400] sm:$0xff]  ;;  %v306_v4 = vpack.c.bf16 %v19_v2, %v18_v1  ;;  %v147_v5 = vld [vmem:[%s12075_s1 + $0x408] sm:$0xff]  ;;  %v21_v7 = vld [vmem:[%s12075_s1 + $0x18] sm:$0xff]  ;;  %7699 = vset.pattern.permute.xlu1 %v8444_v0  ;;  %7698 = vset.pattern.permute.xlu0 %v8444_v0 }
   0x3   :  { %v8492_v8 = vpack.c.bf16 %v147_v5, %v146_v3  ;;  %v148_v9 = vld [vmem:[%s12075_s1 + $0x410] sm:$0xff]  ;;  %v149_v10 = vld [vmem:[%s12075_s1 + $0x418] sm:$0xff]  ;;  %v307_v11 = vpack.c.bf16 %v21_v7, %v20_v6  ;;  %v22_v13 = vld [vmem:[%s12075_s1 + $0x20] sm:$0xff] }
   0x4   :  { %3043 = vmatpush1.bf16.msra.mxu1 %v306_v4  ;;  %v8502_v12 = vpack.c.bf16 %v149_v10, %v148_v9  ;;  %v23_v14 = vld [vmem:[%s12075_s1 + $0x28] sm:$0xff]  ;;  %v150_v15 = vld [vmem:[%s12075_s1 + $0x420] sm:$0xff]  ;;  %v24_v19 = vld [vmem:[%s12075_s1 + $0x30] sm:$0xff] }
   0x5   :  { %3943 = vmatpush1.bf16.msra.mxu0 %v8492_v8  ;;  %3044 = vmatprep.subr.bf16.mxu1 %v8444_v0  ;;  %v151_v16 = vld [vmem:[%s12075_s1 + $0x428] sm:$0xff]  ;;  %v308_v17 = vpack.c.bf16 %v23_v14, %v22_v13  ;;  %v25_v20 = vld [vmem:[%s12075_s1 + $0x38] sm:$0xff]  ;;  %v152_v21 = vld [vmem:[%s12075_s1 + $0x430] sm:$0xff] }
   0x6   :  { %3944 = vmatprep.subr.bf16.mxu0 %v8444_v0  ;;  %v8519_v18 = vpack.c.bf16 %v151_v16, %v150_v15  ;;  %v153_v22 = vld [vmem:[%s12075_s1 + $0x438] sm:$0xff]  ;;  %v309_v23 = vpack.c.bf16 %v25_v20, %v24_v19  ;;  %v26_v25 = vld [vmem:[%s12075_s1 + $0x40] sm:$0xff]  ;;  %v27_v26 = vld [vmem:[%s12075_s1 + $0x48] sm:$0xff] }
   0x7   :  { %v8536_v24 = vpack.c.bf16 %v153_v22, %v152_v21  ;;  %v154_v27 = vld [vmem:[%s12075_s1 + $0x440] sm:$0xff]  ;;  %v155_v28 = vld [vmem:[%s12075_s1 + $0x448] sm:$0xff]  ;;  %v310_v29 = vpack.c.bf16 %v27_v26, %v26_v25  ;;  %v28_v31 = vld [vmem:[%s12075_s1 + $0x50] sm:$0xff] }
   0x8   :  { %3045 = vmatpush1.bf16.msra.mxu1 %v307_v11  ;;  %v8553_v30 = vpack.c.bf16 %v155_v28, %v154_v27  ;;  %v29_v32 = vld [vmem:[%s12075_s1 + $0x58] sm:$0xff]  ;;  %v156_v33 = vld [vmem:[%s12075_s1 + $0x450] sm:$0xff]  ;;  %v30_v37 = vld [vmem:[%s12075_s1 + $0x60] sm:$0xff] }
   0x9   :  { %3945 = vmatpush1.bf16.msra.mxu0 %v8502_v12  ;;  %3046 = vmatprep.subr.bf16.mxu1 %v8444_v0  ;;  %v157_v34 = vld [vmem:[%s12075_s1 + $0x458] sm:$0xff]  ;;  %v311_v35 = vpack.c.bf16 %v29_v32, %v28_v31  ;;  %v31_v38 = vld [vmem:[%s12075_s1 + $0x68] sm:$0xff]  ;;  %v158_v39 = vld [vmem:[%s12075_s1 + $0x460] sm:$0xff] }
   0xa   :  { %3946 = vmatprep.subr.bf16.mxu0 %v8444_v0  ;;  %v8570_v36 = vpack.c.bf16 %v157_v34, %v156_v33  ;;  %v159_v40 = vld [vmem:[%s12075_s1 + $0x468] sm:$0xff]  ;;  %v312_v42 = vpack.c.bf16 %v31_v38, %v30_v37  ;;  %v32_v45 = vld [vmem:[%s12075_s1 + $0x70] sm:$0xff]  ;;  %v33_v46 = vld [vmem:[%s12075_s1 + $0x78] sm:$0xff] }
   0xb   :  { %v7702_v41 = vld [vmem:[%s12076_s0 + $0x4] ss:$72 sps:$4 sm:$0xff]   ;;  %v8593_v44 = vpack.c.bf16 %v159_v40, %v158_v39  ;;  %v160_v47 = vld [vmem:[%s12075_s1 + $0x470] sm:$0xff]  ;;  %v161_v48 = vld [vmem:[%s12075_s1 + $0x478] sm:$0xff]  ;;  %v313_v49 = vpack.c.bf16 %v33_v46, %v32_v45 }
   0xc   :  { %3047 = vmatpush1.bf16.msra.mxu1 %v308_v17  ;;  %v7705_v43 = vld [vmem:[%s12076_s0 + $0x24] ss:$72 sps:$4 sm:$0xff]   ;;  %3074 = vmatprep.mubr.bf16.mxu1 %v7702_v41  ;;  %v8610_v50 = vpack.c.bf16 %v161_v48, %v160_v47  ;;  %v36_v57 = vld [vmem:[%s12075_s1 + $0x90] sm:$0xff]  ;;  %v37_v58 = vld [vmem:[%s12075_s1 + $0x98] sm:$0xff] }
   0xd   :  { %3947 = vmatpush1.bf16.msra.mxu0 %v8519_v18  ;;  %3048 = vmatprep.subr.bf16.mxu1 %v8444_v0  ;;  %v34_v51 = vld [vmem:[%s12075_s1 + $0x80] sm:$0xff]  ;;  %v35_v52 = vld [vmem:[%s12075_s1 + $0x88] sm:$0xff]  ;;  %v164_v59 = vld [vmem:[%s12075_s1 + $0x490] sm:$0xff]  ;;  %v315_v61 = vpack.c.bf16 %v37_v58, %v36_v57 }
   0xe   :  { %3948 = vmatprep.subr.bf16.mxu0 %v8444_v0  ;;  %3974 = vmatprep.mubr.bf16.mxu0 %v7705_v43  ;;  %v162_v53 = vld [vmem:[%s12075_s1 + $0x480] sm:$0xff]  ;;  %v163_v54 = vld [vmem:[%s12075_s1 + $0x488] sm:$0xff]  ;;  %v314_v55 = vpack.c.bf16 %v35_v52, %v34_v51  ;;  %v165_v60 = vld [vmem:[%s12075_s1 + $0x498] sm:$0xff] }
   0xf   :  { %v8627_v56 = vpack.c.bf16 %v163_v54, %v162_v53  ;;  %v8644_v62 = vpack.c.bf16 %v165_v60, %v164_v59  ;;  %v38_v63 = vld [vmem:[%s12075_s1 + $0xa0] sm:$0xff]  ;;  %v39_v1 = vld [vmem:[%s12075_s1 + $0xa8] sm:$0xff]  ;;  %v40_v6 = vld [vmem:[%s12075_s1 + $0xb0] sm:$0xff] }
  0x10   :  { %3049 = vmatpush1.bf16.msra.mxu1 %v309_v23  ;;  %v166_v2 = vld [vmem:[%s12075_s1 + $0x4a0] sm:$0xff]  ;;  %v167_v3 = vld [vmem:[%s12075_s1 + $0x4a8] sm:$0xff]  ;;  %v316_v4 = vpack.c.bf16 %v39_v1, %v38_v63  ;;  %v41_v7 = vld [vmem:[%s12075_s1 + $0xb8] sm:$0xff] }
  0x11   :  { %3949 = vmatpush1.bf16.msra.mxu0 %v8536_v24  ;;  %3050 = vmatprep.subr.bf16.mxu1 %v8444_v0  ;;  %v8661_v5 = vpack.c.bf16 %v167_v3, %v166_v2  ;;  %v168_v9 = vld [vmem:[%s12075_s1 + $0x4b0] sm:$0xff]  ;;  %v169_v10 = vld [vmem:[%s12075_s1 + $0x4b8] sm:$0xff]  ;;  %v317_v11 = vpack.c.bf16 %v41_v7, %v40_v6  ;;  %v42_v14 = vld [vmem:[%s12075_s1 + $0xc0] sm:$0xff] }
  0x12   :  { %3950 = vmatprep.subr.bf16.mxu0 %v8444_v0  ;;  %v8678_v13 = vpack.c.bf16 %v169_v10, %v168_v9  ;;  %v43_v15 = vld [vmem:[%s12075_s1 + $0xc8] sm:$0xff]  ;;  %v170_v16 = vld [vmem:[%s12075_s1 + $0x4c0] sm:$0xff]  ;;  %v44_v21 = vld [vmem:[%s12075_s1 + $0xd0] sm:$0xff] }
  0x13   :  { %v171_v17 = vld [vmem:[%s12075_s1 + $0x4c8] sm:$0xff]  ;;  %v318_v19 = vpack.c.bf16 %v43_v15, %v42_v14  ;;  %v45_v22 = vld [vmem:[%s12075_s1 + $0xd8] sm:$0xff]  ;;  %v172_v23 = vld [vmem:[%s12075_s1 + $0x4d0] sm:$0xff] }
  0x14   :  { %3051 = vmatpush1.bf16.msra.mxu1 %v310_v29  ;;  %v8695_v20 = vpack.c.bf16 %v171_v17, %v170_v16  ;;  %v173_v25 = vld [vmem:[%s12075_s1 + $0x4d8] sm:$0xff]  ;;  %v319_v26 = vpack.c.bf16 %v45_v22, %v44_v21  ;;  %v46_v28 = vld [vmem:[%s12075_s1 + $0xe0] sm:$0xff]  ;;  %v47_v29 = vld [vmem:[%s12075_s1 + $0xe8] sm:$0xff] }
  0x15   :  { %3951 = vmatpush1.bf16.msra.mxu0 %v8553_v30  ;;  %3052 = vmatprep.subr.bf16.mxu1 %v8444_v0  ;;  %v8712_v27 = vpack.c.bf16 %v173_v25, %v172_v23  ;;  %v174_v31 = vld [vmem:[%s12075_s1 + $0x4e0] sm:$0xff]  ;;  %v175_v32 = vld [vmem:[%s12075_s1 + $0x4e8] sm:$0xff]  ;;  %v320_v33 = vpack.c.bf16 %v47_v29, %v46_v28  ;;  %v49_v37 = vld [vmem:[%s12075_s1 + $0xf8] sm:$0xff] }
  0x16   :  { %3952 = vmatprep.subr.bf16.mxu0 %v8444_v0  ;;  %v8729_v34 = vpack.c.bf16 %v175_v32, %v174_v31  ;;  %v176_v38 = vld [vmem:[%s12075_s1 + $0x4f0] sm:$0xff]  ;;  %v177_v39 = vld [vmem:[%s12075_s1 + $0x4f8] sm:$0xff]  ;;  %v50_v43 = vld [vmem:[%s12075_s1 + $0x100] sm:$0xff] }
  0x17   :  { %v8746_v41 = vpack.c.bf16 %v177_v39, %v176_v38  ;;  %v51_v45 = vld [vmem:[%s12075_s1 + $0x108] sm:$0xff]  ;;  %v7706_v51 = vld [vmem:[%s12076_s0 + $0x94] ss:$72 sps:$4 sm:$0xff]   ;;  %v182_v63 = vld [vmem:[%s12075_s1 + $0x520] sm:$0xff] }
  0x18   :  { %3053 = vmatpush1.bf16.msra.mxu1 %v311_v35  ;;  %v48_v35 = vld [vmem:[%s12075_s1 + $0xf0] sm:$0xff]  ;;  %v179_v46 = vld [vmem:[%s12075_s1 + $0x508] sm:$0xff]  ;;  %v53_v57 = vld [vmem:[%s12075_s1 + $0x118] sm:$0xff] }
  0x19   :  { %3953 = vmatpush1.bf16.msra.mxu0 %v8570_v36  ;;  %3054 = vmatprep.subr.bf16.mxu1 %v8444_v0  ;;  %v321_v40 = vpack.c.bf16 %v49_v37, %v48_v35  ;;  %v7700_v47 = vld [vmem:[%s12076_s0] ss:$72 sps:$4 sm:$0xff]   ;;  %v7708_v52 = vld [vmem:[%s12076_s0 + $0xb4] ss:$72 sps:$4 sm:$0xff]   ;;  %v7712_v6 = vld [vmem:[%s12076_s0 + $0x124] ss:$72 sps:$4 sm:$0xff]  }
  0x1a   :  { %3954 = vmatprep.subr.bf16.mxu0 %v8444_v0  ;;  %v7703_v48 = vld [vmem:[%s12076_s0 + $0x20] ss:$72 sps:$4 sm:$0xff]   ;;  %v180_v54 = vld [vmem:[%s12075_s1 + $0x510] sm:$0xff]  ;;  %v181_v58 = vld [vmem:[%s12075_s1 + $0x518] sm:$0xff] }
  0x1b   :  { %v387_v60 = vpack.c.bf16 %v181_v58, %v180_v54  ;;  %v183_v1 = vld [vmem:[%s12075_s1 + $0x528] sm:$0xff]  ;;  %v54_v2 = vld [vmem:[%s12075_s1 + $0x120] sm:$0xff]  ;;  %v184_v10 = vld [vmem:[%s12075_s1 + $0x530] sm:$0xff] }
  0x1c   :  { %3055 = vmatpush1.bf16.msra.mxu1 %v312_v42  ;;  %v178_v42 = vld [vmem:[%s12075_s1 + $0x500] sm:$0xff]  ;;  %v55_v3 = vld [vmem:[%s12075_s1 + $0x128] sm:$0xff]  ;;  %v388_v7 = vpack.c.bf16 %v183_v1, %v182_v63  ;;  %v56_v15 = vld [vmem:[%s12075_s1 + $0x130] sm:$0xff] }
  0x1d   :  { %3955 = vmatpush1.bf16.msra.mxu0 %v8593_v44  ;;  %3056 = vmatprep.subr.bf16.mxu1 %v8444_v0  ;;  %v386_v53 = vpack.c.bf16 %v179_v46, %v178_v42  ;;  %v7714_v9 = vld [vmem:[%s12076_s0 + $0x144] ss:$72 sps:$4 sm:$0xff]   ;;  %v324_v14 = vpack.c.bf16 %v55_v3, %v54_v2  ;;  %v57_v16 = vld [vmem:[%s12075_s1 + $0x138] sm:$0xff]  ;;  %v7716_v17 = vld [vmem:[%s12076_s0 + $0x120] ss:$72 sps:$4 sm:$0xff]  }
  0x1e   :  { %3956 = vmatprep.subr.bf16.mxu0 %v8444_v0  ;;  %v186_v21 = vld [vmem:[%s12075_s1 + $0x540] sm:$0xff]  ;;  %v187_v22 = vld [vmem:[%s12075_s1 + $0x548] sm:$0xff]  ;;  %v325_v23 = vpack.c.bf16 %v57_v16, %v56_v15  ;;  %v7718_v29 = vld [vmem:[%s12076_s0 + $0x1b4] ss:$72 sps:$4 sm:$0xff]  }
  0x1f   :  { %v58_v25 = vld [vmem:[%s12075_s1 + $0x140] sm:$0xff]  ;;  %v7720_v31 = vld [vmem:[%s12076_s0 + $0x1d4] ss:$72 sps:$4 sm:$0xff]   ;;  %v390_v32 = vpack.c.bf16 %v187_v22, %v186_v21  ;;  %v195_v2 = vld [vmem:[%s12075_s1 + $0x588] sm:$0xff] }
  0x20   :  { %3057 = vmatpush1.bf16.msra.mxu1 %v313_v49  ;;  %v322_v49 = vpack.c.bf16 %v51_v45, %v50_v43  ;;  %v7717_v28 = vld [vmem:[%s12076_s0 + $0x140] ss:$72 sps:$4 sm:$0xff]   ;;  %v189_v35 = vld [vmem:[%s12075_s1 + $0x558] sm:$0xff]  ;;  %v60_v38 = vld [vmem:[%s12075_s1 + $0x150] sm:$0xff] }
  0x21   :  { %3957 = vmatpush1.bf16.msra.mxu0 %v8610_v50  ;;  %3058 = vmatprep.subr.bf16.mxu1 %v8444_v0  ;;  %v61_v39 = vld [vmem:[%s12075_s1 + $0x158] sm:$0xff]  ;;  %v190_v43 = vld [vmem:[%s12075_s1 + $0x560] sm:$0xff]  ;;  %v191_v45 = vld [vmem:[%s12075_s1 + $0x568] sm:$0xff] }
  0x22   :  { %3958 = vmatprep.subr.bf16.mxu0 %v8444_v0  ;;  %v327_v46 = vpack.c.bf16 %v61_v39, %v60_v38  ;;  %v192_v54 = vld [vmem:[%s12075_s1 + $0x570] sm:$0xff]  ;;  %v7729_v63 = vld [vmem:[%s12076_s0 + $0x260] ss:$72 sps:$4 sm:$0xff]  }
  0x23   :  { %v64_v58 = vld [vmem:[%s12075_s1 + $0x170] sm:$0xff]  ;;  %v194_v1 = vld [vmem:[%s12075_s1 + $0x580] sm:$0xff] }
  0x24   :  { %3059 = vmatpush1.bf16.msra.mxu1 %v314_v55  ;;  %v52_v55 = vld [vmem:[%s12075_s1 + $0x110] sm:$0xff]  ;;  %v198_v22 = vld [vmem:[%s12075_s1 + $0x5a0] sm:$0xff] }
  0x25   :  { %3959 = vmatpush1.bf16.msra.mxu0 %v8627_v56  ;;  %3060 = vmatprep.subr.bf16.mxu1 %v8444_v0  ;;  %v323_v59 = vpack.c.bf16 %v53_v57, %v52_v55  ;;  %v193_v55 = vld [vmem:[%s12075_s1 + $0x578] sm:$0xff]  ;;  %v68_v16 = vld [vmem:[%s12075_s1 + $0x190] sm:$0xff] }
  0x26   :  { %3960 = vmatprep.subr.bf16.mxu0 %v8444_v0  ;;  %v72_v38 = vld [vmem:[%s12075_s1 + $0x1b0] sm:$0xff] }
  0x28   :  { %3061 = vmatpush1.bf16.msra.mxu1 %v315_v61  ;;  %v7710_v61 = vld [vmem:[%s12076_s0 + $0x90] ss:$72 sps:$4 sm:$0xff]  }
  0x29   :  { %3961 = vmatpush1.bf16.msra.mxu0 %v8644_v62  ;;  %3062 = vmatprep.subr.bf16.mxu1 %v8444_v0 }
  0x2a   :  { %3962 = vmatprep.subr.bf16.mxu0 %v8444_v0 }
  0x2c   :  { %3063 = vmatpush1.bf16.msra.mxu1 %v316_v4  ;;  %v7711_v4 = vld [vmem:[%s12076_s0 + $0xb0] ss:$72 sps:$4 sm:$0xff]  }
  0x2d   :  { %3963 = vmatpush1.bf16.msra.mxu0 %v8661_v5  ;;  %3064 = vmatprep.subr.bf16.mxu1 %v8444_v0 }
  0x2e   :  { %3964 = vmatprep.subr.bf16.mxu0 %v8444_v0 }
  0x30   :  { %3065 = vmatpush1.bf16.msra.mxu1 %v317_v11  ;;  %v185_v11 = vld [vmem:[%s12075_s1 + $0x538] sm:$0xff] }
  0x31   :  { %3965 = vmatpush1.bf16.msra.mxu0 %v8678_v13  ;;  %3066 = vmatprep.subr.bf16.mxu1 %v8444_v0 }
  0x32   :  { %3966 = vmatprep.subr.bf16.mxu0 %v8444_v0 }
  0x34   :  { %3067 = vmatpush1.bf16.msra.mxu1 %v318_v19  ;;  %v389_v19 = vpack.c.bf16 %v185_v11, %v184_v10  ;;  %v394_v10 = vpack.c.bf16 %v195_v2, %v194_v1  ;;  %v196_v11 = vld [vmem:[%s12075_s1 + $0x590] sm:$0xff] }
  0x35   :  { %3967 = vmatpush1.bf16.msra.mxu0 %v8695_v20  ;;  %3068 = vmatprep.subr.bf16.mxu1 %v8444_v0  ;;  %v7746_v1 = vld [vmem:[%s12076_s0 + $0x3f0] ss:$72 sps:$4 sm:$0xff]  }
  0x36   :  { %3968 = vmatprep.subr.bf16.mxu0 %v8444_v0 }
  0x38   :  { %3069 = vmatpush1.bf16.msra.mxu1 %v319_v26  ;;  %v59_v26 = vld [vmem:[%s12075_s1 + $0x148] sm:$0xff] }
  0x39   :  { %3969 = vmatpush1.bf16.msra.mxu0 %v8712_v27  ;;  %3070 = vmatprep.subr.bf16.mxu1 %v8444_v0  ;;  %v326_v37 = vpack.c.bf16 %v59_v26, %v58_v25  ;;  %v7735_v25 = vld [vmem:[%s12076_s0 + $0x2f0] ss:$72 sps:$4 sm:$0xff]   ;;  %v7736_v26 = vld [vmem:[%s12076_s0 + $0x364] ss:$72 sps:$4 sm:$0xff]  }
  0x3a   :  { %3970 = vmatprep.subr.bf16.mxu0 %v8444_v0 }
  0x3c   :  { %3071 = vmatpush1.bf16.msra.mxu1 %v320_v33  ;;  %v188_v33 = vld [vmem:[%s12075_s1 + $0x550] sm:$0xff] }
  0x3d   :  { %3971 = vmatpush1.bf16.msra.mxu0 %v8729_v34  ;;  %3072 = vmatprep.subr.bf16.mxu1 %v8444_v0  ;;  %v391_v42 = vpack.c.bf16 %v189_v35, %v188_v33  ;;  %v200_v33 = vld [vmem:[%s12075_s1 + $0x5b0] sm:$0xff]  ;;  %v201_v35 = vld [vmem:[%s12075_s1 + $0x5b8] sm:$0xff] }
  0x3e   :  { %3972 = vmatprep.subr.bf16.mxu0 %v8444_v0 }
  0x40   :  { %3073 = vmatpush1.bf16.msra.mxu1 %v321_v40  ;;  %v7722_v40 = vld [vmem:[%s12076_s0 + $0x1b0] ss:$72 sps:$4 sm:$0xff]  }
  0x41   :  { %3973 = vmatpush1.bf16.msra.mxu0 %v8746_v41  ;;  %3267 = vmatprep.subr.bf16.mxu1 %v8444_v0 }
  0x42   :  { %4167 = vmatprep.subr.bf16.mxu0 %v8444_v0 }
  0x43   :  { %3075 = vmatmul.mubr.bf16.vlgmr.msra.gmra.mrb[0].mxu1 %v7700_v47  ;;  %v7723_v47 = vld [vmem:[%s12076_s0 + $0x1d0] ss:$72 sps:$4 sm:$0xff]  }
  0x44   :  { %3975 = vmatmul.mubr.bf16.vlgmr.msra.gmra.mrb[0].mxu0 %v7703_v48  ;;  %3268 = vmatpush1.bf16.msra.mxu1 %v322_v49  ;;  %v62_v48 = vld [vmem:[%s12075_s1 + $0x160] sm:$0xff]  ;;  %v63_v49 = vld [vmem:[%s12075_s1 + $0x168] sm:$0xff] }
  0x45   :  { %4168 = vmatpush1.bf16.msra.mxu0 %v386_v53  ;;  %3082 = vmatprep.mubr.bf16.mxu1 %v7706_v51  ;;  %v7724_v51 = vld [vmem:[%s12076_s0 + $0x244] ss:$72 sps:$4 sm:$0xff]   ;;  %v392_v53 = vpack.c.bf16 %v191_v45, %v190_v43  ;;  %v328_v57 = vpack.c.bf16 %v63_v49, %v62_v48  ;;  %v397_v43 = vpack.c.bf16 %v201_v35, %v200_v33  ;;  %v7741_v48 = vld [vmem:[%s12076_s0 + $0x380] ss:$72 sps:$4 sm:$0xff]   ;;  %v7742_v49 = vld [vmem:[%s12076_s0 + $0x3f4] ss:$72 sps:$4 sm:$0xff]  }
  0x46   :  { %4169 = vmatprep.subr.bf16.mxu0 %v8444_v0  ;;  %3982 = vmatprep.mubr.bf16.mxu0 %v7708_v52  ;;  %v7726_v52 = vld [vmem:[%s12076_s0 + $0x264] ss:$72 sps:$4 sm:$0xff]   ;;  %v7764_v35 = vld [vmem:[%s12076_s0 + $0x5a0] ss:$72 sps:$4 sm:$0xff]  }
  0x47   :  { %3269 = vmatprep.subr.bf16.mxu1 %v8444_v0  ;;  %v202_v45 = vld [vmem:[%s12075_s1 + $0x5c0] sm:$0xff] }
  0x48   :  { %3270 = vmatpush1.bf16.msra.mxu1 %v323_v59  ;;  %v65_v59 = vld [vmem:[%s12075_s1 + $0x178] sm:$0xff]  ;;  %v7762_v33 = vld [vmem:[%s12076_s0 + $0x5c4] ss:$72 sps:$4 sm:$0xff]  }
  0x49   :  { %4170 = vmatpush1.bf16.msra.mxu0 %v387_v60  ;;  %3271 = vmatprep.subr.bf16.mxu1 %v8444_v0  ;;  %v7728_v60 = vld [vmem:[%s12076_s0 + $0x240] ss:$72 sps:$4 sm:$0xff]   ;;  %v329_v3 = vpack.c.bf16 %v65_v59, %v64_v58  ;;  %v76_v58 = vld [vmem:[%s12075_s1 + $0x1d0] sm:$0xff] }
  0x4a   :  { %4171 = vmatprep.subr.bf16.mxu0 %v8444_v0 }
  0x4b   :  { %3083 = vmatmul.mubr.bf16.gmra.mrb[4].mxu1 %v7710_v61  ;;  %v393_v61 = vpack.c.bf16 %v193_v55, %v192_v54  ;;  %v204_v54 = vld [vmem:[%s12075_s1 + $0x5d0] sm:$0xff]  ;;  %v205_v55 = vld [vmem:[%s12075_s1 + $0x5d8] sm:$0xff] }
  0x4c   :  { %3983 = vmatmul.mubr.bf16.gmra.mrb[4].mxu0 %v7711_v4  ;;  %3090 = vmatprep.mubr.bf16.mxu1 %v7712_v6  ;;  %v66_v4 = vld [vmem:[%s12075_s1 + $0x180] sm:$0xff]  ;;  %v67_v6 = vld [vmem:[%s12075_s1 + $0x188] sm:$0xff]  ;;  %v399_v2 = vpack.c.bf16 %v205_v55, %v204_v54  ;;  %v213_v55 = vld [vmem:[%s12075_s1 + $0x618] sm:$0xff] }
  0x4d   :  { %4172 = vmatpush1.bf16.msra.mxu0 %v388_v7  ;;  %3990 = vmatprep.mubr.bf16.mxu0 %v7714_v9  ;;  %v7730_v7 = vld [vmem:[%s12076_s0 + $0x2d4] ss:$72 sps:$4 sm:$0xff]   ;;  %v330_v15 = vpack.c.bf16 %v67_v6, %v66_v4  ;;  %v79_v4 = vld [vmem:[%s12075_s1 + $0x1e8] sm:$0xff]  ;;  %v7747_v6 = vld [vmem:[%s12076_s0 + $0x410] ss:$72 sps:$4 sm:$0xff]  }
  0x4e   :  { %4173 = vmatprep.subr.bf16.mxu0 %v8444_v0  ;;  %3272 = vmatpush1.bf16.msra.mxu1 %v324_v14  ;;  %v7732_v9 = vld [vmem:[%s12076_s0 + $0x2f4] ss:$72 sps:$4 sm:$0xff]  }
  0x4f   :  { %3273 = vmatprep.subr.bf16.mxu1 %v8444_v0  ;;  %v197_v14 = vld [vmem:[%s12075_s1 + $0x598] sm:$0xff] }
  0x50   :  { %v395_v21 = vpack.c.bf16 %v197_v14, %v196_v11  ;;  %v208_v11 = vld [vmem:[%s12075_s1 + $0x5f0] sm:$0xff] }
  0x51   :  { %4174 = vmatpush1.bf16.msra.mxu0 %v389_v19  ;;  %v7734_v19 = vld [vmem:[%s12076_s0 + $0x2d0] ss:$72 sps:$4 sm:$0xff]  }
  0x52   :  { %4175 = vmatprep.subr.bf16.mxu0 %v8444_v0  ;;  %3274 = vmatpush1.bf16.msra.mxu1 %v325_v23  ;;  %v199_v23 = vld [vmem:[%s12075_s1 + $0x5a8] sm:$0xff] }
  0x53   :  { %3091 = vmatmul.mubr.bf16.gmra.mrb[8].mxu1 %v7716_v17  ;;  %3275 = vmatprep.subr.bf16.mxu1 %v8444_v0  ;;  %v69_v17 = vld [vmem:[%s12075_s1 + $0x198] sm:$0xff] }
  0x54   :  { %3991 = vmatmul.mubr.bf16.gmra.mrb[8].mxu0 %v7717_v28  ;;  %3098 = vmatprep.mubr.bf16.mxu1 %v7718_v29  ;;  %v331_v28 = vpack.c.bf16 %v69_v17, %v68_v16  ;;  %v70_v29 = vld [vmem:[%s12075_s1 + $0x1a0] sm:$0xff]  ;;  %v80_v17 = vld [vmem:[%s12075_s1 + $0x1f0] sm:$0xff] }
  0x55   :  { %3998 = vmatprep.mubr.bf16.mxu0 %v7720_v31  ;;  %4176 = vmatpush1.bf16.msra.mxu0 %v390_v32  ;;  %v7738_v31 = vld [vmem:[%s12076_s0 + $0x384] ss:$72 sps:$4 sm:$0xff]  }
  0x56   :  { %4177 = vmatprep.subr.bf16.mxu0 %v8444_v0  ;;  %3276 = vmatpush1.bf16.msra.mxu1 %v326_v37  ;;  %v71_v32 = vld [vmem:[%s12075_s1 + $0x1a8] sm:$0xff]  ;;  %v396_v37 = vpack.c.bf16 %v199_v23, %v198_v22 }
  0x57   :  { %3277 = vmatprep.subr.bf16.mxu1 %v8444_v0  ;;  %v332_v39 = vpack.c.bf16 %v71_v32, %v70_v29  ;;  %v7753_v23 = vld [vmem:[%s12076_s0 + $0x4a0] ss:$72 sps:$4 sm:$0xff]   ;;  %v7758_v29 = vld [vmem:[%s12076_s0 + $0x510] ss:$72 sps:$4 sm:$0xff]   ;;  %v7760_v32 = vld [vmem:[%s12076_s0 + $0x5a4] ss:$72 sps:$4 sm:$0xff]  }
  0x59   :  { %4178 = vmatpush1.bf16.msra.mxu0 %v391_v42  ;;  %v7740_v42 = vld [vmem:[%s12076_s0 + $0x360] ss:$72 sps:$4 sm:$0xff]  }
  0x5a   :  { %4179 = vmatprep.subr.bf16.mxu0 %v8444_v0  ;;  %3278 = vmatpush1.bf16.msra.mxu1 %v327_v46  ;;  %v203_v46 = vld [vmem:[%s12075_s1 + $0x5c8] sm:$0xff] }
  0x5b   :  { %3099 = vmatmul.mubr.bf16.gmra.mrb[12].mxu1 %v7722_v40  ;;  %3279 = vmatprep.subr.bf16.mxu1 %v8444_v0  ;;  %v73_v40 = vld [vmem:[%s12075_s1 + $0x1b8] sm:$0xff] }
  0x5c   :  { %3999 = vmatmul.mubr.bf16.gmra.mrb[12].mxu0 %v7723_v47  ;;  %3106 = vmatprep.mubr.bf16.mxu1 %v7724_v51  ;;  %v74_v47 = vld [vmem:[%s12075_s1 + $0x1c0] sm:$0xff]  ;;  %v333_v51 = vpack.c.bf16 %v73_v40, %v72_v38  ;;  %v7766_v38 = vld [vmem:[%s12076_s0 + $0x634] ss:$72 sps:$4 sm:$0xff]   ;;  %v7770_v40 = vld [vmem:[%s12076_s0 + $0x630] ss:$72 sps:$4 sm:$0xff]  }
  0x5d   :  { %4006 = vmatprep.mubr.bf16.mxu0 %v7726_v52  ;;  %4180 = vmatpush1.bf16.msra.mxu0 %v392_v53  ;;  %v75_v52 = vld [vmem:[%s12075_s1 + $0x1c8] sm:$0xff]  ;;  %v7744_v53 = vld [vmem:[%s12076_s0 + $0x414] ss:$72 sps:$4 sm:$0xff]  }
  0x5e   :  { %4181 = vmatprep.subr.bf16.mxu0 %v8444_v0  ;;  %3280 = vmatpush1.bf16.msra.mxu1 %v328_v57  ;;  %v398_v57 = vpack.c.bf16 %v203_v46, %v202_v45  ;;  %v334_v59 = vpack.c.bf16 %v75_v52, %v74_v47  ;;  %v7776_v45 = vld [vmem:[%s12076_s0 + $0x2c] ss:$72 sps:$4 sm:$0xff]   ;;  %v7777_v46 = vld [vmem:[%s12076_s0 + $0x6c0] ss:$72 sps:$4 sm:$0xff]   ;;  %v7780_v52 = vld [vmem:[%s12076_s0 + $0xbc] ss:$72 sps:$4 sm:$0xff]  }
  0x5f   :  { %3281 = vmatprep.subr.bf16.mxu1 %v8444_v0  ;;  %v210_v47 = vld [vmem:[%s12075_s1 + $0x600] sm:$0xff] }
  0x61   :  { %4182 = vmatpush1.bf16.msra.mxu0 %v393_v61  ;;  %v206_v61 = vld [vmem:[%s12075_s1 + $0x5e0] sm:$0xff] }
  0x62   :  { %4183 = vmatprep.subr.bf16.mxu0 %v8444_v0  ;;  %3282 = vmatpush1.bf16.msra.mxu1 %v329_v3  ;;  %v78_v3 = vld [vmem:[%s12075_s1 + $0x1e0] sm:$0xff] }
  0x63   :  { %3107 = vmatmul.mubr.bf16.gmra.mrb[16].mxu1 %v7728_v60  ;;  %3283 = vmatprep.subr.bf16.mxu1 %v8444_v0  ;;  %v77_v60 = vld [vmem:[%s12075_s1 + $0x1d8] sm:$0xff]  ;;  %v336_v16 = vpack.c.bf16 %v79_v4, %v78_v3 }
  0x64   :  { %4007 = vmatmul.mubr.bf16.gmra.mrb[16].mxu0 %v7729_v63  ;;  %3114 = vmatprep.mubr.bf16.mxu1 %v7730_v7  ;;  %v207_v63 = vld [vmem:[%s12075_s1 + $0x5e8] sm:$0xff]  ;;  %v217_v4 = vld [vmem:[%s12075_s1 + $0x638] sm:$0xff] }
  0x65   :  { %4014 = vmatprep.mubr.bf16.mxu0 %v7732_v9  ;;  %4184 = vmatpush1.bf16.msra.mxu0 %v394_v10  ;;  %v7748_v7 = vld [vmem:[%s12076_s0 + $0x484] ss:$72 sps:$4 sm:$0xff]   ;;  %v335_v9 = vpack.c.bf16 %v77_v60, %v76_v58  ;;  %v400_v14 = vpack.c.bf16 %v207_v63, %v206_v61  ;;  %v7783_v61 = vld [vmem:[%s12076_s0 + $0xb8] ss:$72 sps:$4 sm:$0xff]  }
  0x66   :  { %4185 = vmatprep.subr.bf16.mxu0 %v8444_v0  ;;  %3284 = vmatpush1.bf16.msra.mxu1 %v330_v15  ;;  %v7750_v10 = vld [vmem:[%s12076_s0 + $0x4a4] ss:$72 sps:$4 sm:$0xff]   ;;  %v209_v15 = vld [vmem:[%s12075_s1 + $0x5f8] sm:$0xff] }
  0x67   :  { %3285 = vmatprep.subr.bf16.mxu1 %v8444_v0  ;;  %v401_v22 = vpack.c.bf16 %v209_v15, %v208_v11  ;;  %v215_v60 = vld [vmem:[%s12075_s1 + $0x628] sm:$0xff]  ;;  %v7792_v15 = vld [vmem:[%s12076_s0 + $0x1dc] ss:$72 sps:$4 sm:$0xff]  }
  0x68   :  { %v7784_v63 = vld [vmem:[%s12076_s0 + $0x7e4] ss:$72 sps:$4 sm:$0xff]   ;;  %v7789_v11 = vld [vmem:[%s12076_s0 + $0x148] ss:$72 sps:$4 sm:$0xff]  }
  0x69   :  { %4186 = vmatpush1.bf16.msra.mxu0 %v395_v21  ;;  %v7752_v21 = vld [vmem:[%s12076_s0 + $0x480] ss:$72 sps:$4 sm:$0xff]  }
  0x6a   :  { %4187 = vmatprep.subr.bf16.mxu0 %v8444_v0  ;;  %3286 = vmatpush1.bf16.msra.mxu1 %v331_v28  ;;  %v7756_v28 = vld [vmem:[%s12076_s0 + $0x534] ss:$72 sps:$4 sm:$0xff]  }
  0x6b   :  { %3115 = vmatmul.mubr.bf16.gmra.mrb[20].mxu1 %v7734_v19  ;;  %3287 = vmatprep.subr.bf16.mxu1 %v8444_v0  ;;  %v81_v19 = vld [vmem:[%s12075_s1 + $0x1f8] sm:$0xff] }
  0x6c   :  { %4015 = vmatmul.mubr.bf16.gmra.mrb[20].mxu0 %v7735_v25  ;;  %3122 = vmatprep.mubr.bf16.mxu1 %v7736_v26  ;;  %v7754_v25 = vld [vmem:[%s12076_s0 + $0x514] ss:$72 sps:$4 sm:$0xff]   ;;  %v337_v26 = vpack.c.bf16 %v81_v19, %v80_v17 }
  0x6d   :  { %4022 = vmatprep.mubr.bf16.mxu0 %v7738_v31  ;;  %4188 = vmatpush1.bf16.msra.mxu0 %v396_v37  ;;  %v7759_v31 = vld [vmem:[%s12076_s0 + $0x530] ss:$72 sps:$4 sm:$0xff]   ;;  %v7765_v37 = vld [vmem:[%s12076_s0 + $0x5c0] ss:$72 sps:$4 sm:$0xff]  }
  0x6e   :  { %4189 = vmatprep.subr.bf16.mxu0 %v8444_v0  ;;  %3288 = vmatpush1.bf16.msra.mxu1 %v332_v39  ;;  %v7768_v39 = vld [vmem:[%s12076_s0 + $0x654] ss:$72 sps:$4 sm:$0xff]  }
  0x6f   :  { %3289 = vmatprep.subr.bf16.mxu1 %v8444_v0  ;;  %v221_v19 = vld [vmem:[%s12075_s1 + $0x658] sm:$0xff] }
  0x71   :  { %4190 = vmatpush1.bf16.msra.mxu0 %v397_v43  ;;  %v7772_v43 = vld [vmem:[%s12076_s0 + $0x6c4] ss:$72 sps:$4 sm:$0xff]  }
  0x72   :  { %4191 = vmatprep.subr.bf16.mxu0 %v8444_v0  ;;  %3290 = vmatpush1.bf16.msra.mxu1 %v333_v51  ;;  %v7778_v51 = vld [vmem:[%s12076_s0 + $0x754] ss:$72 sps:$4 sm:$0xff]  }
  0x73   :  { %3123 = vmatmul.mubr.bf16.gmra.mrb[24].mxu1 %v7740_v42  ;;  %3291 = vmatprep.subr.bf16.mxu1 %v8444_v0  ;;  %v7771_v42 = vld [vmem:[%s12076_s0 + $0x650] ss:$72 sps:$4 sm:$0xff]  }
  0x74   :  { %4023 = vmatmul.mubr.bf16.gmra.mrb[24].mxu0 %v7741_v48  ;;  %3130 = vmatprep.mubr.bf16.mxu1 %v7742_v49  ;;  %v211_v48 = vld [vmem:[%s12075_s1 + $0x608] sm:$0xff] }
  0x75   :  { %4030 = vmatprep.mubr.bf16.mxu0 %v7744_v53  ;;  %4192 = vmatpush1.bf16.msra.mxu0 %v398_v57  ;;  %v7774_v49 = vld [vmem:[%s12076_s0 + $0x28] ss:$72 sps:$4 sm:$0xff]   ;;  %v402_v54 = vpack.c.bf16 %v211_v48, %v210_v47  ;;  %v229_v47 = vld [vmem:[%s12075_s1 + $0x698] sm:$0xff]  ;;  %v230_v48 = vld [vmem:[%s12075_s1 + $0x6a0] sm:$0xff] }
  0x76   :  { %4193 = vmatprep.subr.bf16.mxu0 %v8444_v0  ;;  %3292 = vmatpush1.bf16.msra.mxu1 %v334_v59  ;;  %v212_v53 = vld [vmem:[%s12075_s1 + $0x610] sm:$0xff]  ;;  %v214_v59 = vld [vmem:[%s12075_s1 + $0x620] sm:$0xff] }
  0x77   :  { %3293 = vmatprep.subr.bf16.mxu1 %v8444_v0  ;;  %v7782_v57 = vld [vmem:[%s12076_s0 + $0x750] ss:$72 sps:$4 sm:$0xff]   ;;  %v403_v58 = vpack.c.bf16 %v213_v55, %v212_v53  ;;  %v404_v3 = vpack.c.bf16 %v215_v60, %v214_v59  ;;  %v7810_v55 = vld [vmem:[%s12076_s0 + $0x38c] ss:$72 sps:$4 sm:$0xff]   ;;  %v7812_v60 = vld [vmem:[%s12076_s0 + $0xa20] ss:$72 sps:$4 sm:$0xff]  }
  0x78   :  { %v7807_v53 = vld [vmem:[%s12076_s0 + $0x2f8] ss:$72 sps:$4 sm:$0xff]  }
  0x79   :  { %4194 = vmatpush1.bf16.msra.mxu0 %v399_v2  ;;  %v216_v2 = vld [vmem:[%s12075_s1 + $0x630] sm:$0xff]  ;;  %v233_v59 = vld [vmem:[%s12075_s1 + $0x6b8] sm:$0xff] }
  0x7a   :  { %4195 = vmatprep.subr.bf16.mxu0 %v8444_v0  ;;  %3294 = vmatpush1.bf16.msra.mxu1 %v335_v9  ;;  %v405_v9 = vpack.c.bf16 %v217_v4, %v216_v2  ;;  %v7814_v2 = vld [vmem:[%s12076_s0 + $0xab4] ss:$72 sps:$4 sm:$0xff]  }
  0x7b   :  { %3131 = vmatmul.mubr.bf16.gmra.mrb[28].mxu1 %v7746_v1  ;;  %3295 = vmatprep.subr.bf16.mxu1 %v8444_v0  ;;  %v7786_v1 = vld [vmem:[%s12076_s0 + $0x14c] ss:$72 sps:$4 sm:$0xff]   ;;  %v7816_v4 = vld [vmem:[%s12076_s0 + $0x41c] ss:$72 sps:$4 sm:$0xff]  }
  0x7c   :  { %4031 = vmatmul.mubr.bf16.gmra.mrb[28].mxu0 %v7747_v6  ;;  %3138 = vmatprep.mubr.bf16.mxu1 %v7748_v7  ;;  %v218_v6 = vld [vmem:[%s12075_s1 + $0x640] sm:$0xff] }
  0x7d   :  { %4038 = vmatprep.mubr.bf16.mxu0 %v7750_v10  ;;  %4196 = vmatpush1.bf16.msra.mxu0 %v400_v14  ;;  %v7788_v7 = vld [vmem:[%s12076_s0 + $0x7e0] ss:$72 sps:$4 sm:$0xff]   ;;  %v7790_v14 = vld [vmem:[%s12076_s0 + $0x874] ss:$72 sps:$4 sm:$0xff]  }
  0x7e   :  { %4197 = vmatprep.subr.bf16.mxu0 %v8444_v0  ;;  %3296 = vmatpush1.bf16.msra.mxu1 %v336_v16  ;;  %v219_v10 = vld [vmem:[%s12075_s1 + $0x648] sm:$0xff]  ;;  %v220_v16 = vld [vmem:[%s12075_s1 + $0x650] sm:$0xff] }
  0x7f   :  { %3297 = vmatprep.subr.bf16.mxu1 %v8444_v0  ;;  %v406_v17 = vpack.c.bf16 %v219_v10, %v218_v6  ;;  %v236_v6 = vld [vmem:[%s12075_s1 + $0x6d0] sm:$0xff] }
  0x80   :  { %v7818_v10 = vld [vmem:[%s12076_s0 + $0xab0] ss:$72 sps:$4 sm:$0xff]  }
  0x81   :  { %4198 = vmatpush1.bf16.msra.mxu0 %v401_v22  ;;  %v407_v22 = vpack.c.bf16 %v221_v19, %v220_v16  ;;  %v7819_v16 = vld [vmem:[%s12076_s0 + $0x418] ss:$72 sps:$4 sm:$0xff]   ;;  %v7822_v19 = vld [vmem:[%s12076_s0 + $0x4ac] ss:$72 sps:$4 sm:$0xff]  }
  0x82   :  { %4392 = vmatprep.subr.bf16.mxu0 %v8444_v0  ;;  %3298 = vmatpush1.bf16.msra.mxu1 %v337_v26  ;;  %v7796_v26 = vld [vmem:[%s12076_s0 + $0x904] ss:$72 sps:$4 sm:$0xff]  }
  0x83   :  { %3139 = vmatmul.mubr.bf16.gmra.mrb[32].mxu1 %v7752_v21  ;;  %3492 = vmatprep.subr.bf16.mxu1 %v8444_v0  ;;  %v7794_v21 = vld [vmem:[%s12076_s0 + $0x870] ss:$72 sps:$4 sm:$0xff]  }
  0x84   :  { %4039 = vmatmul.mubr.bf16.gmra.mrb[32].mxu0 %v7753_v23  ;;  %3146 = vmatprep.mubr.bf16.mxu1 %v7754_v25  ;;  %v222_v23 = vld [vmem:[%s12075_s1 + $0x660] sm:$0xff] }
  0x85   :  { %4046 = vmatprep.mubr.bf16.mxu0 %v7756_v28  ;;  %v7795_v25 = vld [vmem:[%s12076_s0 + $0x1d8] ss:$72 sps:$4 sm:$0xff]   ;;  %v223_v28 = vld [vmem:[%s12075_s1 + $0x668] sm:$0xff] }
  0x8b   :  { %3147 = vmatmul.mubr.bf16.gmra.mrb[36].mxu1 %v7758_v29  ;;  %v7798_v29 = vld [vmem:[%s12076_s0 + $0x26c] ss:$72 sps:$4 sm:$0xff]  }
  0x8c   :  { %4047 = vmatmul.mubr.bf16.gmra.mrb[36].mxu0 %v7759_v31  ;;  %3154 = vmatprep.mubr.bf16.mxu1 %v7760_v32  ;;  %v224_v31 = vld [vmem:[%s12075_s1 + $0x670] sm:$0xff]  ;;  %v408_v32 = vpack.c.bf16 %v223_v28, %v222_v23  ;;  %v241_v23 = vld [vmem:[%s12075_s1 + $0x6f8] sm:$0xff] }
  0x8d   :  { %4054 = vmatprep.mubr.bf16.mxu0 %v7762_v33  ;;  %v225_v33 = vld [vmem:[%s12075_s1 + $0x678] sm:$0xff]  ;;  %v7825_v28 = vld [vmem:[%s12076_s0 + $0x4a8] ss:$72 sps:$4 sm:$0xff]  }
  0x93   :  { %3155 = vmatmul.mubr.bf16.gmra.mrb[40].mxu1 %v7764_v35  ;;  %v7800_v35 = vld [vmem:[%s12076_s0 + $0x900] ss:$72 sps:$4 sm:$0xff]  }
  0x94   :  { %4055 = vmatmul.mubr.bf16.gmra.mrb[40].mxu0 %v7765_v37  ;;  %3162 = vmatprep.mubr.bf16.mxu1 %v7766_v38  ;;  %v409_v37 = vpack.c.bf16 %v225_v33, %v224_v31  ;;  %v226_v38 = vld [vmem:[%s12075_s1 + $0x680] sm:$0xff] }
  0x95   :  { %4062 = vmatprep.mubr.bf16.mxu0 %v7768_v39  ;;  %v227_v39 = vld [vmem:[%s12075_s1 + $0x688] sm:$0xff]  ;;  %v7828_v31 = vld [vmem:[%s12076_s0 + $0x53c] ss:$72 sps:$4 sm:$0xff]   ;;  %v7831_v33 = vld [vmem:[%s12076_s0 + $0x538] ss:$72 sps:$4 sm:$0xff]  }
  0x9b   :  { %3163 = vmatmul.mubr.bf16.gmra.mrb[44].mxu1 %v7770_v40  ;;  %v7801_v40 = vld [vmem:[%s12076_s0 + $0x268] ss:$72 sps:$4 sm:$0xff]  }
  0x9c   :  { %4063 = vmatmul.mubr.bf16.gmra.mrb[44].mxu0 %v7771_v42  ;;  %3170 = vmatprep.mubr.bf16.mxu1 %v7772_v43  ;;  %v7802_v42 = vld [vmem:[%s12076_s0 + $0x994] ss:$72 sps:$4 sm:$0xff]  }
  0x9d   :  { %4199 = vmatprep.mubr.bf16.mxu0 %v7776_v45  ;;  %v7804_v43 = vld [vmem:[%s12076_s0 + $0x2fc] ss:$72 sps:$4 sm:$0xff]   ;;  %v228_v45 = vld [vmem:[%s12075_s1 + $0x690] sm:$0xff] }
  0xa3   :  { %3171 = vmatmul.mubr.bf16.gmra.mrb[48].mxu1 %v7777_v46  ;;  %v410_v46 = vpack.c.bf16 %v227_v39, %v226_v38  ;;  %v7836_v38 = vld [vmem:[%s12076_s0 + $0xc60] ss:$72 sps:$4 sm:$0xff]  }
  0xa4   :  { %4200 = vmatmul.mubr.bf16.vlgmr.msra.gmra.mrb[0].mxu0 %v7774_v49  ;;  %3178 = vmatprep.mubr.bf16.mxu1 %v7778_v51  ;;  %v7806_v49 = vld [vmem:[%s12076_s0 + $0x990] ss:$72 sps:$4 sm:$0xff]   ;;  %v411_v51 = vpack.c.bf16 %v229_v47, %v228_v45  ;;  %v7847_v47 = vld [vmem:[%s12076_s0 + $0x6ec] ss:$72 sps:$4 sm:$0xff]  }
  0xa5   :  { %4393 = vmatpush1.bf16.msra.mxu0 %v402_v54  ;;  %4207 = vmatprep.mubr.bf16.mxu0 %v7780_v52  ;;  %v231_v52 = vld [vmem:[%s12075_s1 + $0x6a8] sm:$0xff]  ;;  %v7843_v45 = vld [vmem:[%s12076_s0 + $0x658] ss:$72 sps:$4 sm:$0xff]  }
  0xa6   :  { %4394 = vmatprep.subr.bf16.mxu0 %v8444_v0  ;;  %v7808_v54 = vld [vmem:[%s12076_s0 + $0xa24] ss:$72 sps:$4 sm:$0xff]   ;;  %v7837_v39 = vld [vmem:[%s12076_s0 + $0x5c8] ss:$72 sps:$4 sm:$0xff]  }
  0xa9   :  { %4395 = vmatpush1.bf16.msra.mxu0 %v403_v58  ;;  %v412_v58 = vpack.c.bf16 %v231_v52, %v230_v48  ;;  %v7844_v48 = vld [vmem:[%s12076_s0 + $0x8] ss:$72 sps:$4 sm:$0xff]  }
  0xaa   :  { %4396 = vmatprep.subr.bf16.mxu0 %v8444_v0  ;;  %v7849_v52 = vld [vmem:[%s12076_s0 + $0x6e8] ss:$72 sps:$4 sm:$0xff]  }
  0xab   :  { %3179 = vmatmul.mubr.bf16.gmra.mrb[52].mxu1 %v7782_v57  ;;  %v232_v57 = vld [vmem:[%s12075_s1 + $0x6b0] sm:$0xff] }
  0xac   :  { %4208 = vmatmul.mubr.bf16.gmra.mrb[4].mxu0 %v7783_v61  ;;  %3186 = vmatprep.mubr.bf16.mxu1 %v7784_v63  ;;  %v413_v61 = vpack.c.bf16 %v233_v59, %v232_v57  ;;  %v234_v63 = vld [vmem:[%s12075_s1 + $0x6c0] sm:$0xff]  ;;  %v85_v57 = vld [vmem:[%s12075_s1 + $0x218] sm:$0xff] }
  0xad   :  { %4215 = vmatprep.mubr.bf16.mxu0 %v7786_v1  ;;  %4397 = vmatpush1.bf16.msra.mxu0 %v404_v3  ;;  %v7813_v1 = vld [vmem:[%s12076_s0 + $0x388] ss:$72 sps:$4 sm:$0xff]  }
  0xae   :  { %4398 = vmatprep.subr.bf16.mxu0 %v8444_v0  ;;  %v235_v3 = vld [vmem:[%s12075_s1 + $0x6c8] sm:$0xff] }
  0xb1   :  { %4399 = vmatpush1.bf16.msra.mxu0 %v405_v9  ;;  %v237_v9 = vld [vmem:[%s12075_s1 + $0x6d8] sm:$0xff] }
  0xb2   :  { %4400 = vmatprep.subr.bf16.mxu0 %v8444_v0 }
  0xb3   :  { %3187 = vmatmul.mubr.bf16.gmra.mrb[56].mxu1 %v7788_v7  ;;  %v414_v7 = vpack.c.bf16 %v235_v3, %v234_v63  ;;  %v87_v63 = vld [vmem:[%s12075_s1 + $0x228] sm:$0xff] }
  0xb4   :  { %4216 = vmatmul.mubr.bf16.gmra.mrb[8].mxu0 %v7789_v11  ;;  %3194 = vmatprep.mubr.bf16.mxu1 %v7790_v14  ;;  %v415_v11 = vpack.c.bf16 %v237_v9, %v236_v6  ;;  %v238_v14 = vld [vmem:[%s12075_s1 + $0x6e0] sm:$0xff]  ;;  %v7858_v3 = vld [vmem:[%s12076_s0 + $0x80c] ss:$72 sps:$4 sm:$0xff]  }
  0xb5   :  { %4223 = vmatprep.mubr.bf16.mxu0 %v7792_v15  ;;  %4401 = vmatpush1.bf16.msra.mxu0 %v406_v17  ;;  %v239_v15 = vld [vmem:[%s12075_s1 + $0x6e8] sm:$0xff]  ;;  %v88_v6 = vld [vmem:[%s12075_s1 + $0x230] sm:$0xff] }
  0xb6   :  { %4402 = vmatprep.subr.bf16.mxu0 %v8444_v0  ;;  %v7820_v17 = vld [vmem:[%s12076_s0 + $0xb44] ss:$72 sps:$4 sm:$0xff]  }
  0xb9   :  { %4403 = vmatpush1.bf16.msra.mxu0 %v407_v22  ;;  %v416_v22 = vpack.c.bf16 %v239_v15, %v238_v14  ;;  %v7860_v14 = vld [vmem:[%s12076_s0 + $0x128] ss:$72 sps:$4 sm:$0xff]  }
  0xba   :  { %4404 = vmatprep.subr.bf16.mxu0 %v8444_v0  ;;  %v7861_v15 = vld [vmem:[%s12076_s0 + $0x808] ss:$72 sps:$4 sm:$0xff]  }
  0xbb   :  { %3195 = vmatmul.mubr.bf16.gmra.mrb[60].mxu1 %v7794_v21  ;;  %v240_v21 = vld [vmem:[%s12075_s1 + $0x6f0] sm:$0xff] }
  0xbc   :  { %4224 = vmatmul.mubr.bf16.gmra.mrb[12].mxu0 %v7795_v25  ;;  %3202 = vmatprep.mubr.bf16.mxu1 %v7796_v26  ;;  %v7824_v25 = vld [vmem:[%s12076_s0 + $0xb40] ss:$72 sps:$4 sm:$0xff]   ;;  %v417_v26 = vpack.c.bf16 %v241_v23, %v240_v21  ;;  %v92_v21 = vld [vmem:[%s12075_s1 + $0x250] sm:$0xff] }
  0xbd   :  { %4231 = vmatprep.mubr.bf16.mxu0 %v7798_v29  ;;  %4405 = vmatpush1.bf16.msra.mxu0 %v408_v32  ;;  %v7826_v29 = vld [vmem:[%s12076_s0 + $0xbd4] ss:$72 sps:$4 sm:$0xff]   ;;  %v7830_v32 = vld [vmem:[%s12076_s0 + $0xbd0] ss:$72 sps:$4 sm:$0xff]  }
  0xbe   :  { %4406 = vmatprep.subr.bf16.mxu0 %v8444_v0 }
  0xc1   :  { %4407 = vmatpush1.bf16.msra.mxu0 %v409_v37  ;;  %v7834_v37 = vld [vmem:[%s12076_s0 + $0x5cc] ss:$72 sps:$4 sm:$0xff]  }
  0xc2   :  { %4408 = vmatprep.subr.bf16.mxu0 %v8444_v0 }
  0xc3   :  { %3203 = vmatmul.mubr.bf16.gmra.mrb[64].mxu1 %v7800_v35  ;;  %v7832_v35 = vld [vmem:[%s12076_s0 + $0xc64] ss:$72 sps:$4 sm:$0xff]  }
  0xc4   :  { %4232 = vmatmul.mubr.bf16.gmra.mrb[16].mxu0 %v7801_v40  ;;  %3210 = vmatprep.mubr.bf16.mxu1 %v7802_v42  ;;  %v7838_v40 = vld [vmem:[%s12076_s0 + $0xcf4] ss:$72 sps:$4 sm:$0xff]  }
  0xc5   :  { %4239 = vmatprep.mubr.bf16.mxu0 %v7804_v43  ;;  %4409 = vmatpush1.bf16.msra.mxu0 %v410_v46  ;;  %v7840_v42 = vld [vmem:[%s12076_s0 + $0x65c] ss:$72 sps:$4 sm:$0xff]   ;;  %v7842_v43 = vld [vmem:[%s12076_s0 + $0xcf0] ss:$72 sps:$4 sm:$0xff]   ;;  %v7846_v46 = vld [vmem:[%s12076_s0 + $0xc] ss:$72 sps:$4 sm:$0xff]  }
  0xc6   :  { %4410 = vmatprep.subr.bf16.mxu0 %v8444_v0 }
  0xc9   :  { %4411 = vmatpush1.bf16.msra.mxu0 %v411_v51  ;;  %v83_v51 = vld [vmem:[%s12075_s1 + $0x208] sm:$0xff] }
  0xca   :  { %4412 = vmatprep.subr.bf16.mxu0 %v8444_v0 }
  0xcb   :  { %3211 = vmatmul.mubr.bf16.gmra.mrb[68].mxu1 %v7806_v49  ;;  %v82_v49 = vld [vmem:[%s12075_s1 + $0x200] sm:$0xff] }
  0xcc   :  { %4240 = vmatmul.mubr.bf16.gmra.mrb[20].mxu0 %v7807_v53  ;;  %3218 = vmatprep.mubr.bf16.mxu1 %v7808_v54  ;;  %v7850_v53 = vld [vmem:[%s12076_s0 + $0x9c] ss:$72 sps:$4 sm:$0xff]  }
  0xcd   :  { %4247 = vmatprep.mubr.bf16.mxu0 %v7810_v55  ;;  %4413 = vmatpush1.bf16.msra.mxu0 %v412_v58  ;;  %v7852_v54 = vld [vmem:[%s12076_s0 + $0x77c] ss:$72 sps:$4 sm:$0xff]   ;;  %v84_v55 = vld [vmem:[%s12075_s1 + $0x210] sm:$0xff]  ;;  %v338_v58 = vpack.c.bf16 %v83_v51, %v82_v49 }
  0xce   :  { %4414 = vmatprep.subr.bf16.mxu0 %v8444_v0  ;;  %v339_v59 = vpack.c.bf16 %v85_v57, %v84_v55  ;;  %v101_v49 = vld [vmem:[%s12075_s1 + $0x298] sm:$0xff]  ;;  %v7880_v57 = vld [vmem:[%s12076_s0 + $0x36c] ss:$72 sps:$4 sm:$0xff]  }
  0xcf   :  { %v7879_v55 = vld [vmem:[%s12076_s0 + $0x9b8] ss:$72 sps:$4 sm:$0xff]  }
  0xd1   :  { %4415 = vmatpush1.bf16.msra.mxu0 %v413_v61  ;;  %v86_v61 = vld [vmem:[%s12075_s1 + $0x220] sm:$0xff] }
  0xd2   :  { %4416 = vmatprep.subr.bf16.mxu0 %v8444_v0 }
  0xd3   :  { %3219 = vmatmul.mubr.bf16.gmra.mrb[72].mxu1 %v7812_v60  ;;  %v7854_v60 = vld [vmem:[%s12076_s0 + $0x98] ss:$72 sps:$4 sm:$0xff]  }
  0xd4   :  { %4248 = vmatmul.mubr.bf16.gmra.mrb[24].mxu0 %v7813_v1  ;;  %3226 = vmatprep.mubr.bf16.mxu1 %v7814_v2  ;;  %v7855_v1 = vld [vmem:[%s12076_s0 + $0x778] ss:$72 sps:$4 sm:$0xff]   ;;  %v7856_v2 = vld [vmem:[%s12076_s0 + $0x12c] ss:$72 sps:$4 sm:$0xff]  }
  0xd5   :  { %4255 = vmatprep.mubr.bf16.mxu0 %v7816_v4  ;;  %4417 = vmatpush1.bf16.msra.mxu0 %v414_v7  ;;  %v340_v4 = vpack.c.bf16 %v87_v63, %v86_v61  ;;  %v89_v7 = vld [vmem:[%s12075_s1 + $0x238] sm:$0xff] }
  0xd6   :  { %4418 = vmatprep.subr.bf16.mxu0 %v8444_v0  ;;  %v341_v9 = vpack.c.bf16 %v89_v7, %v88_v6  ;;  %v105_v61 = vld [vmem:[%s12075_s1 + $0x2b8] sm:$0xff] }
  0xd7   :  { %v7886_v6 = vld [vmem:[%s12076_s0 + $0x3fc] ss:$72 sps:$4 sm:$0xff]  }
  0xd8   :  { %v7888_v7 = vld [vmem:[%s12076_s0 + $0xadc] ss:$72 sps:$4 sm:$0xff]  }
  0xd9   :  { %4419 = vmatpush1.bf16.msra.mxu0 %v415_v11  ;;  %v91_v11 = vld [vmem:[%s12075_s1 + $0x248] sm:$0xff] }
  0xda   :  { %4420 = vmatprep.subr.bf16.mxu0 %v8444_v0 }
  0xdb   :  { %3227 = vmatmul.mubr.bf16.gmra.mrb[76].mxu1 %v7818_v10  ;;  %v90_v10 = vld [vmem:[%s12075_s1 + $0x240] sm:$0xff] }
  0xdc   :  { %4256 = vmatmul.mubr.bf16.gmra.mrb[28].mxu0 %v7819_v16  ;;  %3234 = vmatprep.mubr.bf16.mxu1 %v7820_v17  ;;  %v7862_v16 = vld [vmem:[%s12076_s0 + $0x1bc] ss:$72 sps:$4 sm:$0xff]  }
  0xdd   :  { %4263 = vmatprep.mubr.bf16.mxu0 %v7822_v19  ;;  %4421 = vmatpush1.bf16.msra.mxu0 %v416_v22  ;;  %v7864_v17 = vld [vmem:[%s12076_s0 + $0x89c] ss:$72 sps:$4 sm:$0xff]   ;;  %v342_v19 = vpack.c.bf16 %v91_v11, %v90_v10  ;;  %v108_v10 = vld [vmem:[%s12075_s1 + $0x2d0] sm:$0xff] }
  0xde   :  { %4422 = vmatprep.subr.bf16.mxu0 %v8444_v0  ;;  %v93_v22 = vld [vmem:[%s12075_s1 + $0x258] sm:$0xff] }
  0xdf   :  { %v343_v23 = vpack.c.bf16 %v93_v22, %v92_v21  ;;  %v109_v11 = vld [vmem:[%s12075_s1 + $0x2d8] sm:$0xff]  ;;  %v7892_v21 = vld [vmem:[%s12076_s0 + $0x48c] ss:$72 sps:$4 sm:$0xff]  }
  0xe0   :  { %v7894_v22 = vld [vmem:[%s12076_s0 + $0xb6c] ss:$72 sps:$4 sm:$0xff]  }
  0xe1   :  { %4423 = vmatpush1.bf16.msra.mxu0 %v417_v26  ;;  %v95_v26 = vld [vmem:[%s12075_s1 + $0x268] sm:$0xff] }
  0xe2   :  { %4617 = vmatprep.subr.bf16.mxu0 %v8444_v0 }
  0xe3   :  { %3235 = vmatmul.mubr.bf16.gmra.mrb[80].mxu1 %v7824_v25  ;;  %v94_v25 = vld [vmem:[%s12075_s1 + $0x260] sm:$0xff] }
  0xe4   :  { %4264 = vmatmul.mubr.bf16.gmra.mrb[32].mxu0 %v7825_v28  ;;  %3242 = vmatprep.mubr.bf16.mxu1 %v7826_v29  ;;  %v7866_v28 = vld [vmem:[%s12076_s0 + $0x1b8] ss:$72 sps:$4 sm:$0xff]  }
  0xe5   :  { %4271 = vmatprep.mubr.bf16.mxu0 %v7828_v31  ;;  %v7867_v29 = vld [vmem:[%s12076_s0 + $0x898] ss:$72 sps:$4 sm:$0xff]   ;;  %v7868_v31 = vld [vmem:[%s12076_s0 + $0x24c] ss:$72 sps:$4 sm:$0xff]  }
  0xeb   :  { %3243 = vmatmul.mubr.bf16.gmra.mrb[84].mxu1 %v7830_v32  ;;  %v7870_v32 = vld [vmem:[%s12076_s0 + $0x92c] ss:$72 sps:$4 sm:$0xff]  }
  0xec   :  { %4272 = vmatmul.mubr.bf16.gmra.mrb[36].mxu0 %v7831_v33  ;;  %3250 = vmatprep.mubr.bf16.mxu1 %v7832_v35  ;;  %v344_v33 = vpack.c.bf16 %v95_v26, %v94_v25  ;;  %v96_v35 = vld [vmem:[%s12075_s1 + $0x270] sm:$0xff]  ;;  %v113_v26 = vld [vmem:[%s12075_s1 + $0x2f8] sm:$0xff] }
  0xed   :  { %4279 = vmatprep.mubr.bf16.mxu0 %v7834_v37  ;;  %v97_v37 = vld [vmem:[%s12075_s1 + $0x278] sm:$0xff]  ;;  %v112_v25 = vld [vmem:[%s12075_s1 + $0x2f0] sm:$0xff] }
  0xf3   :  { %3251 = vmatmul.mubr.bf16.gmra.mrb[88].mxu1 %v7836_v38  ;;  %v345_v38 = vpack.c.bf16 %v97_v37, %v96_v35  ;;  %v7902_v35 = vld [vmem:[%s12076_s0 + $0x518] ss:$72 sps:$4 sm:$0xff]  }
  0xf4   :  { %4280 = vmatmul.mubr.bf16.gmra.mrb[40].mxu0 %v7837_v39  ;;  %3258 = vmatprep.mubr.bf16.mxu1 %v7838_v40  ;;  %v98_v39 = vld [vmem:[%s12075_s1 + $0x280] sm:$0xff]  ;;  %v99_v40 = vld [vmem:[%s12075_s1 + $0x288] sm:$0xff] }
  0xf5   :  { %4287 = vmatprep.mubr.bf16.mxu0 %v7840_v42  ;;  %v7872_v42 = vld [vmem:[%s12076_s0 + $0x248] ss:$72 sps:$4 sm:$0xff]   ;;  %v7903_v37 = vld [vmem:[%s12076_s0 + $0xbf8] ss:$72 sps:$4 sm:$0xff]  }
  0xfb   :  { %3259 = vmatmul.mubr.bf16.gmra.mrb[92].mxu1 %v7842_v43  ;;  %v7873_v43 = vld [vmem:[%s12076_s0 + $0x928] ss:$72 sps:$4 sm:$0xff]  }
  0xfc   :  { %4288 = vmatmul.mubr.bf16.gmra.mrb[44].mxu0 %v7843_v45  ;;  %3299 = vmatprep.mubr.bf16.mxu1 %v7846_v46  ;;  %v7874_v45 = vld [vmem:[%s12076_s0 + $0x2dc] ss:$72 sps:$4 sm:$0xff]  }
  0xfd   :  { %4295 = vmatprep.mubr.bf16.mxu0 %v7847_v47  ;;  %v7876_v46 = vld [vmem:[%s12076_s0 + $0x9bc] ss:$72 sps:$4 sm:$0xff]   ;;  %v346_v47 = vpack.c.bf16 %v99_v40, %v98_v39  ;;  %v7906_v39 = vld [vmem:[%s12076_s0 + $0xc8c] ss:$72 sps:$4 sm:$0xff]   ;;  %v7908_v40 = vld [vmem:[%s12076_s0 + $0x5a8] ss:$72 sps:$4 sm:$0xff]  }
 0x103   :  { %3300 = vmatmul.mubr.bf16.vlgmr.msra.gmra.mrb[0].mxu1 %v7844_v48  ;;  %v100_v48 = vld [vmem:[%s12075_s1 + $0x290] sm:$0xff] }
 0x104   :  { %4296 = vmatmul.mubr.bf16.gmra.mrb[48].mxu0 %v7849_v52  ;;  %3493 = vmatpush1.bf16.msra.mxu1 %v338_v58  ;;  %v347_v51 = vpack.c.bf16 %v101_v49, %v100_v48  ;;  %v102_v52 = vld [vmem:[%s12075_s1 + $0x2a0] sm:$0xff]  ;;  %v7882_v58 = vld [vmem:[%s12076_s0 + $0xa4c] ss:$72 sps:$4 sm:$0xff]  }
 0x105   :  { %3307 = vmatprep.mubr.bf16.mxu1 %v7850_v53  ;;  %4303 = vmatprep.mubr.bf16.mxu0 %v7852_v54  ;;  %v103_v53 = vld [vmem:[%s12075_s1 + $0x2a8] sm:$0xff]  ;;  %v7878_v54 = vld [vmem:[%s12076_s0 + $0x2d8] ss:$72 sps:$4 sm:$0xff]   ;;  %v7920_v49 = vld [vmem:[%s12076_s0 + $0x34] ss:$72 sps:$4 sm:$0xff]  }
 0x106   :  { %3494 = vmatprep.subr.bf16.mxu1 %v8444_v0  ;;  %v7916_v48 = vld [vmem:[%s12076_s0 + $0x6cc] ss:$72 sps:$4 sm:$0xff]  }
 0x108   :  { %3495 = vmatpush1.bf16.msra.mxu1 %v339_v59  ;;  %v348_v59 = vpack.c.bf16 %v103_v53, %v102_v52  ;;  %v243_v52 = vld [vmem:[%s12075_s1 + $0x708] sm:$0xff] }
 0x109   :  { %3496 = vmatprep.subr.bf16.mxu1 %v8444_v0  ;;  %v7921_v53 = vld [vmem:[%s12076_s0 + $0x6c8] ss:$72 sps:$4 sm:$0xff]  }
 0x10b   :  { %3308 = vmatmul.mubr.bf16.gmra.mrb[4].mxu1 %v7854_v60  ;;  %v104_v60 = vld [vmem:[%s12075_s1 + $0x2b0] sm:$0xff] }
 0x10c   :  { %4304 = vmatmul.mubr.bf16.gmra.mrb[52].mxu0 %v7855_v1  ;;  %3315 = vmatprep.mubr.bf16.mxu1 %v7856_v2  ;;  %v349_v63 = vpack.c.bf16 %v105_v61, %v104_v60  ;;  %v106_v1 = vld [vmem:[%s12075_s1 + $0x2c0] sm:$0xff]  ;;  %v107_v2 = vld [vmem:[%s12075_s1 + $0x2c8] sm:$0xff]  ;;  %v245_v60 = vld [vmem:[%s12075_s1 + $0x718] sm:$0xff] }
 0x10d   :  { %4311 = vmatprep.mubr.bf16.mxu0 %v7858_v3  ;;  %3497 = vmatpush1.bf16.msra.mxu1 %v340_v4  ;;  %v7884_v3 = vld [vmem:[%s12076_s0 + $0x368] ss:$72 sps:$4 sm:$0xff]  }
 0x10e   :  { %3498 = vmatprep.subr.bf16.mxu1 %v8444_v0  ;;  %v7885_v4 = vld [vmem:[%s12076_s0 + $0xa48] ss:$72 sps:$4 sm:$0xff]  }
 0x111   :  { %3499 = vmatpush1.bf16.msra.mxu1 %v341_v9  ;;  %v350_v9 = vpack.c.bf16 %v107_v2, %v106_v1  ;;  %v247_v1 = vld [vmem:[%s12075_s1 + $0x728] sm:$0xff]  ;;  %v7926_v2 = vld [vmem:[%s12076_s0 + $0x758] ss:$72 sps:$4 sm:$0xff]  }
 0x112   :  { %3500 = vmatprep.subr.bf16.mxu1 %v8444_v0 }
 0x113   :  { %3316 = vmatmul.mubr.bf16.gmra.mrb[8].mxu1 %v7860_v14  ;;  %v351_v14 = vpack.c.bf16 %v109_v11, %v108_v10  ;;  %v249_v10 = vld [vmem:[%s12075_s1 + $0x738] sm:$0xff] }
 0x114   :  { %4312 = vmatmul.mubr.bf16.gmra.mrb[56].mxu0 %v7861_v15  ;;  %3323 = vmatprep.mubr.bf16.mxu1 %v7862_v16  ;;  %v110_v15 = vld [vmem:[%s12075_s1 + $0x2e0] sm:$0xff]  ;;  %v111_v16 = vld [vmem:[%s12075_s1 + $0x2e8] sm:$0xff] }
 0x115   :  { %4319 = vmatprep.mubr.bf16.mxu0 %v7864_v17  ;;  %3501 = vmatpush1.bf16.msra.mxu1 %v342_v19  ;;  %v7890_v17 = vld [vmem:[%s12076_s0 + $0x3f8] ss:$72 sps:$4 sm:$0xff]  }
 0x116   :  { %3502 = vmatprep.subr.bf16.mxu1 %v8444_v0  ;;  %v7891_v19 = vld [vmem:[%s12076_s0 + $0xad8] ss:$72 sps:$4 sm:$0xff]  }
 0x119   :  { %3503 = vmatpush1.bf16.msra.mxu1 %v343_v23  ;;  %v352_v23 = vpack.c.bf16 %v111_v16, %v110_v15  ;;  %v251_v15 = vld [vmem:[%s12075_s1 + $0x748] sm:$0xff] }
 0x11a   :  { %3504 = vmatprep.subr.bf16.mxu1 %v8444_v0  ;;  %v7932_v16 = vld [vmem:[%s12076_s0 + $0x7e8] ss:$72 sps:$4 sm:$0xff]  }
 0x11b   :  { %3324 = vmatmul.mubr.bf16.gmra.mrb[12].mxu1 %v7866_v28  ;;  %v353_v28 = vpack.c.bf16 %v113_v26, %v112_v25  ;;  %v253_v25 = vld [vmem:[%s12075_s1 + $0x758] sm:$0xff] }
 0x11c   :  { %4320 = vmatmul.mubr.bf16.gmra.mrb[60].mxu0 %v7867_v29  ;;  %3331 = vmatprep.mubr.bf16.mxu1 %v7868_v31  ;;  %v7896_v29 = vld [vmem:[%s12076_s0 + $0x488] ss:$72 sps:$4 sm:$0xff]  }
 0x11d   :  { %4327 = vmatprep.mubr.bf16.mxu0 %v7870_v32  ;;  %3505 = vmatpush1.bf16.msra.mxu1 %v344_v33  ;;  %v7897_v31 = vld [vmem:[%s12076_s0 + $0xb68] ss:$72 sps:$4 sm:$0xff]   ;;  %v7898_v32 = vld [vmem:[%s12076_s0 + $0x51c] ss:$72 sps:$4 sm:$0xff]  }
 0x11e   :  { %3506 = vmatprep.subr.bf16.mxu1 %v8444_v0  ;;  %v7900_v33 = vld [vmem:[%s12076_s0 + $0xbfc] ss:$72 sps:$4 sm:$0xff]  }
 0x121   :  { %3507 = vmatpush1.bf16.msra.mxu1 %v345_v38  ;;  %v7904_v38 = vld [vmem:[%s12076_s0 + $0x5ac] ss:$72 sps:$4 sm:$0xff]  }
 0x122   :  { %3508 = vmatprep.subr.bf16.mxu1 %v8444_v0 }
 0x123   :  { %3332 = vmatmul.mubr.bf16.gmra.mrb[16].mxu1 %v7872_v42  ;;  %v7909_v42 = vld [vmem:[%s12076_s0 + $0xc88] ss:$72 sps:$4 sm:$0xff]  }
 0x124   :  { %4328 = vmatmul.mubr.bf16.gmra.mrb[64].mxu0 %v7873_v43  ;;  %3339 = vmatprep.mubr.bf16.mxu1 %v7874_v45  ;;  %v7910_v43 = vld [vmem:[%s12076_s0 + $0x63c] ss:$72 sps:$4 sm:$0xff]  }
 0x125   :  { %4335 = vmatprep.mubr.bf16.mxu0 %v7876_v46  ;;  %3509 = vmatpush1.bf16.msra.mxu1 %v346_v47  ;;  %v7912_v45 = vld [vmem:[%s12076_s0 + $0xd1c] ss:$72 sps:$4 sm:$0xff]   ;;  %v7914_v46 = vld [vmem:[%s12076_s0 + $0x638] ss:$72 sps:$4 sm:$0xff]  }
 0x126   :  { %3510 = vmatprep.subr.bf16.mxu1 %v8444_v0  ;;  %v7915_v47 = vld [vmem:[%s12076_s0 + $0xd18] ss:$72 sps:$4 sm:$0xff]  }
 0x129   :  { %3511 = vmatpush1.bf16.msra.mxu1 %v347_v51  ;;  %v242_v51 = vld [vmem:[%s12075_s1 + $0x700] sm:$0xff] }
 0x12a   :  { %3512 = vmatprep.subr.bf16.mxu1 %v8444_v0 }
 0x12b   :  { %3340 = vmatmul.mubr.bf16.gmra.mrb[20].mxu1 %v7878_v54  ;;  %v7918_v54 = vld [vmem:[%s12076_s0 + $0x30] ss:$72 sps:$4 sm:$0xff]  }
 0x12c   :  { %4336 = vmatmul.mubr.bf16.gmra.mrb[68].mxu0 %v7879_v55  ;;  %3347 = vmatprep.mubr.bf16.mxu1 %v7880_v57  ;;  %v7922_v55 = vld [vmem:[%s12076_s0 + $0x75c] ss:$72 sps:$4 sm:$0xff]   ;;  %v418_v57 = vpack.c.bf16 %v243_v52, %v242_v51  ;;  %v260_v51 = vld [vmem:[%s12075_s1 + $0x790] sm:$0xff] }
 0x12d   :  { %4343 = vmatprep.mubr.bf16.mxu0 %v7882_v58  ;;  %3513 = vmatpush1.bf16.msra.mxu1 %v348_v59  ;;  %v7924_v58 = vld [vmem:[%s12076_s0 + $0xc4] ss:$72 sps:$4 sm:$0xff]   ;;  %v244_v59 = vld [vmem:[%s12075_s1 + $0x710] sm:$0xff]  ;;  %v261_v52 = vld [vmem:[%s12075_s1 + $0x798] sm:$0xff] }
 0x12e   :  { %3514 = vmatprep.subr.bf16.mxu1 %v8444_v0  ;;  %v419_v61 = vpack.c.bf16 %v245_v60, %v244_v59  ;;  %v7952_v59 = vld [vmem:[%s12076_s0 + $0xa2c] ss:$72 sps:$4 sm:$0xff]  }
 0x12f   :  { %v7954_v60 = vld [vmem:[%s12076_s0 + $0x394] ss:$72 sps:$4 sm:$0xff]  }
 0x131   :  { %3515 = vmatpush1.bf16.msra.mxu1 %v349_v63  ;;  %v246_v63 = vld [vmem:[%s12075_s1 + $0x720] sm:$0xff] }
 0x132   :  { %3516 = vmatprep.subr.bf16.mxu1 %v8444_v0 }
 0x133   :  { %3348 = vmatmul.mubr.bf16.gmra.mrb[24].mxu1 %v7884_v3  ;;  %v7927_v3 = vld [vmem:[%s12076_s0 + $0xc0] ss:$72 sps:$4 sm:$0xff]  }
 0x134   :  { %4344 = vmatmul.mubr.bf16.gmra.mrb[72].mxu0 %v7885_v4  ;;  %3355 = vmatprep.mubr.bf16.mxu1 %v7886_v6  ;;  %v7928_v4 = vld [vmem:[%s12076_s0 + $0x7ec] ss:$72 sps:$4 sm:$0xff]  }
 0x135   :  { %4351 = vmatprep.mubr.bf16.mxu0 %v7888_v7  ;;  %3517 = vmatpush1.bf16.msra.mxu1 %v350_v9  ;;  %v7930_v6 = vld [vmem:[%s12076_s0 + $0x154] ss:$72 sps:$4 sm:$0xff]   ;;  %v420_v7 = vpack.c.bf16 %v247_v1, %v246_v63 }
 0x136   :  { %3518 = vmatprep.subr.bf16.mxu1 %v8444_v0  ;;  %v248_v9 = vld [vmem:[%s12075_s1 + $0x730] sm:$0xff]  ;;  %v265_v1 = vld [vmem:[%s12075_s1 + $0x7b8] sm:$0xff] }
 0x137   :  { %v421_v11 = vpack.c.bf16 %v249_v10, %v248_v9  ;;  %v264_v63 = vld [vmem:[%s12075_s1 + $0x7b0] sm:$0xff]  ;;  %v7958_v9 = vld [vmem:[%s12076_s0 + $0xabc] ss:$72 sps:$4 sm:$0xff]  }
 0x138   :  { %v7960_v10 = vld [vmem:[%s12076_s0 + $0x424] ss:$72 sps:$4 sm:$0xff]  }
 0x139   :  { %3519 = vmatpush1.bf16.msra.mxu1 %v351_v14  ;;  %v250_v14 = vld [vmem:[%s12075_s1 + $0x740] sm:$0xff] }
 0x13a   :  { %3520 = vmatprep.subr.bf16.mxu1 %v8444_v0 }
 0x13b   :  { %3356 = vmatmul.mubr.bf16.gmra.mrb[28].mxu1 %v7890_v17  ;;  %v7933_v17 = vld [vmem:[%s12076_s0 + $0x150] ss:$72 sps:$4 sm:$0xff]  }
 0x13c   :  { %4352 = vmatmul.mubr.bf16.gmra.mrb[76].mxu0 %v7891_v19  ;;  %3363 = vmatprep.mubr.bf16.mxu1 %v7892_v21  ;;  %v7934_v19 = vld [vmem:[%s12076_s0 + $0x87c] ss:$72 sps:$4 sm:$0xff]  }
 0x13d   :  { %4359 = vmatprep.mubr.bf16.mxu0 %v7894_v22  ;;  %3521 = vmatpush1.bf16.msra.mxu1 %v352_v23  ;;  %v7936_v21 = vld [vmem:[%s12076_s0 + $0x1e4] ss:$72 sps:$4 sm:$0xff]   ;;  %v422_v22 = vpack.c.bf16 %v251_v15, %v250_v14  ;;  %v252_v23 = vld [vmem:[%s12075_s1 + $0x750] sm:$0xff]  ;;  %v269_v15 = vld [vmem:[%s12075_s1 + $0x7d8] sm:$0xff] }
 0x13e   :  { %3522 = vmatprep.subr.bf16.mxu1 %v8444_v0  ;;  %v423_v26 = vpack.c.bf16 %v253_v25, %v252_v23  ;;  %v268_v14 = vld [vmem:[%s12075_s1 + $0x7d0] sm:$0xff] }
 0x13f   :  { %v7964_v23 = vld [vmem:[%s12076_s0 + $0xb4c] ss:$72 sps:$4 sm:$0xff]  }
 0x140   :  { %v7966_v25 = vld [vmem:[%s12076_s0 + $0x4b4] ss:$72 sps:$4 sm:$0xff]  }
 0x141   :  { %3523 = vmatpush1.bf16.msra.mxu1 %v353_v28  ;;  %v254_v28 = vld [vmem:[%s12075_s1 + $0x760] sm:$0xff] }
 0x142   :  { %3717 = vmatprep.subr.bf16.mxu1 %v8444_v0 }
 0x143   :  { %3364 = vmatmul.mubr.bf16.gmra.mrb[32].mxu1 %v7896_v29  ;;  %v255_v29 = vld [vmem:[%s12075_s1 + $0x768] sm:$0xff] }
 0x144   :  { %4360 = vmatmul.mubr.bf16.gmra.mrb[80].mxu0 %v7897_v31  ;;  %3371 = vmatprep.mubr.bf16.mxu1 %v7898_v32  ;;  %v7938_v31 = vld [vmem:[%s12076_s0 + $0x878] ss:$72 sps:$4 sm:$0xff]  }
 0x145   :  { %4367 = vmatprep.mubr.bf16.mxu0 %v7900_v33  ;;  %v7939_v32 = vld [vmem:[%s12076_s0 + $0x1e0] ss:$72 sps:$4 sm:$0xff]   ;;  %v7940_v33 = vld [vmem:[%s12076_s0 + $0x90c] ss:$72 sps:$4 sm:$0xff]  }
 0x14b   :  { %3372 = vmatmul.mubr.bf16.gmra.mrb[36].mxu1 %v7902_v35  ;;  %v7942_v35 = vld [vmem:[%s12076_s0 + $0x274] ss:$72 sps:$4 sm:$0xff]  }
 0x14c   :  { %4368 = vmatmul.mubr.bf16.gmra.mrb[84].mxu0 %v7903_v37  ;;  %3379 = vmatprep.mubr.bf16.mxu1 %v7904_v38  ;;  %v424_v37 = vpack.c.bf16 %v255_v29, %v254_v28  ;;  %v256_v38 = vld [vmem:[%s12075_s1 + $0x770] sm:$0xff]  ;;  %v273_v29 = vld [vmem:[%s12075_s1 + $0x7f8] sm:$0xff] }
 0x14d   :  { %4375 = vmatprep.mubr.bf16.mxu0 %v7906_v39  ;;  %v257_v39 = vld [vmem:[%s12075_s1 + $0x778] sm:$0xff]  ;;  %v272_v28 = vld [vmem:[%s12075_s1 + $0x7f0] sm:$0xff] }
 0x153   :  { %3380 = vmatmul.mubr.bf16.gmra.mrb[40].mxu1 %v7908_v40  ;;  %v425_v40 = vpack.c.bf16 %v257_v39, %v256_v38  ;;  %v7974_v38 = vld [vmem:[%s12076_s0 + $0xbd8] ss:$72 sps:$4 sm:$0xff]  }
 0x154   :  { %4376 = vmatmul.mubr.bf16.gmra.mrb[88].mxu0 %v7909_v42  ;;  %3387 = vmatprep.mubr.bf16.mxu1 %v7910_v43  ;;  %v258_v42 = vld [vmem:[%s12075_s1 + $0x780] sm:$0xff]  ;;  %v259_v43 = vld [vmem:[%s12075_s1 + $0x788] sm:$0xff] }
 0x155   :  { %4383 = vmatprep.mubr.bf16.mxu0 %v7912_v45  ;;  %v7944_v45 = vld [vmem:[%s12076_s0 + $0x908] ss:$72 sps:$4 sm:$0xff]  }
 0x156   :  { %v7975_v39 = vld [vmem:[%s12076_s0 + $0x540] ss:$72 sps:$4 sm:$0xff]  }
 0x15b   :  { %3388 = vmatmul.mubr.bf16.gmra.mrb[44].mxu1 %v7914_v46  ;;  %v7945_v46 = vld [vmem:[%s12076_s0 + $0x270] ss:$72 sps:$4 sm:$0xff]  }
 0x15c   :  { %4384 = vmatmul.mubr.bf16.gmra.mrb[92].mxu0 %v7915_v47  ;;  %3395 = vmatprep.mubr.bf16.mxu1 %v7916_v48  ;;  %v7946_v47 = vld [vmem:[%s12076_s0 + $0x99c] ss:$72 sps:$4 sm:$0xff]  }
 0x15d   :  { %4424 = vmatprep.mubr.bf16.mxu0 %v7920_v49  ;;  %v7948_v48 = vld [vmem:[%s12076_s0 + $0x304] ss:$72 sps:$4 sm:$0xff]   ;;  %v426_v49 = vpack.c.bf16 %v259_v43, %v258_v42  ;;  %v7978_v42 = vld [vmem:[%s12076_s0 + $0x5d4] ss:$72 sps:$4 sm:$0xff]   ;;  %v7980_v43 = vld [vmem:[%s12076_s0 + $0xc68] ss:$72 sps:$4 sm:$0xff]  }
 0x163   :  { %3396 = vmatmul.mubr.bf16.gmra.mrb[48].mxu1 %v7921_v53  ;;  %v427_v53 = vpack.c.bf16 %v261_v52, %v260_v51  ;;  %v7990_v51 = vld [vmem:[%s12076_s0 + $0x14] ss:$72 sps:$4 sm:$0xff]  }
 0x164   :  { %4425 = vmatmul.mubr.bf16.vlgmr.msra.gmra.mrb[0].mxu0 %v7918_v54  ;;  %3403 = vmatprep.mubr.bf16.mxu1 %v7922_v55  ;;  %v262_v54 = vld [vmem:[%s12075_s1 + $0x7a0] sm:$0xff]  ;;  %v263_v55 = vld [vmem:[%s12075_s1 + $0x7a8] sm:$0xff]  ;;  %v7991_v52 = vld [vmem:[%s12076_s0 + $0x6f4] ss:$72 sps:$4 sm:$0xff]  }
 0x165   :  { %4618 = vmatpush1.bf16.msra.mxu0 %v418_v57  ;;  %4432 = vmatprep.mubr.bf16.mxu0 %v7924_v58  ;;  %v7950_v57 = vld [vmem:[%s12076_s0 + $0x998] ss:$72 sps:$4 sm:$0xff]  }
 0x166   :  { %4619 = vmatprep.subr.bf16.mxu0 %v8444_v0  ;;  %v7951_v58 = vld [vmem:[%s12076_s0 + $0x300] ss:$72 sps:$4 sm:$0xff]  }
 0x169   :  { %4620 = vmatpush1.bf16.msra.mxu0 %v419_v61  ;;  %v428_v61 = vpack.c.bf16 %v263_v55, %v262_v54  ;;  %v115_v54 = vld [vmem:[%s12075_s1 + $0x308] sm:$0xff]  ;;  %v7988_v55 = vld [vmem:[%s12076_s0 + $0x10] ss:$72 sps:$4 sm:$0xff]  }
 0x16a   :  { %4621 = vmatprep.subr.bf16.mxu0 %v8444_v0 }
 0x16b   :  { %3404 = vmatmul.mubr.bf16.gmra.mrb[52].mxu1 %v7926_v2  ;;  %v429_v2 = vpack.c.bf16 %v265_v1, %v264_v63  ;;  %v117_v63 = vld [vmem:[%s12075_s1 + $0x318] sm:$0xff] }
 0x16c   :  { %4433 = vmatmul.mubr.bf16.gmra.mrb[4].mxu0 %v7927_v3  ;;  %3411 = vmatprep.mubr.bf16.mxu1 %v7928_v4  ;;  %v266_v3 = vld [vmem:[%s12075_s1 + $0x7c0] sm:$0xff]  ;;  %v267_v4 = vld [vmem:[%s12075_s1 + $0x7c8] sm:$0xff] }
 0x16d   :  { %4440 = vmatprep.mubr.bf16.mxu0 %v7930_v6  ;;  %4622 = vmatpush1.bf16.msra.mxu0 %v420_v7  ;;  %v7956_v6 = vld [vmem:[%s12076_s0 + $0xa28] ss:$72 sps:$4 sm:$0xff]  }
 0x16e   :  { %4623 = vmatprep.subr.bf16.mxu0 %v8444_v0  ;;  %v7957_v7 = vld [vmem:[%s12076_s0 + $0x390] ss:$72 sps:$4 sm:$0xff]  }
 0x171   :  { %4624 = vmatpush1.bf16.msra.mxu0 %v421_v11  ;;  %v430_v11 = vpack.c.bf16 %v267_v4, %v266_v3  ;;  %v119_v3 = vld [vmem:[%s12075_s1 + $0x328] sm:$0xff] }
 0x172   :  { %4625 = vmatprep.subr.bf16.mxu0 %v8444_v0  ;;  %v7998_v4 = vld [vmem:[%s12076_s0 + $0xa0] ss:$72 sps:$4 sm:$0xff]  }
 0x173   :  { %3412 = vmatmul.mubr.bf16.gmra.mrb[56].mxu1 %v7932_v16  ;;  %v431_v16 = vpack.c.bf16 %v269_v15, %v268_v14  ;;  %v121_v14 = vld [vmem:[%s12075_s1 + $0x338] sm:$0xff] }
 0x174   :  { %4441 = vmatmul.mubr.bf16.gmra.mrb[8].mxu0 %v7933_v17  ;;  %3419 = vmatprep.mubr.bf16.mxu1 %v7934_v19  ;;  %v270_v17 = vld [vmem:[%s12075_s1 + $0x7e0] sm:$0xff]  ;;  %v271_v19 = vld [vmem:[%s12075_s1 + $0x7e8] sm:$0xff] }
 0x175   :  { %4448 = vmatprep.mubr.bf16.mxu0 %v7936_v21  ;;  %4626 = vmatpush1.bf16.msra.mxu0 %v422_v22  ;;  %v7962_v21 = vld [vmem:[%s12076_s0 + $0xab8] ss:$72 sps:$4 sm:$0xff]  }
 0x176   :  { %4627 = vmatprep.subr.bf16.mxu0 %v8444_v0  ;;  %v7963_v22 = vld [vmem:[%s12076_s0 + $0x420] ss:$72 sps:$4 sm:$0xff]  }
 0x179   :  { %4628 = vmatpush1.bf16.msra.mxu0 %v423_v26  ;;  %v432_v26 = vpack.c.bf16 %v271_v19, %v270_v17  ;;  %v123_v17 = vld [vmem:[%s12075_s1 + $0x348] sm:$0xff]  ;;  %v8004_v19 = vld [vmem:[%s12076_s0 + $0x130] ss:$72 sps:$4 sm:$0xff]  }
 0x17a   :  { %4629 = vmatprep.subr.bf16.mxu0 %v8444_v0 }
 0x17b   :  { %3420 = vmatmul.mubr.bf16.gmra.mrb[60].mxu1 %v7938_v31  ;;  %v433_v31 = vpack.c.bf16 %v273_v29, %v272_v28  ;;  %v125_v28 = vld [vmem:[%s12075_s1 + $0x358] sm:$0xff] }
 0x17c   :  { %4449 = vmatmul.mubr.bf16.gmra.mrb[12].mxu0 %v7939_v32  ;;  %3427 = vmatprep.mubr.bf16.mxu1 %v7940_v33  ;;  %v7968_v32 = vld [vmem:[%s12076_s0 + $0xb48] ss:$72 sps:$4 sm:$0xff]  }
 0x17d   :  { %4456 = vmatprep.mubr.bf16.mxu0 %v7942_v35  ;;  %4630 = vmatpush1.bf16.msra.mxu0 %v424_v37  ;;  %v7969_v33 = vld [vmem:[%s12076_s0 + $0x4b0] ss:$72 sps:$4 sm:$0xff]   ;;  %v7970_v35 = vld [vmem:[%s12076_s0 + $0xbdc] ss:$72 sps:$4 sm:$0xff]  }
 0x17e   :  { %4631 = vmatprep.subr.bf16.mxu0 %v8444_v0  ;;  %v7972_v37 = vld [vmem:[%s12076_s0 + $0x544] ss:$72 sps:$4 sm:$0xff]  }
 0x181   :  { %4632 = vmatpush1.bf16.msra.mxu0 %v425_v40  ;;  %v7976_v40 = vld [vmem:[%s12076_s0 + $0xc6c] ss:$72 sps:$4 sm:$0xff]  }
 0x182   :  { %4633 = vmatprep.subr.bf16.mxu0 %v8444_v0 }
 0x183   :  { %3428 = vmatmul.mubr.bf16.gmra.mrb[64].mxu1 %v7944_v45  ;;  %v7981_v45 = vld [vmem:[%s12076_s0 + $0x5d0] ss:$72 sps:$4 sm:$0xff]  }
 0x184   :  { %4457 = vmatmul.mubr.bf16.gmra.mrb[16].mxu0 %v7945_v46  ;;  %3435 = vmatprep.mubr.bf16.mxu1 %v7946_v47  ;;  %v7982_v46 = vld [vmem:[%s12076_s0 + $0xcfc] ss:$72 sps:$4 sm:$0xff]  }
 0x185   :  { %4464 = vmatprep.mubr.bf16.mxu0 %v7948_v48  ;;  %4634 = vmatpush1.bf16.msra.mxu0 %v426_v49  ;;  %v7984_v47 = vld [vmem:[%s12076_s0 + $0x664] ss:$72 sps:$4 sm:$0xff]   ;;  %v7986_v48 = vld [vmem:[%s12076_s0 + $0xcf8] ss:$72 sps:$4 sm:$0xff]  }
 0x186   :  { %4635 = vmatprep.subr.bf16.mxu0 %v8444_v0  ;;  %v7987_v49 = vld [vmem:[%s12076_s0 + $0x660] ss:$72 sps:$4 sm:$0xff]  }
 0x189   :  { %4636 = vmatpush1.bf16.msra.mxu0 %v427_v53  ;;  %v114_v53 = vld [vmem:[%s12075_s1 + $0x300] sm:$0xff] }
 0x18a   :  { %4637 = vmatprep.subr.bf16.mxu0 %v8444_v0 }
 0x18b   :  { %3436 = vmatmul.mubr.bf16.gmra.mrb[68].mxu1 %v7950_v57  ;;  %v7993_v57 = vld [vmem:[%s12076_s0 + $0x6f0] ss:$72 sps:$4 sm:$0xff]  }
 0x18c   :  { %4465 = vmatmul.mubr.bf16.gmra.mrb[20].mxu0 %v7951_v58  ;;  %3443 = vmatprep.mubr.bf16.mxu1 %v7952_v59  ;;  %v354_v58 = vpack.c.bf16 %v115_v54, %v114_v53  ;;  %v7994_v59 = vld [vmem:[%s12076_s0 + $0xa4] ss:$72 sps:$4 sm:$0xff]   ;;  %v132_v53 = vld [vmem:[%s12075_s1 + $0x390] sm:$0xff]  ;;  %v133_v54 = vld [vmem:[%s12075_s1 + $0x398] sm:$0xff] }
 0x18d   :  { %4472 = vmatprep.mubr.bf16.mxu0 %v7954_v60  ;;  %4638 = vmatpush1.bf16.msra.mxu0 %v428_v61  ;;  %v7996_v60 = vld [vmem:[%s12076_s0 + $0x784] ss:$72 sps:$4 sm:$0xff]   ;;  %v116_v61 = vld [vmem:[%s12075_s1 + $0x310] sm:$0xff] }
 0x18e   :  { %4639 = vmatprep.subr.bf16.mxu0 %v8444_v0  ;;  %v355_v1 = vpack.c.bf16 %v117_v63, %v116_v61  ;;  %v8024_v61 = vld [vmem:[%s12076_s0 + $0x374] ss:$72 sps:$4 sm:$0xff]  }
 0x18f   :  { %v8026_v63 = vld [vmem:[%s12076_s0 + $0xa54] ss:$72 sps:$4 sm:$0xff]  }
 0x191   :  { %4640 = vmatpush1.bf16.msra.mxu0 %v429_v2  ;;  %v118_v2 = vld [vmem:[%s12075_s1 + $0x320] sm:$0xff] }
 0x192   :  { %4641 = vmatprep.subr.bf16.mxu0 %v8444_v0 }
 0x193   :  { %3444 = vmatmul.mubr.bf16.gmra.mrb[72].mxu1 %v7956_v6  ;;  %v7999_v6 = vld [vmem:[%s12076_s0 + $0x780] ss:$72 sps:$4 sm:$0xff]  }
 0x194   :  { %4473 = vmatmul.mubr.bf16.gmra.mrb[24].mxu0 %v7957_v7  ;;  %3451 = vmatprep.mubr.bf16.mxu1 %v7958_v9  ;;  %v8000_v7 = vld [vmem:[%s12076_s0 + $0x134] ss:$72 sps:$4 sm:$0xff]  }
 0x195   :  { %4480 = vmatprep.mubr.bf16.mxu0 %v7960_v10  ;;  %4642 = vmatpush1.bf16.msra.mxu0 %v430_v11  ;;  %v8002_v9 = vld [vmem:[%s12076_s0 + $0x814] ss:$72 sps:$4 sm:$0xff]   ;;  %v356_v10 = vpack.c.bf16 %v119_v3, %v118_v2 }
 0x196   :  { %4643 = vmatprep.subr.bf16.mxu0 %v8444_v0  ;;  %v120_v11 = vld [vmem:[%s12075_s1 + $0x330] sm:$0xff]  ;;  %v137_v3 = vld [vmem:[%s12075_s1 + $0x3b8] sm:$0xff] }
 0x197   :  { %v357_v15 = vpack.c.bf16 %v121_v14, %v120_v11  ;;  %v136_v2 = vld [vmem:[%s12075_s1 + $0x3b0] sm:$0xff]  ;;  %v8030_v11 = vld [vmem:[%s12076_s0 + $0x404] ss:$72 sps:$4 sm:$0xff]  }
 0x198   :  { %v8032_v14 = vld [vmem:[%s12076_s0 + $0xae4] ss:$72 sps:$4 sm:$0xff]  }
 0x199   :  { %4644 = vmatpush1.bf16.msra.mxu0 %v431_v16  ;;  %v122_v16 = vld [vmem:[%s12075_s1 + $0x340] sm:$0xff] }
 0x19a   :  { %4645 = vmatprep.subr.bf16.mxu0 %v8444_v0 }
 0x19b   :  { %3452 = vmatmul.mubr.bf16.gmra.mrb[76].mxu1 %v7962_v21  ;;  %v8005_v21 = vld [vmem:[%s12076_s0 + $0x810] ss:$72 sps:$4 sm:$0xff]  }
 0x19c   :  { %4481 = vmatmul.mubr.bf16.gmra.mrb[28].mxu0 %v7963_v22  ;;  %3459 = vmatprep.mubr.bf16.mxu1 %v7964_v23  ;;  %v8006_v22 = vld [vmem:[%s12076_s0 + $0x1c4] ss:$72 sps:$4 sm:$0xff]  }
 0x19d   :  { %4488 = vmatprep.mubr.bf16.mxu0 %v7966_v25  ;;  %4646 = vmatpush1.bf16.msra.mxu0 %v432_v26  ;;  %v8008_v23 = vld [vmem:[%s12076_s0 + $0x8a4] ss:$72 sps:$4 sm:$0xff]   ;;  %v358_v25 = vpack.c.bf16 %v123_v17, %v122_v16  ;;  %v124_v26 = vld [vmem:[%s12075_s1 + $0x350] sm:$0xff]  ;;  %v141_v17 = vld [vmem:[%s12075_s1 + $0x3d8] sm:$0xff] }
 0x19e   :  { %4647 = vmatprep.subr.bf16.mxu0 %v8444_v0  ;;  %v359_v29 = vpack.c.bf16 %v125_v28, %v124_v26  ;;  %v140_v16 = vld [vmem:[%s12075_s1 + $0x3d0] sm:$0xff] }
 0x19f   :  { %v8036_v26 = vld [vmem:[%s12076_s0 + $0x494] ss:$72 sps:$4 sm:$0xff]  }
 0x1a0   :  { %v8038_v28 = vld [vmem:[%s12076_s0 + $0xb74] ss:$72 sps:$4 sm:$0xff]  }
 0x1a1   :  { %4648 = vmatpush1.bf16.msra.mxu0 %v433_v31  ;;  %v126_v31 = vld [vmem:[%s12075_s1 + $0x360] sm:$0xff] }
 0x1a2   :  { %4842 = vmatprep.subr.bf16.mxu0 %v8444_v0 }
 0x1a3   :  { %3460 = vmatmul.mubr.bf16.gmra.mrb[80].mxu1 %v7968_v32  ;;  %v127_v32 = vld [vmem:[%s12075_s1 + $0x368] sm:$0xff] }
 0x1a4   :  { %4489 = vmatmul.mubr.bf16.gmra.mrb[32].mxu0 %v7969_v33  ;;  %3467 = vmatprep.mubr.bf16.mxu1 %v7970_v35  ;;  %v8010_v33 = vld [vmem:[%s12076_s0 + $0x1c0] ss:$72 sps:$4 sm:$0xff]  }
 0x1a5   :  { %4496 = vmatprep.mubr.bf16.mxu0 %v7972_v37  ;;  %v8011_v35 = vld [vmem:[%s12076_s0 + $0x8a0] ss:$72 sps:$4 sm:$0xff]   ;;  %v8012_v37 = vld [vmem:[%s12076_s0 + $0x254] ss:$72 sps:$4 sm:$0xff]  }
 0x1ab   :  { %3468 = vmatmul.mubr.bf16.gmra.mrb[84].mxu1 %v7974_v38  ;;  %v8014_v38 = vld [vmem:[%s12076_s0 + $0x934] ss:$72 sps:$4 sm:$0xff]  }
 0x1ac   :  { %4497 = vmatmul.mubr.bf16.gmra.mrb[36].mxu0 %v7975_v39  ;;  %3475 = vmatprep.mubr.bf16.mxu1 %v7976_v40  ;;  %v360_v39 = vpack.c.bf16 %v127_v32, %v126_v31  ;;  %v128_v40 = vld [vmem:[%s12075_s1 + $0x370] sm:$0xff]  ;;  %v145_v32 = vld [vmem:[%s12075_s1 + $0x3f8] sm:$0xff] }
 0x1ad   :  { %4504 = vmatprep.mubr.bf16.mxu0 %v7978_v42  ;;  %v129_v42 = vld [vmem:[%s12075_s1 + $0x378] sm:$0xff]  ;;  %v144_v31 = vld [vmem:[%s12075_s1 + $0x3f0] sm:$0xff] }
 0x1b3   :  { %3476 = vmatmul.mubr.bf16.gmra.mrb[88].mxu1 %v7980_v43  ;;  %v361_v43 = vpack.c.bf16 %v129_v42, %v128_v40  ;;  %v8046_v40 = vld [vmem:[%s12076_s0 + $0x520] ss:$72 sps:$4 sm:$0xff]  }
 0x1b4   :  { %4505 = vmatmul.mubr.bf16.gmra.mrb[40].mxu0 %v7981_v45  ;;  %3483 = vmatprep.mubr.bf16.mxu1 %v7982_v46  ;;  %v130_v45 = vld [vmem:[%s12075_s1 + $0x380] sm:$0xff]  ;;  %v131_v46 = vld [vmem:[%s12075_s1 + $0x388] sm:$0xff] }
 0x1b5   :  { %4512 = vmatprep.mubr.bf16.mxu0 %v7984_v47  ;;  %v8016_v47 = vld [vmem:[%s12076_s0 + $0x250] ss:$72 sps:$4 sm:$0xff]   ;;  %v8047_v42 = vld [vmem:[%s12076_s0 + $0xc00] ss:$72 sps:$4 sm:$0xff]  }
 0x1bb   :  { %3484 = vmatmul.mubr.bf16.gmra.mrb[92].mxu1 %v7986_v48  ;;  %v8017_v48 = vld [vmem:[%s12076_s0 + $0x930] ss:$72 sps:$4 sm:$0xff]  }
 0x1bc   :  { %4513 = vmatmul.mubr.bf16.gmra.mrb[44].mxu0 %v7987_v49  ;;  %3524 = vmatprep.mubr.bf16.mxu1 %v7990_v51  ;;  %v8018_v49 = vld [vmem:[%s12076_s0 + $0x2e4] ss:$72 sps:$4 sm:$0xff]  }
 0x1bd   :  { %4520 = vmatprep.mubr.bf16.mxu0 %v7991_v52  ;;  %v8020_v51 = vld [vmem:[%s12076_s0 + $0x9c4] ss:$72 sps:$4 sm:$0xff]   ;;  %v362_v52 = vpack.c.bf16 %v131_v46, %v130_v45  ;;  %v8050_v45 = vld [vmem:[%s12076_s0 + $0xc94] ss:$72 sps:$4 sm:$0xff]   ;;  %v8052_v46 = vld [vmem:[%s12076_s0 + $0x5b0] ss:$72 sps:$4 sm:$0xff]  }
 0x1c3   :  { %3525 = vmatmul.mubr.bf16.vlgmr.msra.gmra.mrb[0].mxu1 %v7988_v55  ;;  %v363_v55 = vpack.c.bf16 %v133_v54, %v132_v53  ;;  %v8060_v53 = vld [vmem:[%s12076_s0 + $0x6d4] ss:$72 sps:$4 sm:$0xff]  }
 0x1c4   :  { %4521 = vmatmul.mubr.bf16.gmra.mrb[48].mxu0 %v7993_v57  ;;  %3718 = vmatpush1.bf16.msra.mxu1 %v354_v58  ;;  %v134_v57 = vld [vmem:[%s12075_s1 + $0x3a0] sm:$0xff]  ;;  %v135_v58 = vld [vmem:[%s12075_s1 + $0x3a8] sm:$0xff] }
 0x1c5   :  { %3532 = vmatprep.mubr.bf16.mxu1 %v7994_v59  ;;  %4528 = vmatprep.mubr.bf16.mxu0 %v7996_v60  ;;  %v8022_v59 = vld [vmem:[%s12076_s0 + $0x2e0] ss:$72 sps:$4 sm:$0xff]   ;;  %v8064_v54 = vld [vmem:[%s12076_s0 + $0x3c] ss:$72 sps:$4 sm:$0xff]  }
 0x1c6   :  { %3719 = vmatprep.subr.bf16.mxu1 %v8444_v0  ;;  %v8023_v60 = vld [vmem:[%s12076_s0 + $0x9c0] ss:$72 sps:$4 sm:$0xff]  }
 0x1c8   :  { %3720 = vmatpush1.bf16.msra.mxu1 %v355_v1  ;;  %v364_v1 = vpack.c.bf16 %v135_v58, %v134_v57  ;;  %v275_v57 = vld [vmem:[%s12075_s1 + $0x808] sm:$0xff]  ;;  %v8065_v58 = vld [vmem:[%s12076_s0 + $0x6d0] ss:$72 sps:$4 sm:$0xff]  }
 0x1c9   :  { %3721 = vmatprep.subr.bf16.mxu1 %v8444_v0 }
 0x1cb   :  { %3533 = vmatmul.mubr.bf16.gmra.mrb[4].mxu1 %v7998_v4  ;;  %v365_v4 = vpack.c.bf16 %v137_v3, %v136_v2  ;;  %v277_v2 = vld [vmem:[%s12075_s1 + $0x818] sm:$0xff] }
 0x1cc   :  { %4529 = vmatmul.mubr.bf16.gmra.mrb[52].mxu0 %v7999_v6  ;;  %3540 = vmatprep.mubr.bf16.mxu1 %v8000_v7  ;;  %v138_v6 = vld [vmem:[%s12075_s1 + $0x3c0] sm:$0xff]  ;;  %v139_v7 = vld [vmem:[%s12075_s1 + $0x3c8] sm:$0xff] }
 0x1cd   :  { %4536 = vmatprep.mubr.bf16.mxu0 %v8002_v9  ;;  %3722 = vmatpush1.bf16.msra.mxu1 %v356_v10  ;;  %v8028_v9 = vld [vmem:[%s12076_s0 + $0x370] ss:$72 sps:$4 sm:$0xff]  }
 0x1ce   :  { %3723 = vmatprep.subr.bf16.mxu1 %v8444_v0  ;;  %v8029_v10 = vld [vmem:[%s12076_s0 + $0xa50] ss:$72 sps:$4 sm:$0xff]  }
 0x1d1   :  { %3724 = vmatpush1.bf16.msra.mxu1 %v357_v15  ;;  %v366_v15 = vpack.c.bf16 %v139_v7, %v138_v6  ;;  %v279_v6 = vld [vmem:[%s12075_s1 + $0x828] sm:$0xff] }
 0x1d2   :  { %3725 = vmatprep.subr.bf16.mxu1 %v8444_v0  ;;  %v8070_v7 = vld [vmem:[%s12076_s0 + $0x760] ss:$72 sps:$4 sm:$0xff]  }
 0x1d3   :  { %3541 = vmatmul.mubr.bf16.gmra.mrb[8].mxu1 %v8004_v19  ;;  %v367_v19 = vpack.c.bf16 %v141_v17, %v140_v16  ;;  %v281_v16 = vld [vmem:[%s12075_s1 + $0x838] sm:$0xff] }
 0x1d4   :  { %4537 = vmatmul.mubr.bf16.gmra.mrb[56].mxu0 %v8005_v21  ;;  %3548 = vmatprep.mubr.bf16.mxu1 %v8006_v22  ;;  %v142_v21 = vld [vmem:[%s12075_s1 + $0x3e0] sm:$0xff]  ;;  %v143_v22 = vld [vmem:[%s12075_s1 + $0x3e8] sm:$0xff] }
 0x1d5   :  { %4544 = vmatprep.mubr.bf16.mxu0 %v8008_v23  ;;  %3726 = vmatpush1.bf16.msra.mxu1 %v358_v25  ;;  %v8034_v23 = vld [vmem:[%s12076_s0 + $0x400] ss:$72 sps:$4 sm:$0xff]  }
 0x1d6   :  { %3727 = vmatprep.subr.bf16.mxu1 %v8444_v0  ;;  %v8035_v25 = vld [vmem:[%s12076_s0 + $0xae0] ss:$72 sps:$4 sm:$0xff]  }
 0x1d9   :  { %3728 = vmatpush1.bf16.msra.mxu1 %v359_v29  ;;  %v368_v29 = vpack.c.bf16 %v143_v22, %v142_v21  ;;  %v283_v21 = vld [vmem:[%s12075_s1 + $0x848] sm:$0xff]  ;;  %v8076_v22 = vld [vmem:[%s12076_s0 + $0x7f0] ss:$72 sps:$4 sm:$0xff]  }
 0x1da   :  { %3729 = vmatprep.subr.bf16.mxu1 %v8444_v0 }
 0x1db   :  { %3549 = vmatmul.mubr.bf16.gmra.mrb[12].mxu1 %v8010_v33  ;;  %v369_v33 = vpack.c.bf16 %v145_v32, %v144_v31  ;;  %v285_v31 = vld [vmem:[%s12075_s1 + $0x858] sm:$0xff] }
 0x1dc   :  { %4545 = vmatmul.mubr.bf16.gmra.mrb[60].mxu0 %v8011_v35  ;;  %3556 = vmatprep.mubr.bf16.mxu1 %v8012_v37  ;;  %v8040_v35 = vld [vmem:[%s12076_s0 + $0x490] ss:$72 sps:$4 sm:$0xff]  }
 0x1dd   :  { %4552 = vmatprep.mubr.bf16.mxu0 %v8014_v38  ;;  %3730 = vmatpush1.bf16.msra.mxu1 %v360_v39  ;;  %v8041_v37 = vld [vmem:[%s12076_s0 + $0xb70] ss:$72 sps:$4 sm:$0xff]   ;;  %v8042_v38 = vld [vmem:[%s12076_s0 + $0x524] ss:$72 sps:$4 sm:$0xff]  }
 0x1de   :  { %3731 = vmatprep.subr.bf16.mxu1 %v8444_v0  ;;  %v8044_v39 = vld [vmem:[%s12076_s0 + $0xc04] ss:$72 sps:$4 sm:$0xff]  }
 0x1e1   :  { %3732 = vmatpush1.bf16.msra.mxu1 %v361_v43  ;;  %v8048_v43 = vld [vmem:[%s12076_s0 + $0x5b4] ss:$72 sps:$4 sm:$0xff]  }
 0x1e2   :  { %3733 = vmatprep.subr.bf16.mxu1 %v8444_v0 }
 0x1e3   :  { %3557 = vmatmul.mubr.bf16.gmra.mrb[16].mxu1 %v8016_v47  ;;  %v8053_v47 = vld [vmem:[%s12076_s0 + $0xc90] ss:$72 sps:$4 sm:$0xff]  }
 0x1e4   :  { %4553 = vmatmul.mubr.bf16.gmra.mrb[64].mxu0 %v8017_v48  ;;  %3564 = vmatprep.mubr.bf16.mxu1 %v8018_v49  ;;  %v8054_v48 = vld [vmem:[%s12076_s0 + $0x644] ss:$72 sps:$4 sm:$0xff]  }
 0x1e5   :  { %4560 = vmatprep.mubr.bf16.mxu0 %v8020_v51  ;;  %3734 = vmatpush1.bf16.msra.mxu1 %v362_v52  ;;  %v8056_v49 = vld [vmem:[%s12076_s0 + $0xd24] ss:$72 sps:$4 sm:$0xff]   ;;  %v8058_v51 = vld [vmem:[%s12076_s0 + $0x640] ss:$72 sps:$4 sm:$0xff]  }
 0x1e6   :  { %3735 = vmatprep.subr.bf16.mxu1 %v8444_v0  ;;  %v8059_v52 = vld [vmem:[%s12076_s0 + $0xd20] ss:$72 sps:$4 sm:$0xff]  }
 0x1e9   :  { %3736 = vmatpush1.bf16.msra.mxu1 %v363_v55  ;;  %v274_v55 = vld [vmem:[%s12075_s1 + $0x800] sm:$0xff] }
 0x1ea   :  { %3737 = vmatprep.subr.bf16.mxu1 %v8444_v0 }
 0x1eb   :  { %3565 = vmatmul.mubr.bf16.gmra.mrb[20].mxu1 %v8022_v59  ;;  %v8062_v59 = vld [vmem:[%s12076_s0 + $0x38] ss:$72 sps:$4 sm:$0xff]  }
 0x1ec   :  { %4561 = vmatmul.mubr.bf16.gmra.mrb[68].mxu0 %v8023_v60  ;;  %3572 = vmatprep.mubr.bf16.mxu1 %v8024_v61  ;;  %v8066_v60 = vld [vmem:[%s12076_s0 + $0x764] ss:$72 sps:$4 sm:$0xff]   ;;  %v434_v61 = vpack.c.bf16 %v275_v57, %v274_v55  ;;  %v292_v55 = vld [vmem:[%s12075_s1 + $0x890] sm:$0xff]  ;;  %v293_v57 = vld [vmem:[%s12075_s1 + $0x898] sm:$0xff] }
 0x1ed   :  { %4568 = vmatprep.mubr.bf16.mxu0 %v8026_v63  ;;  %3738 = vmatpush1.bf16.msra.mxu1 %v364_v1  ;;  %v8068_v63 = vld [vmem:[%s12076_s0 + $0xcc] ss:$72 sps:$4 sm:$0xff]  }
 0x1ee   :  { %3739 = vmatprep.subr.bf16.mxu1 %v8444_v0  ;;  %v276_v1 = vld [vmem:[%s12075_s1 + $0x810] sm:$0xff] }
 0x1ef   :  { %v435_v3 = vpack.c.bf16 %v277_v2, %v276_v1  ;;  %v8096_v1 = vld [vmem:[%s12076_s0 + $0xa34] ss:$72 sps:$4 sm:$0xff]  }
 0x1f0   :  { %v8098_v2 = vld [vmem:[%s12076_s0 + $0x39c] ss:$72 sps:$4 sm:$0xff]  }
 0x1f1   :  { %3740 = vmatpush1.bf16.msra.mxu1 %v365_v4  ;;  %v278_v4 = vld [vmem:[%s12075_s1 + $0x820] sm:$0xff] }
 0x1f2   :  { %3741 = vmatprep.subr.bf16.mxu1 %v8444_v0 }
 0x1f3   :  { %3573 = vmatmul.mubr.bf16.gmra.mrb[24].mxu1 %v8028_v9  ;;  %v8071_v9 = vld [vmem:[%s12076_s0 + $0xc8] ss:$72 sps:$4 sm:$0xff]  }
 0x1f4   :  { %4569 = vmatmul.mubr.bf16.gmra.mrb[72].mxu0 %v8029_v10  ;;  %3580 = vmatprep.mubr.bf16.mxu1 %v8030_v11  ;;  %v8072_v10 = vld [vmem:[%s12076_s0 + $0x7f4] ss:$72 sps:$4 sm:$0xff]  }
 0x1f5   :  { %4576 = vmatprep.mubr.bf16.mxu0 %v8032_v14  ;;  %3742 = vmatpush1.bf16.msra.mxu1 %v366_v15  ;;  %v8074_v11 = vld [vmem:[%s12076_s0 + $0x15c] ss:$72 sps:$4 sm:$0xff]   ;;  %v436_v14 = vpack.c.bf16 %v279_v6, %v278_v4  ;;  %v280_v15 = vld [vmem:[%s12075_s1 + $0x830] sm:$0xff] }
 0x1f6   :  { %3743 = vmatprep.subr.bf16.mxu1 %v8444_v0  ;;  %v437_v17 = vpack.c.bf16 %v281_v16, %v280_v15  ;;  %v296_v4 = vld [vmem:[%s12075_s1 + $0x8b0] sm:$0xff]  ;;  %v297_v6 = vld [vmem:[%s12075_s1 + $0x8b8] sm:$0xff]  ;;  %v8102_v15 = vld [vmem:[%s12076_s0 + $0xac4] ss:$72 sps:$4 sm:$0xff]  }
 0x1f7   :  { %v8104_v16 = vld [vmem:[%s12076_s0 + $0x42c] ss:$72 sps:$4 sm:$0xff]  }
 0x1f9   :  { %3744 = vmatpush1.bf16.msra.mxu1 %v367_v19  ;;  %v282_v19 = vld [vmem:[%s12075_s1 + $0x840] sm:$0xff] }
 0x1fa   :  { %3745 = vmatprep.subr.bf16.mxu1 %v8444_v0 }
 0x1fb   :  { %3581 = vmatmul.mubr.bf16.gmra.mrb[28].mxu1 %v8034_v23  ;;  %v8077_v23 = vld [vmem:[%s12076_s0 + $0x158] ss:$72 sps:$4 sm:$0xff]  }
 0x1fc   :  { %4577 = vmatmul.mubr.bf16.gmra.mrb[76].mxu0 %v8035_v25  ;;  %3588 = vmatprep.mubr.bf16.mxu1 %v8036_v26  ;;  %v8078_v25 = vld [vmem:[%s12076_s0 + $0x884] ss:$72 sps:$4 sm:$0xff]  }
 0x1fd   :  { %4584 = vmatprep.mubr.bf16.mxu0 %v8038_v28  ;;  %3746 = vmatpush1.bf16.msra.mxu1 %v368_v29  ;;  %v8080_v26 = vld [vmem:[%s12076_s0 + $0x1ec] ss:$72 sps:$4 sm:$0xff]   ;;  %v438_v28 = vpack.c.bf16 %v283_v21, %v282_v19  ;;  %v301_v21 = vld [vmem:[%s12075_s1 + $0x8d8] sm:$0xff] }
 0x1fe   :  { %3747 = vmatprep.subr.bf16.mxu1 %v8444_v0  ;;  %v284_v29 = vld [vmem:[%s12075_s1 + $0x850] sm:$0xff] }
 0x1ff   :  { %v439_v32 = vpack.c.bf16 %v285_v31, %v284_v29  ;;  %v300_v19 = vld [vmem:[%s12075_s1 + $0x8d0] sm:$0xff]  ;;  %v8110_v31 = vld [vmem:[%s12076_s0 + $0x4bc] ss:$72 sps:$4 sm:$0xff]  }
 0x200   :  { %v8108_v29 = vld [vmem:[%s12076_s0 + $0xb54] ss:$72 sps:$4 sm:$0xff]  }
 0x201   :  { %3748 = vmatpush1.bf16.msra.mxu1 %v369_v33  ;;  %v286_v33 = vld [vmem:[%s12075_s1 + $0x860] sm:$0xff] }
 0x202   :  { %6945 = vmatprep.subr.bf16.mxu1 %v8444_v0 }
 0x203   :  { %3589 = vmatmul.mubr.bf16.gmra.mrb[32].mxu1 %v8040_v35  ;;  %v287_v35 = vld [vmem:[%s12075_s1 + $0x868] sm:$0xff] }
 0x204   :  { %4585 = vmatmul.mubr.bf16.gmra.mrb[80].mxu0 %v8041_v37  ;;  %3596 = vmatprep.mubr.bf16.mxu1 %v8042_v38  ;;  %v8082_v37 = vld [vmem:[%s12076_s0 + $0x880] ss:$72 sps:$4 sm:$0xff]  }
 0x205   :  { %4592 = vmatprep.mubr.bf16.mxu0 %v8044_v39  ;;  %v8083_v38 = vld [vmem:[%s12076_s0 + $0x1e8] ss:$72 sps:$4 sm:$0xff]   ;;  %v8084_v39 = vld [vmem:[%s12076_s0 + $0x914] ss:$72 sps:$4 sm:$0xff]  }
 0x20b   :  { %3597 = vmatmul.mubr.bf16.gmra.mrb[36].mxu1 %v8046_v40  ;;  %v8086_v40 = vld [vmem:[%s12076_s0 + $0x27c] ss:$72 sps:$4 sm:$0xff]  }
 0x20c   :  { %4593 = vmatmul.mubr.bf16.gmra.mrb[84].mxu0 %v8047_v42  ;;  %3604 = vmatprep.mubr.bf16.mxu1 %v8048_v43  ;;  %v440_v42 = vpack.c.bf16 %v287_v35, %v286_v33  ;;  %v288_v43 = vld [vmem:[%s12075_s1 + $0x870] sm:$0xff]  ;;  %v305_v35 = vld [vmem:[%s12075_s1 + $0x8f8] sm:$0xff] }
 0x20d   :  { %4600 = vmatprep.mubr.bf16.mxu0 %v8050_v45  ;;  %v289_v45 = vld [vmem:[%s12075_s1 + $0x878] sm:$0xff]  ;;  %v304_v33 = vld [vmem:[%s12075_s1 + $0x8f0] sm:$0xff] }
 0x213   :  { %3605 = vmatmul.mubr.bf16.gmra.mrb[40].mxu1 %v8052_v46  ;;  %v441_v46 = vpack.c.bf16 %v289_v45, %v288_v43  ;;  %v8118_v43 = vld [vmem:[%s12076_s0 + $0xbe0] ss:$72 sps:$4 sm:$0xff]  }
 0x214   :  { %4601 = vmatmul.mubr.bf16.gmra.mrb[88].mxu0 %v8053_v47  ;;  %3612 = vmatprep.mubr.bf16.mxu1 %v8054_v48  ;;  %v290_v47 = vld [vmem:[%s12075_s1 + $0x880] sm:$0xff]  ;;  %v291_v48 = vld [vmem:[%s12075_s1 + $0x888] sm:$0xff] }
 0x215   :  { %4608 = vmatprep.mubr.bf16.mxu0 %v8056_v49  ;;  %v8088_v49 = vld [vmem:[%s12076_s0 + $0x910] ss:$72 sps:$4 sm:$0xff]  }
 0x216   :  { %v8119_v45 = vld [vmem:[%s12076_s0 + $0x548] ss:$72 sps:$4 sm:$0xff]  }
 0x21b   :  { %3613 = vmatmul.mubr.bf16.gmra.mrb[44].mxu1 %v8058_v51  ;;  %v8089_v51 = vld [vmem:[%s12076_s0 + $0x278] ss:$72 sps:$4 sm:$0xff]  }
 0x21c   :  { %4609 = vmatmul.mubr.bf16.gmra.mrb[92].mxu0 %v8059_v52  ;;  %3620 = vmatprep.mubr.bf16.mxu1 %v8060_v53  ;;  %v8090_v52 = vld [vmem:[%s12076_s0 + $0x9a4] ss:$72 sps:$4 sm:$0xff]  }
 0x21d   :  { %4649 = vmatprep.mubr.bf16.mxu0 %v8064_v54  ;;  %v8092_v53 = vld [vmem:[%s12076_s0 + $0x30c] ss:$72 sps:$4 sm:$0xff]   ;;  %v442_v54 = vpack.c.bf16 %v291_v48, %v290_v47  ;;  %v8122_v47 = vld [vmem:[%s12076_s0 + $0x5dc] ss:$72 sps:$4 sm:$0xff]   ;;  %v8124_v48 = vld [vmem:[%s12076_s0 + $0xc70] ss:$72 sps:$4 sm:$0xff]  }
 0x223   :  { %3621 = vmatmul.mubr.bf16.gmra.mrb[48].mxu1 %v8065_v58  ;;  %v443_v58 = vpack.c.bf16 %v293_v57, %v292_v55  ;;  %v8134_v55 = vld [vmem:[%s12076_s0 + $0x1c] ss:$72 sps:$4 sm:$0xff]  }
 0x224   :  { %4650 = vmatmul.mubr.bf16.vlgmr.msra.gmra.mrb[0].mxu0 %v8062_v59  ;;  %3628 = vmatprep.mubr.bf16.mxu1 %v8066_v60  ;;  %v294_v59 = vld [vmem:[%s12075_s1 + $0x8a0] sm:$0xff]  ;;  %v295_v60 = vld [vmem:[%s12075_s1 + $0x8a8] sm:$0xff] }
 0x225   :  { %4843 = vmatpush1.bf16.msra.mxu0 %v434_v61  ;;  %4657 = vmatprep.mubr.bf16.mxu0 %v8068_v63  ;;  %v8094_v61 = vld [vmem:[%s12076_s0 + $0x9a0] ss:$72 sps:$4 sm:$0xff]   ;;  %v8135_v57 = vld [vmem:[%s12076_s0 + $0x6fc] ss:$72 sps:$4 sm:$0xff]  }
 0x226   :  { %4844 = vmatprep.subr.bf16.mxu0 %v8444_v0  ;;  %v8095_v63 = vld [vmem:[%s12076_s0 + $0x308] ss:$72 sps:$4 sm:$0xff]  }
 0x229   :  { %4845 = vmatpush1.bf16.msra.mxu0 %v435_v3  ;;  %v444_v3 = vpack.c.bf16 %v295_v60, %v294_v59  ;;  %v8137_v59 = vld [vmem:[%s12076_s0 + $0x6f8] ss:$72 sps:$4 sm:$0xff]   ;;  %v8138_v60 = vld [vmem:[%s12076_s0 + $0xac] ss:$72 sps:$4 sm:$0xff]  }
 0x22a   :  { %4846 = vmatprep.subr.bf16.mxu0 %v8444_v0 }
 0x22b   :  { %3629 = vmatmul.mubr.bf16.gmra.mrb[52].mxu1 %v8070_v7  ;;  %v445_v7 = vpack.c.bf16 %v297_v6, %v296_v4  ;;  %v8150_v4 = vld [vmem:[%s12076_s0 + $0x1cc] ss:$72 sps:$4 sm:$0xff]  }
 0x22c   :  { %4658 = vmatmul.mubr.bf16.gmra.mrb[4].mxu0 %v8071_v9  ;;  %3636 = vmatprep.mubr.bf16.mxu1 %v8072_v10  ;;  %v298_v9 = vld [vmem:[%s12075_s1 + $0x8c0] sm:$0xff]  ;;  %v299_v10 = vld [vmem:[%s12075_s1 + $0x8c8] sm:$0xff] }
 0x22d   :  { %4665 = vmatprep.mubr.bf16.mxu0 %v8074_v11  ;;  %4847 = vmatpush1.bf16.msra.mxu0 %v436_v14  ;;  %v8100_v11 = vld [vmem:[%s12076_s0 + $0xa30] ss:$72 sps:$4 sm:$0xff]   ;;  %v8152_v6 = vld [vmem:[%s12076_s0 + $0x8ac] ss:$72 sps:$4 sm:$0xff]  }
 0x22e   :  { %4848 = vmatprep.subr.bf16.mxu0 %v8444_v0  ;;  %v8101_v14 = vld [vmem:[%s12076_s0 + $0x398] ss:$72 sps:$4 sm:$0xff]  }
 0x231   :  { %4849 = vmatpush1.bf16.msra.mxu0 %v437_v17  ;;  %v446_v17 = vpack.c.bf16 %v299_v10, %v298_v9  ;;  %v8158_v9 = vld [vmem:[%s12076_s0 + $0x93c] ss:$72 sps:$4 sm:$0xff]   ;;  %v8161_v10 = vld [vmem:[%s12076_s0 + $0x938] ss:$72 sps:$4 sm:$0xff]  }
 0x232   :  { %4850 = vmatprep.subr.bf16.mxu0 %v8444_v0 }
 0x233   :  { %3637 = vmatmul.mubr.bf16.gmra.mrb[56].mxu1 %v8076_v22  ;;  %v447_v22 = vpack.c.bf16 %v301_v21, %v300_v19  ;;  %v8179_v19 = vld [vmem:[%s12076_s0 + $0xae8] ss:$72 sps:$4 sm:$0xff]   ;;  %v8182_v21 = vld [vmem:[%s12076_s0 + $0xb7c] ss:$72 sps:$4 sm:$0xff]  }
 0x234   :  { %4666 = vmatmul.mubr.bf16.gmra.mrb[8].mxu0 %v8077_v23  ;;  %3644 = vmatprep.mubr.bf16.mxu1 %v8078_v25  ;;  %v302_v23 = vld [vmem:[%s12075_s1 + $0x8e0] sm:$0xff]  ;;  %v303_v25 = vld [vmem:[%s12075_s1 + $0x8e8] sm:$0xff] }
 0x235   :  { %4673 = vmatprep.mubr.bf16.mxu0 %v8080_v26  ;;  %4851 = vmatpush1.bf16.msra.mxu0 %v438_v28  ;;  %v8106_v26 = vld [vmem:[%s12076_s0 + $0xac0] ss:$72 sps:$4 sm:$0xff]  }
 0x236   :  { %4852 = vmatprep.subr.bf16.mxu0 %v8444_v0  ;;  %v8107_v28 = vld [vmem:[%s12076_s0 + $0x428] ss:$72 sps:$4 sm:$0xff]  }
 0x239   :  { %4853 = vmatpush1.bf16.msra.mxu0 %v439_v32  ;;  %v448_v32 = vpack.c.bf16 %v303_v25, %v302_v23  ;;  %v8188_v23 = vld [vmem:[%s12076_s0 + $0xc0c] ss:$72 sps:$4 sm:$0xff]   ;;  %v8192_v25 = vld [vmem:[%s12076_s0 + $0x5bc] ss:$72 sps:$4 sm:$0xff]  }
 0x23a   :  { %4854 = vmatprep.subr.bf16.mxu0 %v8444_v0 }
 0x23b   :  { %3645 = vmatmul.mubr.bf16.gmra.mrb[60].mxu1 %v8082_v37  ;;  %v449_v37 = vpack.c.bf16 %v305_v35, %v304_v33  ;;  %v8203_v33 = vld [vmem:[%s12076_s0 + $0xd28] ss:$72 sps:$4 sm:$0xff]   ;;  %v8204_v35 = vld [vmem:[%s12076_s0 + $0x6dc] ss:$72 sps:$4 sm:$0xff]  }
 0x23c   :  { %4674 = vmatmul.mubr.bf16.gmra.mrb[12].mxu0 %v8083_v38  ;;  %3652 = vmatprep.mubr.bf16.mxu1 %v8084_v39  ;;  %v8112_v38 = vld [vmem:[%s12076_s0 + $0xb50] ss:$72 sps:$4 sm:$0xff]  }
 0x23d   :  { %4681 = vmatprep.mubr.bf16.mxu0 %v8086_v40  ;;  %4855 = vmatpush1.bf16.msra.mxu0 %v440_v42  ;;  %v8113_v39 = vld [vmem:[%s12076_s0 + $0x4b8] ss:$72 sps:$4 sm:$0xff]   ;;  %v8114_v40 = vld [vmem:[%s12076_s0 + $0xbe4] ss:$72 sps:$4 sm:$0xff]  }
 0x23e   :  { %4856 = vmatprep.subr.bf16.mxu0 %v8444_v0  ;;  %v8116_v42 = vld [vmem:[%s12076_s0 + $0x54c] ss:$72 sps:$4 sm:$0xff]  }
 0x241   :  { %4857 = vmatpush1.bf16.msra.mxu0 %v441_v46  ;;  %v8120_v46 = vld [vmem:[%s12076_s0 + $0xc74] ss:$72 sps:$4 sm:$0xff]  }
 0x242   :  { %4858 = vmatprep.subr.bf16.mxu0 %v8444_v0 }
 0x243   :  { %3653 = vmatmul.mubr.bf16.gmra.mrb[64].mxu1 %v8088_v49  ;;  %v8125_v49 = vld [vmem:[%s12076_s0 + $0x5d8] ss:$72 sps:$4 sm:$0xff]  }
 0x244   :  { %4682 = vmatmul.mubr.bf16.gmra.mrb[16].mxu0 %v8089_v51  ;;  %3660 = vmatprep.mubr.bf16.mxu1 %v8090_v52  ;;  %v8126_v51 = vld [vmem:[%s12076_s0 + $0xd04] ss:$72 sps:$4 sm:$0xff]  }
 0x245   :  { %4689 = vmatprep.mubr.bf16.mxu0 %v8092_v53  ;;  %4859 = vmatpush1.bf16.msra.mxu0 %v442_v54  ;;  %v8128_v52 = vld [vmem:[%s12076_s0 + $0x66c] ss:$72 sps:$4 sm:$0xff]   ;;  %v8130_v53 = vld [vmem:[%s12076_s0 + $0xd00] ss:$72 sps:$4 sm:$0xff]  }
 0x246   :  { %4860 = vmatprep.subr.bf16.mxu0 %v8444_v0  ;;  %v8131_v54 = vld [vmem:[%s12076_s0 + $0x668] ss:$72 sps:$4 sm:$0xff]  }
 0x249   :  { %4861 = vmatpush1.bf16.msra.mxu0 %v443_v58  ;;  %v8132_v58 = vld [vmem:[%s12076_s0 + $0x18] ss:$72 sps:$4 sm:$0xff]  }
 0x24a   :  { %4862 = vmatprep.subr.bf16.mxu0 %v8444_v0 }
 0x24b   :  { %3661 = vmatmul.mubr.bf16.gmra.mrb[68].mxu1 %v8094_v61  ;;  %v8140_v61 = vld [vmem:[%s12076_s0 + $0x78c] ss:$72 sps:$4 sm:$0xff]  }
 0x24c   :  { %4690 = vmatmul.mubr.bf16.gmra.mrb[20].mxu0 %v8095_v63  ;;  %3668 = vmatprep.mubr.bf16.mxu1 %v8096_v1  ;;  %v8142_v63 = vld [vmem:[%s12076_s0 + $0xa8] ss:$72 sps:$4 sm:$0xff]  }
 0x24d   :  { %4697 = vmatprep.mubr.bf16.mxu0 %v8098_v2  ;;  %4863 = vmatpush1.bf16.msra.mxu0 %v444_v3  ;;  %v8143_v1 = vld [vmem:[%s12076_s0 + $0x788] ss:$72 sps:$4 sm:$0xff]   ;;  %v8144_v2 = vld [vmem:[%s12076_s0 + $0x13c] ss:$72 sps:$4 sm:$0xff]   ;;  %v8148_v3 = vld [vmem:[%s12076_s0 + $0x138] ss:$72 sps:$4 sm:$0xff]  }
 0x24e   :  { %4864 = vmatprep.subr.bf16.mxu0 %v8444_v0 }
 0x251   :  { %4865 = vmatpush1.bf16.msra.mxu0 %v445_v7  ;;  %v8155_v7 = vld [vmem:[%s12076_s0 + $0x8a8] ss:$72 sps:$4 sm:$0xff]  }
 0x252   :  { %4866 = vmatprep.subr.bf16.mxu0 %v8444_v0 }
 0x253   :  { %3669 = vmatmul.mubr.bf16.gmra.mrb[72].mxu1 %v8100_v11  ;;  %v8164_v11 = vld [vmem:[%s12076_s0 + $0x9cc] ss:$72 sps:$4 sm:$0xff]  }
 0x254   :  { %4698 = vmatmul.mubr.bf16.gmra.mrb[24].mxu0 %v8101_v14  ;;  %3676 = vmatprep.mubr.bf16.mxu1 %v8102_v15  ;;  %v8167_v14 = vld [vmem:[%s12076_s0 + $0x9c8] ss:$72 sps:$4 sm:$0xff]   ;;  %v8170_v15 = vld [vmem:[%s12076_s0 + $0xa5c] ss:$72 sps:$4 sm:$0xff]  }
 0x255   :  { %4705 = vmatprep.mubr.bf16.mxu0 %v8104_v16  ;;  %4867 = vmatpush1.bf16.msra.mxu0 %v446_v17  ;;  %v8173_v16 = vld [vmem:[%s12076_s0 + $0xa58] ss:$72 sps:$4 sm:$0xff]   ;;  %v8176_v17 = vld [vmem:[%s12076_s0 + $0xaec] ss:$72 sps:$4 sm:$0xff]  }
 0x256   :  { %4868 = vmatprep.subr.bf16.mxu0 %v8444_v0 }
 0x259   :  { %4869 = vmatpush1.bf16.msra.mxu0 %v447_v22  ;;  %v8185_v22 = vld [vmem:[%s12076_s0 + $0xb78] ss:$72 sps:$4 sm:$0xff]  }
 0x25a   :  { %4870 = vmatprep.subr.bf16.mxu0 %v8444_v0 }
 0x25b   :  { %3677 = vmatmul.mubr.bf16.gmra.mrb[76].mxu1 %v8106_v26  ;;  %v8196_v26 = vld [vmem:[%s12076_s0 + $0x5b8] ss:$72 sps:$4 sm:$0xff]  }
 0x25c   :  { %4706 = vmatmul.mubr.bf16.gmra.mrb[28].mxu0 %v8107_v28  ;;  %3684 = vmatprep.mubr.bf16.mxu1 %v8108_v29  ;;  %v8197_v28 = vld [vmem:[%s12076_s0 + $0xc98] ss:$72 sps:$4 sm:$0xff]   ;;  %v8198_v29 = vld [vmem:[%s12076_s0 + $0x64c] ss:$72 sps:$4 sm:$0xff]  }
 0x25d   :  { %4713 = vmatprep.mubr.bf16.mxu0 %v8110_v31  ;;  %4871 = vmatpush1.bf16.msra.mxu0 %v448_v32  ;;  %v8200_v31 = vld [vmem:[%s12076_s0 + $0xd2c] ss:$72 sps:$4 sm:$0xff]   ;;  %v8202_v32 = vld [vmem:[%s12076_s0 + $0x648] ss:$72 sps:$4 sm:$0xff]  }
 0x25e   :  { %4872 = vmatprep.subr.bf16.mxu0 %v8444_v0 }
 0x261   :  { %4873 = vmatpush1.bf16.msra.mxu0 %v449_v37  ;;  %v8208_v37 = vld [vmem:[%s12076_s0 + $0x44] ss:$72 sps:$4 sm:$0xff]  }
 0x263   :  { %3685 = vmatmul.mubr.bf16.gmra.mrb[80].mxu1 %v8112_v38  ;;  %v8209_v38 = vld [vmem:[%s12076_s0 + $0x6d8] ss:$72 sps:$4 sm:$0xff]  }
 0x264   :  { %4714 = vmatmul.mubr.bf16.gmra.mrb[32].mxu0 %v8113_v39  ;;  %3692 = vmatprep.mubr.bf16.mxu1 %v8114_v40  ;;  %v8206_v39 = vld [vmem:[%s12076_s0 + $0x40] ss:$72 sps:$4 sm:$0xff]   ;;  %v8210_v40 = vld [vmem:[%s12076_s0 + $0x76c] ss:$72 sps:$4 sm:$0xff]  }
 0x265   :  { %4721 = vmatprep.mubr.bf16.mxu0 %v8116_v42  ;;  %v8212_v42 = vld [vmem:[%s12076_s0 + $0xd4] ss:$72 sps:$4 sm:$0xff]  }
 0x26b   :  { %3693 = vmatmul.mubr.bf16.gmra.mrb[84].mxu1 %v8118_v43  ;;  %v8214_v43 = vld [vmem:[%s12076_s0 + $0x768] ss:$72 sps:$4 sm:$0xff]  }
 0x26c   :  { %4722 = vmatmul.mubr.bf16.gmra.mrb[36].mxu0 %v8119_v45  ;;  %3700 = vmatprep.mubr.bf16.mxu1 %v8120_v46  ;;  %v8215_v45 = vld [vmem:[%s12076_s0 + $0xd0] ss:$72 sps:$4 sm:$0xff]   ;;  %v8216_v46 = vld [vmem:[%s12076_s0 + $0x7fc] ss:$72 sps:$4 sm:$0xff]  }
 0x26d   :  { %4729 = vmatprep.mubr.bf16.mxu0 %v8122_v47  ;;  %v8218_v47 = vld [vmem:[%s12076_s0 + $0x164] ss:$72 sps:$4 sm:$0xff]  }
 0x273   :  { %3701 = vmatmul.mubr.bf16.gmra.mrb[88].mxu1 %v8124_v48  ;;  %v8220_v48 = vld [vmem:[%s12076_s0 + $0x7f8] ss:$72 sps:$4 sm:$0xff]  }
 0x274   :  { %4730 = vmatmul.mubr.bf16.gmra.mrb[40].mxu0 %v8125_v49  ;;  %3708 = vmatprep.mubr.bf16.mxu1 %v8126_v51  ;;  %v8221_v49 = vld [vmem:[%s12076_s0 + $0x160] ss:$72 sps:$4 sm:$0xff]   ;;  %v8222_v51 = vld [vmem:[%s12076_s0 + $0x88c] ss:$72 sps:$4 sm:$0xff]  }
 0x275   :  { %4737 = vmatprep.mubr.bf16.mxu0 %v8128_v52  ;;  %v8224_v52 = vld [vmem:[%s12076_s0 + $0x1f4] ss:$72 sps:$4 sm:$0xff]  }
 0x27b   :  { %3709 = vmatmul.mubr.bf16.gmra.mrb[92].mxu1 %v8130_v53  ;;  %v8226_v53 = vld [vmem:[%s12076_s0 + $0x888] ss:$72 sps:$4 sm:$0xff]  }
 0x27c   :  { %4738 = vmatmul.mubr.bf16.gmra.mrb[44].mxu0 %v8131_v54  ;;  %3749 = vmatprep.mubr.bf16.mxu1 %v8134_v55  ;;  %v8227_v54 = vld [vmem:[%s12076_s0 + $0x1f0] ss:$72 sps:$4 sm:$0xff]   ;;  %v8228_v55 = vld [vmem:[%s12076_s0 + $0x91c] ss:$72 sps:$4 sm:$0xff]  }
 0x27d   :  { %4745 = vmatprep.mubr.bf16.mxu0 %v8135_v57  ;;  %v8230_v57 = vld [vmem:[%s12076_s0 + $0x284] ss:$72 sps:$4 sm:$0xff]  }
 0x283   :  { %3750 = vmatmul.mubr.bf16.vlgmr.msra.gmra.mrb[0].mxu1 %v8132_v58  ;;  %v8232_v58 = vld [vmem:[%s12076_s0 + $0x918] ss:$72 sps:$4 sm:$0xff]  }
 0x284   :  { %4746 = vmatmul.mubr.bf16.gmra.mrb[48].mxu0 %v8137_v59  ;;  %6961 = vmatpush1.bf16.msra.mxu1 %v8492_v8  ;;  %v8146_v8 = vld [vmem:[%s12076_s0 + $0x81c] ss:$72 sps:$4 sm:$0xff]   ;;  %v8233_v59 = vld [vmem:[%s12076_s0 + $0x280] ss:$72 sps:$4 sm:$0xff]  }
 0x285   :  { %3757 = vmatprep.mubr.bf16.mxu1 %v8138_v60  ;;  %4753 = vmatprep.mubr.bf16.mxu0 %v8140_v61  ;;  %v8234_v60 = vld [vmem:[%s12076_s0 + $0x9ac] ss:$72 sps:$4 sm:$0xff]  }
 0x286   :  { %6946 = vmatprep.subr.bf16.mxu1 %v8444_v0  ;;  %v8236_v61 = vld [vmem:[%s12076_s0 + $0x314] ss:$72 sps:$4 sm:$0xff]  }
 0x288   :  { %6962 = vmatpush1.bf16.msra.mxu1 %v8502_v12  ;;  %v8149_v12 = vld [vmem:[%s12076_s0 + $0x818] ss:$72 sps:$4 sm:$0xff]  }
 0x289   :  { %6947 = vmatprep.subr.bf16.mxu1 %v8444_v0 }
 0x28b   :  { %3758 = vmatmul.mubr.bf16.gmra.mrb[4].mxu1 %v8142_v63  ;;  %v8238_v63 = vld [vmem:[%s12076_s0 + $0x9a8] ss:$72 sps:$4 sm:$0xff]  }
 0x28c   :  { %4754 = vmatmul.mubr.bf16.gmra.mrb[52].mxu0 %v8143_v1  ;;  %3765 = vmatprep.mubr.bf16.mxu1 %v8144_v2  ;;  %v8239_v1 = vld [vmem:[%s12076_s0 + $0x310] ss:$72 sps:$4 sm:$0xff]   ;;  %v8240_v2 = vld [vmem:[%s12076_s0 + $0xa3c] ss:$72 sps:$4 sm:$0xff]  }
 0x28d   :  { %4761 = vmatprep.mubr.bf16.mxu0 %v8146_v8  ;;  %6963 = vmatpush1.bf16.msra.mxu1 %v8519_v18  ;;  %v8154_v18 = vld [vmem:[%s12076_s0 + $0x1c8] ss:$72 sps:$4 sm:$0xff]   ;;  %v8242_v8 = vld [vmem:[%s12076_s0 + $0x3a4] ss:$72 sps:$4 sm:$0xff]  }
 0x28e   :  { %6948 = vmatprep.subr.bf16.mxu1 %v8444_v0 }
 0x291   :  { %6964 = vmatpush1.bf16.msra.mxu1 %v8536_v24  ;;  %v8156_v24 = vld [vmem:[%s12076_s0 + $0x25c] ss:$72 sps:$4 sm:$0xff]  }
 0x292   :  { %6949 = vmatprep.subr.bf16.mxu1 %v8444_v0 }
 0x293   :  { %3766 = vmatmul.mubr.bf16.gmra.mrb[8].mxu1 %v8148_v3  ;;  %v8244_v3 = vld [vmem:[%s12076_s0 + $0xa38] ss:$72 sps:$4 sm:$0xff]  }
 0x294   :  { %4762 = vmatmul.mubr.bf16.gmra.mrb[56].mxu0 %v8149_v12  ;;  %3773 = vmatprep.mubr.bf16.mxu1 %v8150_v4  ;;  %v8245_v12 = vld [vmem:[%s12076_s0 + $0x3a0] ss:$72 sps:$4 sm:$0xff]   ;;  %v8246_v4 = vld [vmem:[%s12076_s0 + $0xacc] ss:$72 sps:$4 sm:$0xff]  }
 0x295   :  { %4769 = vmatprep.mubr.bf16.mxu0 %v8152_v6  ;;  %6965 = vmatpush1.bf16.msra.mxu1 %v8553_v30  ;;  %v8160_v30 = vld [vmem:[%s12076_s0 + $0x258] ss:$72 sps:$4 sm:$0xff]   ;;  %v8248_v6 = vld [vmem:[%s12076_s0 + $0x434] ss:$72 sps:$4 sm:$0xff]  }
 0x296   :  { %6950 = vmatprep.subr.bf16.mxu1 %v8444_v0 }
 0x299   :  { %6966 = vmatpush1.bf16.msra.mxu1 %v8570_v36  ;;  %v8162_v36 = vld [vmem:[%s12076_s0 + $0x2ec] ss:$72 sps:$4 sm:$0xff]  }
 0x29a   :  { %6951 = vmatprep.subr.bf16.mxu1 %v8444_v0 }
 0x29b   :  { %3774 = vmatmul.mubr.bf16.gmra.mrb[12].mxu1 %v8154_v18  ;;  %v8250_v18 = vld [vmem:[%s12076_s0 + $0xac8] ss:$72 sps:$4 sm:$0xff]  }
 0x29c   :  { %4770 = vmatmul.mubr.bf16.gmra.mrb[60].mxu0 %v8155_v7  ;;  %3781 = vmatprep.mubr.bf16.mxu1 %v8156_v24  ;;  %v8251_v7 = vld [vmem:[%s12076_s0 + $0x430] ss:$72 sps:$4 sm:$0xff]   ;;  %v8252_v24 = vld [vmem:[%s12076_s0 + $0xb5c] ss:$72 sps:$4 sm:$0xff]  }
 0x29d   :  { %4777 = vmatprep.mubr.bf16.mxu0 %v8158_v9  ;;  %6967 = vmatpush1.bf16.msra.mxu1 %v8593_v44  ;;  %v8166_v44 = vld [vmem:[%s12076_s0 + $0x2e8] ss:$72 sps:$4 sm:$0xff]   ;;  %v8254_v9 = vld [vmem:[%s12076_s0 + $0x4c4] ss:$72 sps:$4 sm:$0xff]  }
 0x29e   :  { %6952 = vmatprep.subr.bf16.mxu1 %v8444_v0 }
 0x2a1   :  { %6968 = vmatpush1.bf16.msra.mxu1 %v8610_v50  ;;  %v8168_v50 = vld [vmem:[%s12076_s0 + $0x37c] ss:$72 sps:$4 sm:$0xff]  }
 0x2a2   :  { %6953 = vmatprep.subr.bf16.mxu1 %v8444_v0 }
 0x2a3   :  { %3782 = vmatmul.mubr.bf16.gmra.mrb[16].mxu1 %v8160_v30  ;;  %v8256_v30 = vld [vmem:[%s12076_s0 + $0xb58] ss:$72 sps:$4 sm:$0xff]  }
 0x2a4   :  { %4778 = vmatmul.mubr.bf16.gmra.mrb[64].mxu0 %v8161_v10  ;;  %3789 = vmatprep.mubr.bf16.mxu1 %v8162_v36  ;;  %v8257_v10 = vld [vmem:[%s12076_s0 + $0x4c0] ss:$72 sps:$4 sm:$0xff]   ;;  %v8258_v36 = vld [vmem:[%s12076_s0 + $0xbec] ss:$72 sps:$4 sm:$0xff]  }
 0x2a5   :  { %4785 = vmatprep.mubr.bf16.mxu0 %v8164_v11  ;;  %6969 = vmatpush1.bf16.msra.mxu1 %v8627_v56  ;;  %v8172_v56 = vld [vmem:[%s12076_s0 + $0x378] ss:$72 sps:$4 sm:$0xff]   ;;  %v8260_v11 = vld [vmem:[%s12076_s0 + $0x554] ss:$72 sps:$4 sm:$0xff]  }
 0x2a6   :  { %6954 = vmatprep.subr.bf16.mxu1 %v8444_v0 }
 0x2a9   :  { %6970 = vmatpush1.bf16.msra.mxu1 %v8644_v62  ;;  %v8174_v62 = vld [vmem:[%s12076_s0 + $0x40c] ss:$72 sps:$4 sm:$0xff]  }
 0x2aa   :  { %6955 = vmatprep.subr.bf16.mxu1 %v8444_v0 }
 0x2ab   :  { %3790 = vmatmul.mubr.bf16.gmra.mrb[20].mxu1 %v8166_v44  ;;  %v8262_v44 = vld [vmem:[%s12076_s0 + $0xbe8] ss:$72 sps:$4 sm:$0xff]  }
 0x2ac   :  { %4786 = vmatmul.mubr.bf16.gmra.mrb[68].mxu0 %v8167_v14  ;;  %3797 = vmatprep.mubr.bf16.mxu1 %v8168_v50  ;;  %v8263_v14 = vld [vmem:[%s12076_s0 + $0x550] ss:$72 sps:$4 sm:$0xff]   ;;  %v8264_v50 = vld [vmem:[%s12076_s0 + $0xc7c] ss:$72 sps:$4 sm:$0xff]  }
 0x2ad   :  { %4793 = vmatprep.mubr.bf16.mxu0 %v8170_v15  ;;  %6971 = vmatpush1.bf16.msra.mxu1 %v8661_v5  ;;  %v8178_v5 = vld [vmem:[%s12076_s0 + $0x408] ss:$72 sps:$4 sm:$0xff]   ;;  %v8266_v15 = vld [vmem:[%s12076_s0 + $0x5e4] ss:$72 sps:$4 sm:$0xff]  }
 0x2ae   :  { %6956 = vmatprep.subr.bf16.mxu1 %v8444_v0 }
 0x2b1   :  { %6972 = vmatpush1.bf16.msra.mxu1 %v8678_v13  ;;  %v8180_v13 = vld [vmem:[%s12076_s0 + $0x49c] ss:$72 sps:$4 sm:$0xff]  }
 0x2b2   :  { %6957 = vmatprep.subr.bf16.mxu1 %v8444_v0 }
 0x2b3   :  { %3798 = vmatmul.mubr.bf16.gmra.mrb[24].mxu1 %v8172_v56  ;;  %v8268_v56 = vld [vmem:[%s12076_s0 + $0xc78] ss:$72 sps:$4 sm:$0xff]  }
 0x2b4   :  { %4794 = vmatmul.mubr.bf16.gmra.mrb[72].mxu0 %v8173_v16  ;;  %3805 = vmatprep.mubr.bf16.mxu1 %v8174_v62  ;;  %v8269_v16 = vld [vmem:[%s12076_s0 + $0x5e0] ss:$72 sps:$4 sm:$0xff]   ;;  %v8270_v62 = vld [vmem:[%s12076_s0 + $0xd0c] ss:$72 sps:$4 sm:$0xff]  }
 0x2b5   :  { %4801 = vmatprep.mubr.bf16.mxu0 %v8176_v17  ;;  %6973 = vmatpush1.bf16.msra.mxu1 %v8695_v20  ;;  %v8184_v20 = vld [vmem:[%s12076_s0 + $0x498] ss:$72 sps:$4 sm:$0xff]   ;;  %v8272_v17 = vld [vmem:[%s12076_s0 + $0x674] ss:$72 sps:$4 sm:$0xff]  }
 0x2b6   :  { %6958 = vmatprep.subr.bf16.mxu1 %v8444_v0 }
 0x2b9   :  { %6974 = vmatpush1.bf16.msra.mxu1 %v8712_v27  ;;  %v8186_v27 = vld [vmem:[%s12076_s0 + $0x52c] ss:$72 sps:$4 sm:$0xff]  }
 0x2ba   :  { %6959 = vmatprep.subr.bf16.mxu1 %v8444_v0 }
 0x2bb   :  { %3806 = vmatmul.mubr.bf16.gmra.mrb[28].mxu1 %v8178_v5  ;;  %v8274_v5 = vld [vmem:[%s12076_s0 + $0xd08] ss:$72 sps:$4 sm:$0xff]  }
 0x2bc   :  { %4802 = vmatmul.mubr.bf16.gmra.mrb[76].mxu0 %v8179_v19  ;;  %3813 = vmatprep.mubr.bf16.mxu1 %v8180_v13  ;;  %v8275_v19 = vld [vmem:[%s12076_s0 + $0x670] ss:$72 sps:$4 sm:$0xff]   ;;  %v8278_v13 = vld [vmem:[%s12076_s0 + $0x6e4] ss:$72 sps:$4 sm:$0xff]  }
 0x2bd   :  { %4809 = vmatprep.mubr.bf16.mxu0 %v8182_v21  ;;  %6975 = vmatpush1.bf16.msra.mxu1 %v8729_v34  ;;  %v8191_v34 = vld [vmem:[%s12076_s0 + $0xc08] ss:$72 sps:$4 sm:$0xff]   ;;  %v8279_v21 = vld [vmem:[%s12076_s0 + $0x704] ss:$72 sps:$4 sm:$0xff]  }
 0x2be   :  { %6960 = vmatprep.subr.bf16.mxu1 %v8444_v0  ;;  %v8190_v0 = vld [vmem:[%s12076_s0 + $0x528] ss:$72 sps:$4 sm:$0xff]  }
 0x2c1   :  { %6976 = vmatpush1.bf16.msra.mxu1 %v8746_v41  ;;  %v8194_v41 = vld [vmem:[%s12076_s0 + $0xc9c] ss:$72 sps:$4 sm:$0xff]  }
 0x2c3   :  { %3814 = vmatmul.mubr.bf16.gmra.mrb[32].mxu1 %v8184_v20  ;;  %v8276_v20 = vld [vmem:[%s12076_s0 + $0x6e0] ss:$72 sps:$4 sm:$0xff]  }
 0x2c4   :  { %4810 = vmatmul.mubr.bf16.gmra.mrb[80].mxu0 %v8185_v22  ;;  %3821 = vmatprep.mubr.bf16.mxu1 %v8186_v27  ;;  %v8281_v22 = vld [vmem:[%s12076_s0 + $0x700] ss:$72 sps:$4 sm:$0xff]   ;;  %v8282_v27 = vld [vmem:[%s12076_s0 + $0x774] ss:$72 sps:$4 sm:$0xff]  }
 0x2c5   :  { %4817 = vmatprep.mubr.bf16.mxu0 %v8188_v23  ;;  %v8284_v23 = vld [vmem:[%s12076_s0 + $0x794] ss:$72 sps:$4 sm:$0xff]  }
 0x2cb   :  { %3822 = vmatmul.mubr.bf16.gmra.mrb[36].mxu1 %v8190_v0  ;;  %v8286_v0 = vld [vmem:[%s12076_s0 + $0x770] ss:$72 sps:$4 sm:$0xff]  }
 0x2cc   :  { %4818 = vmatmul.mubr.bf16.gmra.mrb[84].mxu0 %v8191_v34  ;;  %3829 = vmatprep.mubr.bf16.mxu1 %v8192_v25  ;;  %v8287_v34 = vld [vmem:[%s12076_s0 + $0x790] ss:$72 sps:$4 sm:$0xff]   ;;  %v8288_v25 = vld [vmem:[%s12076_s0 + $0x804] ss:$72 sps:$4 sm:$0xff]  }
 0x2cd   :  { %4825 = vmatprep.mubr.bf16.mxu0 %v8194_v41  ;;  %v8290_v41 = vld [vmem:[%s12076_s0 + $0x824] ss:$72 sps:$4 sm:$0xff]  }
 0x2d3   :  { %3830 = vmatmul.mubr.bf16.gmra.mrb[40].mxu1 %v8196_v26  ;;  %v8292_v26 = vld [vmem:[%s12076_s0 + $0x800] ss:$72 sps:$4 sm:$0xff]  }
 0x2d4   :  { %4826 = vmatmul.mubr.bf16.gmra.mrb[88].mxu0 %v8197_v28  ;;  %3837 = vmatprep.mubr.bf16.mxu1 %v8198_v29  ;;  %v8293_v28 = vld [vmem:[%s12076_s0 + $0x820] ss:$72 sps:$4 sm:$0xff]   ;;  %v8294_v29 = vld [vmem:[%s12076_s0 + $0x894] ss:$72 sps:$4 sm:$0xff]  }
 0x2d5   :  { %4833 = vmatprep.mubr.bf16.mxu0 %v8200_v31  ;;  %v8296_v31 = vld [vmem:[%s12076_s0 + $0x8b4] ss:$72 sps:$4 sm:$0xff]  }
 0x2db   :  { %3838 = vmatmul.mubr.bf16.gmra.mrb[44].mxu1 %v8202_v32 }
 0x2dc   :  { %4834 = vmatmul.mubr.bf16.gmra.mrb[92].mxu0 %v8203_v33  ;;  %3845 = vmatprep.mubr.bf16.mxu1 %v8204_v35  ;;  %v8298_v35 = vld [vmem:[%s12076_s0 + $0x890] ss:$72 sps:$4 sm:$0xff]  }
 0x2dd   :  { %4874 = vmatprep.mubr.bf16.mxu0 %v8208_v37 }
 0x2e3   :  { %3846 = vmatmul.mubr.bf16.gmra.mrb[48].mxu1 %v8209_v38  ;;  %v8299_v38 = vld [vmem:[%s12076_s0 + $0x8b0] ss:$72 sps:$4 sm:$0xff]  }
 0x2e4   :  { %4875 = vmatmul.mubr.bf16.vlgmr.msra.gmra.mrb[0].mxu0 %v8206_v39  ;;  %3853 = vmatprep.mubr.bf16.mxu1 %v8210_v40  ;;  %v8300_v39 = vld [vmem:[%s12076_s0 + $0x924] ss:$72 sps:$4 sm:$0xff]  }
 0x2e5   :  { %4882 = vmatprep.mubr.bf16.mxu0 %v8212_v42  ;;  %v8302_v42 = vld [vmem:[%s12076_s0 + $0x944] ss:$72 sps:$4 sm:$0xff]  }
 0x2eb   :  { %3854 = vmatmul.mubr.bf16.gmra.mrb[52].mxu1 %v8214_v43 }
 0x2ec   :  { %4883 = vmatmul.mubr.bf16.gmra.mrb[4].mxu0 %v8215_v45  ;;  %3861 = vmatprep.mubr.bf16.mxu1 %v8216_v46  ;;  %v8304_v46 = vld [vmem:[%s12076_s0 + $0x920] ss:$72 sps:$4 sm:$0xff]  }
 0x2ed   :  { %4890 = vmatprep.mubr.bf16.mxu0 %v8218_v47 }
 0x2f3   :  { %3862 = vmatmul.mubr.bf16.gmra.mrb[56].mxu1 %v8220_v48  ;;  %v8305_v48 = vld [vmem:[%s12076_s0 + $0x940] ss:$72 sps:$4 sm:$0xff]  }
 0x2f4   :  { %4891 = vmatmul.mubr.bf16.gmra.mrb[8].mxu0 %v8221_v49  ;;  %3869 = vmatprep.mubr.bf16.mxu1 %v8222_v51  ;;  %v8306_v49 = vld [vmem:[%s12076_s0 + $0x9b4] ss:$72 sps:$4 sm:$0xff]  }
 0x2f5   :  { %4898 = vmatprep.mubr.bf16.mxu0 %v8224_v52  ;;  %v8308_v52 = vld [vmem:[%s12076_s0 + $0x9d4] ss:$72 sps:$4 sm:$0xff]  }
 0x2fb   :  { %3870 = vmatmul.mubr.bf16.gmra.mrb[60].mxu1 %v8226_v53 }
 0x2fc   :  { %4899 = vmatmul.mubr.bf16.gmra.mrb[12].mxu0 %v8227_v54  ;;  %3877 = vmatprep.mubr.bf16.mxu1 %v8228_v55  ;;  %v8310_v55 = vld [vmem:[%s12076_s0 + $0x9b0] ss:$72 sps:$4 sm:$0xff]  }
 0x2fd   :  { %4906 = vmatprep.mubr.bf16.mxu0 %v8230_v57 }
 0x303   :  { %3878 = vmatmul.mubr.bf16.gmra.mrb[64].mxu1 %v8232_v58  ;;  %v8311_v58 = vld [vmem:[%s12076_s0 + $0x9d0] ss:$72 sps:$4 sm:$0xff]  }
 0x304   :  { %4907 = vmatmul.mubr.bf16.gmra.mrb[16].mxu0 %v8233_v59  ;;  %3885 = vmatprep.mubr.bf16.mxu1 %v8234_v60  ;;  %v8312_v59 = vld [vmem:[%s12076_s0 + $0xa44] ss:$72 sps:$4 sm:$0xff]  }
 0x305   :  { %4914 = vmatprep.mubr.bf16.mxu0 %v8236_v61  ;;  %v8314_v61 = vld [vmem:[%s12076_s0 + $0xa64] ss:$72 sps:$4 sm:$0xff]  }
 0x30b   :  { %3886 = vmatmul.mubr.bf16.gmra.mrb[68].mxu1 %v8238_v63 }
 0x30c   :  { %4915 = vmatmul.mubr.bf16.gmra.mrb[20].mxu0 %v8239_v1  ;;  %3893 = vmatprep.mubr.bf16.mxu1 %v8240_v2  ;;  %v8316_v2 = vld [vmem:[%s12076_s0 + $0xa40] ss:$72 sps:$4 sm:$0xff]  }
 0x30d   :  { %4922 = vmatprep.mubr.bf16.mxu0 %v8242_v8 }
 0x313   :  { %3894 = vmatmul.mubr.bf16.gmra.mrb[72].mxu1 %v8244_v3  ;;  %v8317_v3 = vld [vmem:[%s12076_s0 + $0xa60] ss:$72 sps:$4 sm:$0xff]  }
 0x314   :  { %4923 = vmatmul.mubr.bf16.gmra.mrb[24].mxu0 %v8245_v12  ;;  %3901 = vmatprep.mubr.bf16.mxu1 %v8246_v4  ;;  %v8318_v12 = vld [vmem:[%s12076_s0 + $0xad4] ss:$72 sps:$4 sm:$0xff]  }
 0x315   :  { %4930 = vmatprep.mubr.bf16.mxu0 %v8248_v6  ;;  %v8320_v6 = vld [vmem:[%s12076_s0 + $0xaf4] ss:$72 sps:$4 sm:$0xff]  }
 0x31b   :  { %3902 = vmatmul.mubr.bf16.gmra.mrb[76].mxu1 %v8250_v18 }
 0x31c   :  { %4931 = vmatmul.mubr.bf16.gmra.mrb[28].mxu0 %v8251_v7  ;;  %3909 = vmatprep.mubr.bf16.mxu1 %v8252_v24  ;;  %v8322_v24 = vld [vmem:[%s12076_s0 + $0xad0] ss:$72 sps:$4 sm:$0xff]  }
 0x31d   :  { %4938 = vmatprep.mubr.bf16.mxu0 %v8254_v9 }
 0x323   :  { %3910 = vmatmul.mubr.bf16.gmra.mrb[80].mxu1 %v8256_v30  ;;  %v8323_v30 = vld [vmem:[%s12076_s0 + $0xaf0] ss:$72 sps:$4 sm:$0xff]  }
 0x324   :  { %4939 = vmatmul.mubr.bf16.gmra.mrb[32].mxu0 %v8257_v10  ;;  %3917 = vmatprep.mubr.bf16.mxu1 %v8258_v36  ;;  %v8324_v10 = vld [vmem:[%s12076_s0 + $0xb64] ss:$72 sps:$4 sm:$0xff]  }
 0x325   :  { %4946 = vmatprep.mubr.bf16.mxu0 %v8260_v11  ;;  %v8326_v11 = vld [vmem:[%s12076_s0 + $0xb84] ss:$72 sps:$4 sm:$0xff]  }
 0x32b   :  { %3918 = vmatmul.mubr.bf16.gmra.mrb[84].mxu1 %v8262_v44 }
 0x32c   :  { %4947 = vmatmul.mubr.bf16.gmra.mrb[36].mxu0 %v8263_v14  ;;  %3925 = vmatprep.mubr.bf16.mxu1 %v8264_v50  ;;  %v8328_v50 = vld [vmem:[%s12076_s0 + $0xb60] ss:$72 sps:$4 sm:$0xff]  }
 0x32d   :  { %4954 = vmatprep.mubr.bf16.mxu0 %v8266_v15 }
 0x333   :  { %3926 = vmatmul.mubr.bf16.gmra.mrb[88].mxu1 %v8268_v56  ;;  %v8329_v56 = vld [vmem:[%s12076_s0 + $0xb80] ss:$72 sps:$4 sm:$0xff]  }
 0x334   :  { %4955 = vmatmul.mubr.bf16.gmra.mrb[40].mxu0 %v8269_v16  ;;  %3933 = vmatprep.mubr.bf16.mxu1 %v8270_v62  ;;  %v8330_v16 = vld [vmem:[%s12076_s0 + $0xbf4] ss:$72 sps:$4 sm:$0xff]  }
 0x335   :  { %4962 = vmatprep.mubr.bf16.mxu0 %v8272_v17  ;;  %v8332_v17 = vld [vmem:[%s12076_s0 + $0xc14] ss:$72 sps:$4 sm:$0xff]  }
 0x33b   :  { %3934 = vmatmul.mubr.bf16.gmra.mrb[92].mxu1 %v8274_v5 }
 0x33c   :  { %4963 = vmatmul.mubr.bf16.gmra.mrb[44].mxu0 %v8275_v19  ;;  %4070 = vmatprep.mubr.bf16.mxu1 %v8278_v13  ;;  %v8334_v13 = vld [vmem:[%s12076_s0 + $0xbf0] ss:$72 sps:$4 sm:$0xff]  }
 0x33d   :  { %4970 = vmatprep.mubr.bf16.mxu0 %v8279_v21 }
 0x343   :  { %4071 = vmatmul.mubr.bf16.vlgmr.msra.gmra.mrb[48].mxu1 %v8276_v20  ;;  %v8335_v20 = vld [vmem:[%s12076_s0 + $0xc10] ss:$72 sps:$4 sm:$0xff]  }
 0x344   :  { %4971 = vmatmul.mubr.bf16.gmra.mrb[48].mxu0 %v8281_v22  ;;  %4078 = vmatprep.mubr.bf16.mxu1 %v8282_v27  ;;  %v8336_v22 = vld [vmem:[%s12076_s0 + $0xc84] ss:$72 sps:$4 sm:$0xff]  }
 0x345   :  { %4978 = vmatprep.mubr.bf16.mxu0 %v8284_v23  ;;  %v8338_v23 = vld [vmem:[%s12076_s0 + $0xca4] ss:$72 sps:$4 sm:$0xff]  }
 0x34b   :  { %4079 = vmatmul.mubr.bf16.gmra.mrb[52].mxu1 %v8286_v0 }
 0x34c   :  { %4979 = vmatmul.mubr.bf16.gmra.mrb[52].mxu0 %v8287_v34  ;;  %4086 = vmatprep.mubr.bf16.mxu1 %v8288_v25  ;;  %v8340_v25 = vld [vmem:[%s12076_s0 + $0xc80] ss:$72 sps:$4 sm:$0xff]  }
 0x34d   :  { %4986 = vmatprep.mubr.bf16.mxu0 %v8290_v41 }
 0x353   :  { %4087 = vmatmul.mubr.bf16.gmra.mrb[56].mxu1 %v8292_v26  ;;  %v8341_v26 = vld [vmem:[%s12076_s0 + $0xca0] ss:$72 sps:$4 sm:$0xff]  }
 0x354   :  { %4987 = vmatmul.mubr.bf16.gmra.mrb[56].mxu0 %v8293_v28  ;;  %4094 = vmatprep.mubr.bf16.mxu1 %v8294_v29  ;;  %v8342_v28 = vld [vmem:[%s12076_s0 + $0xd14] ss:$72 sps:$4 sm:$0xff]  }
 0x355   :  { %4994 = vmatprep.mubr.bf16.mxu0 %v8296_v31  ;;  %v8344_v31 = vld [vmem:[%s12076_s0 + $0xd34] ss:$72 sps:$4 sm:$0xff]  }
 0x356   :  { %v10754_v32 = vpop.f32.mrb[0].mxu1 }
 0x357   :  { %v3753_v33 = vpop.f32.mrb[1].mxu1 }
 0x358   :  { %v10759_v37 = vpop.f32.mrb[2].mxu1 }
 0x359   :  { %v3756_v40 = vpop.f32.mrb[3].mxu1 }
 0x35a   :  { %v8347_v40 = vld [vmem:[%s12076_s0 + $0xd30] ss:$72 sps:$4 sm:$0xff]  }
 0x35b   :  { %4095 = vmatmul.mubr.bf16.gmra.mrb[60].mxu1 %v8298_v35 }
 0x35c   :  { %4995 = vmatmul.mubr.bf16.gmra.mrb[60].mxu0 %v8299_v38  ;;  %4102 = vmatprep.mubr.bf16.mxu1 %v8300_v39  ;;  %v8346_v38 = vld [vmem:[%s12076_s0 + $0xd10] ss:$72 sps:$4 sm:$0xff]  }
 0x35d   :  { %5002 = vmatprep.mubr.bf16.mxu0 %v8302_v42 }
 0x35e   :  { %v10770_v43 = vpop.f32.mrb[4].mxu1 }
 0x35f   :  { %v3761_v45 = vpop.f32.mrb[5].mxu1 }
 0x360   :  { %v10775_v47 = vpop.f32.mrb[6].mxu1 }
 0x361   :  { %v3764_v51 = vpop.f32.mrb[7].mxu1 }
 0x363   :  { %4103 = vmatmul.mubr.bf16.gmra.mrb[64].mxu1 %v8304_v46 }
 0x364   :  { %5003 = vmatmul.mubr.bf16.gmra.mrb[64].mxu0 %v8305_v48  ;;  %4110 = vmatprep.mubr.bf16.mxu1 %v8306_v49 }
 0x365   :  { %5010 = vmatprep.mubr.bf16.mxu0 %v8308_v52 }
 0x366   :  { %v10786_v53 = vpop.f32.mrb[8].mxu1 }
 0x367   :  { %v3769_v54 = vpop.f32.mrb[9].mxu1 }
 0x368   :  { %v10791_v57 = vpop.f32.mrb[10].mxu1 }
 0x369   :  { %v3772_v60 = vpop.f32.mrb[11].mxu1 }
 0x36b   :  { %4111 = vmatmul.mubr.bf16.gmra.mrb[68].mxu1 %v8310_v55 }
 0x36c   :  { %5011 = vmatmul.mubr.bf16.gmra.mrb[68].mxu0 %v8311_v58  ;;  %4118 = vmatprep.mubr.bf16.mxu1 %v8312_v59 }
 0x36d   :  { %5018 = vmatprep.mubr.bf16.mxu0 %v8314_v61 }
 0x36e   :  { %v10802_v63 = vpop.f32.mrb[12].mxu1 }
 0x36f   :  { %v3777_v1 = vpop.f32.mrb[13].mxu1 }
 0x370   :  { %v10807_v8 = vpop.f32.mrb[14].mxu1 }
 0x371   :  { %v3780_v4 = vpop.f32.mrb[15].mxu1 }
 0x373   :  { %4119 = vmatmul.mubr.bf16.gmra.mrb[72].mxu1 %v8316_v2 }
 0x374   :  { %5019 = vmatmul.mubr.bf16.gmra.mrb[72].mxu0 %v8317_v3  ;;  %4126 = vmatprep.mubr.bf16.mxu1 %v8318_v12 }
 0x375   :  { %5026 = vmatprep.mubr.bf16.mxu0 %v8320_v6 }
 0x376   :  { %v10818_v18 = vpop.f32.mrb[16].mxu1 }
 0x377   :  { %v3785_v7 = vpop.f32.mrb[17].mxu1 }
 0x378   :  { %v10823_v9 = vpop.f32.mrb[18].mxu1 }
 0x379   :  { %v3788_v36 = vpop.f32.mrb[19].mxu1 }
 0x37b   :  { %4127 = vmatmul.mubr.bf16.gmra.mrb[76].mxu1 %v8322_v24 }
 0x37c   :  { %5027 = vmatmul.mubr.bf16.gmra.mrb[76].mxu0 %v8323_v30  ;;  %4134 = vmatprep.mubr.bf16.mxu1 %v8324_v10 }
 0x37d   :  { %5034 = vmatprep.mubr.bf16.mxu0 %v8326_v11 }
 0x37e   :  { %v10834_v44 = vpop.f32.mrb[20].mxu1 }
 0x37f   :  { %v3793_v14 = vpop.f32.mrb[21].mxu1 }
 0x380   :  { %v10839_v15 = vpop.f32.mrb[22].mxu1 }
 0x381   :  { %v3796_v62 = vpop.f32.mrb[23].mxu1 }
 0x383   :  { %4135 = vmatmul.mubr.bf16.gmra.mrb[80].mxu1 %v8328_v50 }
 0x384   :  { %5035 = vmatmul.mubr.bf16.gmra.mrb[80].mxu0 %v8329_v56  ;;  %4142 = vmatprep.mubr.bf16.mxu1 %v8330_v16 }
 0x385   :  { %5042 = vmatprep.mubr.bf16.mxu0 %v8332_v17 }
 0x386   :  { %v10850_v5 = vpop.f32.mrb[24].mxu1 }
 0x387   :  { %v3801_v19 = vpop.f32.mrb[25].mxu1 }
 0x388   :  { %v10855_v21 = vpop.f32.mrb[26].mxu1 }
 0x389   :  { %v3804_v27 = vpop.f32.mrb[27].mxu1 }
 0x38b   :  { %4143 = vmatmul.mubr.bf16.gmra.mrb[84].mxu1 %v8334_v13 }
 0x38c   :  { %5043 = vmatmul.mubr.bf16.gmra.mrb[84].mxu0 %v8335_v20  ;;  %4150 = vmatprep.mubr.bf16.mxu1 %v8336_v22 }
 0x38d   :  { %5050 = vmatprep.mubr.bf16.mxu0 %v8338_v23 }
 0x38e   :  { %v10866_v0 = vpop.f32.mrb[28].mxu1 }
 0x38f   :  { %v3809_v34 = vpop.f32.mrb[29].mxu1 }
 0x390   :  { %v10871_v41 = vpop.f32.mrb[30].mxu1 }
 0x391   :  { %v3812_v29 = vpop.f32.mrb[31].mxu1 }
 0x393   :  { %4151 = vmatmul.mubr.bf16.gmra.mrb[88].mxu1 %v8340_v25 }
 0x394   :  { %5051 = vmatmul.mubr.bf16.gmra.mrb[88].mxu0 %v8341_v26  ;;  %4158 = vmatprep.mubr.bf16.mxu1 %v8342_v28 }
 0x395   :  { %5058 = vmatprep.mubr.bf16.mxu0 %v8344_v31 }
 0x396   :  { %v10882_v33 = vpop.f32.mrb[32].mxu1 }
 0x397   :  { %v3817_v35 = vpop.f32.mrb[33].mxu1 }
 0x398   :  { %v10887_v39 = vpop.f32.mrb[34].mxu1 }
 0x399   :  { %v3820_v42 = vpop.f32.mrb[35].mxu1 }
 0x39b   :  { %4159 = vmatmul.mubr.bf16.gmra.mrb[92].mxu1 %v8346_v38 }
 0x39c   :  { %5059 = vmatmul.mubr.bf16.gmra.mrb[92].mxu0 %v8347_v40 }
 0x39e   :  { %v10892_v45 = vpop.f32.mrb[36].mxu1 }
 0x39f   :  { %v3825_v46 = vpop.f32.mrb[37].mxu1 }
 0x3a0   :  { %v10894_v48 = vpop.f32.mrb[38].mxu1 }
 0x3a1   :  { %v3828_v49 = vpop.f32.mrb[39].mxu1 }
 0x3a6   :  { %v10896_v51 = vpop.f32.mrb[40].mxu1 }
 0x3a7   :  { %v3833_v52 = vpop.f32.mrb[41].mxu1 }
 0x3a8   :  { %v10898_v54 = vpop.f32.mrb[42].mxu1 }
 0x3a9   :  { %v3836_v55 = vpop.f32.mrb[43].mxu1 }
 0x3ae   :  { %v10900_v58 = vpop.f32.mrb[44].mxu1 }
 0x3af   :  { %v3841_v59 = vpop.f32.mrb[45].mxu1 }
 0x3b0   :  { %v10902_v60 = vpop.f32.mrb[46].mxu1 }
 0x3b1   :  { %v3844_v61 = vpop.f32.mrb[47].mxu1 }
 0x3b7   :  { %v4876_v1 = vpop.f32.mrb[0].mxu0 }
 0x3b8   :  { %v10905_v2 = vadd.f32 %v4876_v1, %v10754_v32  ;;  %v4878_v3 = vpop.f32.mrb[1].mxu0 }
 0x3b9   :  { %v4879_v12 = vpop.f32.mrb[2].mxu0 }
 0x3ba   :  { %v10908_v4 = vadd.f32 %v4879_v12, %v10759_v37  ;;  %v4881_v6 = vpop.f32.mrb[3].mxu0  ;;  %v5068_v7 = vsel %vm5067_vm0, %v10905_v2, 0.0 }
 0x3bb   :  { %5069 = vadd.xlane.f32.xlu0 %v5068_v7 }
 0x3bc   :  { %v5071_v24 = vsel %vm5067_vm0, %v10908_v4, 0.0 }
 0x3bf   :  { %v4884_v30 = vpop.f32.mrb[4].mxu0  ;;  %5072 = vadd.xlane.f32.xlu0 %v5071_v24 }
 0x3c0   :  { %v10915_v10 = vadd.f32 %v4884_v30, %v10770_v43  ;;  %v4886_v32 = vpop.f32.mrb[5].mxu0 }
 0x3c1   :  { %v4887_v36 = vpop.f32.mrb[6].mxu0 }
 0x3c2   :  { %12147 = vst [vmem:[#allocation2_spill] sm:$0xff] %v10915_v10  ;;  %v10918_v11 = vadd.f32 %v4887_v36, %v10775_v47  ;;  %v4889_v37 = vpop.f32.mrb[7].mxu0  ;;  %v5074_v14 = vsel %vm5067_vm0, %v10915_v10, 0.0 }
 0x3c3   :  { %5075 = vadd.xlane.f32.xlu1 %v5074_v14 }
 0x3c4   :  { %12148 = vst [vmem:[#allocation3_spill] sm:$0xff] %v10918_v11  ;;  %v5077_v50 = vsel %vm5067_vm0, %v10918_v11, 0.0 }
 0x3c7   :  { %v4892_v56 = vpop.f32.mrb[8].mxu0  ;;  %5078 = vadd.xlane.f32.xlu1 %v5077_v50 }
 0x3c8   :  { %v10925_v16 = vadd.f32 %v4892_v56, %v10786_v53  ;;  %v4894_v43 = vpop.f32.mrb[9].mxu0 }
 0x3c9   :  { %v4895_v62 = vpop.f32.mrb[10].mxu0 }
 0x3ca   :  { %12149 = vst [vmem:[#allocation4_spill] sm:$0xff] %v10925_v16  ;;  %v10928_v17 = vadd.f32 %v4895_v62, %v10791_v57  ;;  %v4897_v47 = vpop.f32.mrb[11].mxu0  ;;  %v5080_v19 = vsel %vm5067_vm0, %v10925_v16, 0.0 }
 0x3cb   :  { %5081 = vadd.xlane.f32.xlu0 %v5080_v19 }
 0x3cc   :  { %12150 = vst [vmem:[#allocation5_spill] sm:$0xff] %v10928_v17  ;;  %v5083_v13 = vsel %vm5067_vm0, %v10928_v17, 0.0 }
 0x3cd   :  { %5084 = vadd.xlane.f32.xlu1 %v5083_v13 }
 0x3cf   :  { %v4900_v20 = vpop.f32.mrb[12].mxu0 }
 0x3d0   :  { %v10935_v22 = vadd.f32 %v4900_v20, %v10802_v63  ;;  %v4902_v53 = vpop.f32.mrb[13].mxu0 }
 0x3d1   :  { %v4903_v27 = vpop.f32.mrb[14].mxu0 }
 0x3d2   :  { %12151 = vst [vmem:[#allocation6_spill] sm:$0xff] %v10935_v22  ;;  %v10938_v23 = vadd.f32 %v4903_v27, %v10807_v8  ;;  %v4905_v57 = vpop.f32.mrb[15].mxu0  ;;  %v5086_v34 = vsel %vm5067_vm0, %v10935_v22, 0.0 }
 0x3d3   :  { %5087 = vadd.xlane.f32.xlu0 %v5086_v34 }
 0x3d4   :  { %12152 = vst [vmem:[#allocation7_spill] sm:$0xff] %v10938_v23  ;;  %v5089_v25 = vsel %vm5067_vm0, %v10938_v23, 0.0 }
 0x3d5   :  { %5090 = vadd.xlane.f32.xlu1 %v5089_v25 }
 0x3d7   :  { %v4908_v26 = vpop.f32.mrb[16].mxu0 }
 0x3d8   :  { %v10945_v28 = vadd.f32 %v4908_v26, %v10818_v18  ;;  %v4910_v63 = vpop.f32.mrb[17].mxu0 }
 0x3d9   :  { %v4911_v29 = vpop.f32.mrb[18].mxu0 }
 0x3da   :  { %12153 = vst [vmem:[#allocation8_spill] sm:$0xff] %v10945_v28  ;;  %v10948_v31 = vadd.f32 %v4911_v29, %v10823_v9  ;;  %v4913_v8 = vpop.f32.mrb[19].mxu0  ;;  %v5092_v35 = vsel %vm5067_vm0, %v10945_v28, 0.0 }
 0x3db   :  { %5093 = vadd.xlane.f32.xlu0 %v5092_v35 }
 0x3dc   :  { %12154 = vst [vmem:[#allocation9_spill] sm:$0xff] %v10948_v31  ;;  %v5095_v38 = vsel %vm5067_vm0, %v10948_v31, 0.0 }
 0x3dd   :  { %5096 = vadd.xlane.f32.xlu1 %v5095_v38 }
 0x3df   :  { %v4916_v40 = vpop.f32.mrb[20].mxu0 }
 0x3e0   :  { %v10955_v42 = vadd.f32 %v4916_v40, %v10834_v44  ;;  %v4918_v18 = vpop.f32.mrb[21].mxu0 }
 0x3e1   :  { %v4919_v46 = vpop.f32.mrb[22].mxu0 }
 0x3e2   :  { %12155 = vst [vmem:[#allocation10_spill] sm:$0xff] %v10955_v42  ;;  %v10958_v49 = vadd.f32 %v4919_v46, %v10839_v15  ;;  %v4921_v9 = vpop.f32.mrb[23].mxu0  ;;  %v5098_v52 = vsel %vm5067_vm0, %v10955_v42, 0.0 }
 0x3e3   :  { %5099 = vadd.xlane.f32.xlu0 %v5098_v52 }
 0x3e4   :  { %12156 = vst [vmem:[#allocation11_spill] sm:$0xff] %v10958_v49  ;;  %v5101_v55 = vsel %vm5067_vm0, %v10958_v49, 0.0 }
 0x3e5   :  { %5102 = vadd.xlane.f32.xlu1 %v5101_v55 }
 0x3e7   :  { %v4924_v59 = vpop.f32.mrb[24].mxu0 }
 0x3e8   :  { %v10965_v61 = vadd.f32 %v4924_v59, %v10850_v5  ;;  %v4926_v44 = vpop.f32.mrb[25].mxu0 }
 0x3e9   :  { %v4927_v1 = vpop.f32.mrb[26].mxu0 }
 0x3ea   :  { %12157 = vst [vmem:[#allocation12_spill] sm:$0xff] %v10965_v61  ;;  %v10968_v3 = vadd.f32 %v4927_v1, %v10855_v21  ;;  %v4929_v15 = vpop.f32.mrb[27].mxu0  ;;  %v5104_v12 = vsel %vm5067_vm0, %v10965_v61, 0.0 }
 0x3eb   :  { %5105 = vadd.xlane.f32.xlu0 %v5104_v12 }
 0x3ec   :  { %12158 = vst [vmem:[#allocation13_spill] sm:$0xff] %v10968_v3  ;;  %v5107_v6 = vsel %vm5067_vm0, %v10968_v3, 0.0 }
 0x3ed   :  { %5108 = vadd.xlane.f32.xlu1 %v5107_v6 }
 0x3ef   :  { %v4932_v7 = vpop.f32.mrb[28].mxu0 }
 0x3f0   :  { %v10975_v24 = vadd.f32 %v4932_v7, %v10866_v0  ;;  %v4934_v5 = vpop.f32.mrb[29].mxu0 }
 0x3f1   :  { %v4935_v30 = vpop.f32.mrb[30].mxu0 }
 0x3f2   :  { %12159 = vst [vmem:[#allocation14_spill] sm:$0xff] %v10975_v24  ;;  %v10978_v32 = vadd.f32 %v4935_v30, %v10871_v41  ;;  %v4937_v21 = vpop.f32.mrb[31].mxu0  ;;  %v5110_v36 = vsel %vm5067_vm0, %v10975_v24, 0.0 }
 0x3f3   :  { %5111 = vadd.xlane.f32.xlu0 %v5110_v36 }
 0x3f4   :  { %12160 = vst [vmem:[#allocation15_spill] sm:$0xff] %v10978_v32  ;;  %v5113_v37 = vsel %vm5067_vm0, %v10978_v32, 0.0 }
 0x3f5   :  { %5114 = vadd.xlane.f32.xlu1 %v5113_v37 }
 0x3f7   :  { %v4940_v14 = vpop.f32.mrb[32].mxu0 }
 0x3f8   :  { %v10985_v50 = vadd.f32 %v4940_v14, %v10882_v33  ;;  %v4942_v0 = vpop.f32.mrb[33].mxu0 }
 0x3f9   :  { %v4943_v56 = vpop.f32.mrb[34].mxu0 }
 0x3fa   :  { %12161 = vst [vmem:[#allocation16_spill] sm:$0xff] %v10985_v50  ;;  %v10988_v43 = vadd.f32 %v4943_v56, %v10887_v39  ;;  %v4945_v41 = vpop.f32.mrb[35].mxu0  ;;  %v5116_v62 = vsel %vm5067_vm0, %v10985_v50, 0.0 }
 0x3fb   :  { %5117 = vadd.xlane.f32.xlu0 %v5116_v62 }
 0x3fc   :  { %12162 = vst [vmem:[#allocation17_spill] sm:$0xff] %v10988_v43  ;;  %v5119_v47 = vsel %vm5067_vm0, %v10988_v43, 0.0 }
 0x3fd   :  { %5120 = vadd.xlane.f32.xlu1 %v5119_v47 }
 0x3ff   :  { %v4948_v19 = vpop.f32.mrb[36].mxu0 }
 0x400   :  { %v10995_v13 = vadd.f32 %v4948_v19, %v10892_v45  ;;  %v4950_v33 = vpop.f32.mrb[37].mxu0 }
 0x401   :  { %v4951_v20 = vpop.f32.mrb[38].mxu0 }
 0x402   :  { %12163 = vst [vmem:[#allocation18_spill] sm:$0xff] %v10995_v13  ;;  %v10998_v53 = vadd.f32 %v4951_v20, %v10894_v48  ;;  %v4953_v39 = vpop.f32.mrb[39].mxu0  ;;  %v5122_v27 = vsel %vm5067_vm0, %v10995_v13, 0.0 }
 0x403   :  { %5123 = vadd.xlane.f32.xlu0 %v5122_v27 }
 0x404   :  { %12164 = vst [vmem:[#allocation19_spill] sm:$0xff] %v10998_v53  ;;  %v5125_v57 = vsel %vm5067_vm0, %v10998_v53, 0.0 }
 0x405   :  { %5126 = vadd.xlane.f32.xlu1 %v5125_v57 }
 0x407   :  { %v4956_v34 = vpop.f32.mrb[40].mxu0 }
 0x408   :  { %v11005_v25 = vadd.f32 %v4956_v34, %v10896_v51  ;;  %v4958_v45 = vpop.f32.mrb[41].mxu0 }
 0x409   :  { %v4959_v26 = vpop.f32.mrb[42].mxu0 }
 0x40a   :  { %12165 = vst [vmem:[#allocation20_spill] sm:$0xff] %v11005_v25  ;;  %v11008_v63 = vadd.f32 %v4959_v26, %v10898_v54  ;;  %v4961_v48 = vpop.f32.mrb[43].mxu0  ;;  %v5128_v29 = vsel %vm5067_vm0, %v11005_v25, 0.0 }
 0x40b   :  { %5129 = vadd.xlane.f32.xlu0 %v5128_v29 }
 0x40c   :  { %12166 = vst [vmem:[#allocation21_spill] sm:$0xff] %v11008_v63  ;;  %v5131_v8 = vsel %vm5067_vm0, %v11008_v63, 0.0 }
 0x40d   :  { %5132 = vadd.xlane.f32.xlu1 %v5131_v8 }
 0x40f   :  { %v4964_v35 = vpop.f32.mrb[44].mxu0 }
 0x410   :  { %v11015_v38 = vadd.f32 %v4964_v35, %v10900_v58  ;;  %v4966_v51 = vpop.f32.mrb[45].mxu0 }
 0x411   :  { %v4967_v40 = vpop.f32.mrb[46].mxu0 }
 0x412   :  { %12167 = vst [vmem:[#allocation22_spill] sm:$0xff] %v11015_v38  ;;  %v11018_v18 = vadd.f32 %v4967_v40, %v10902_v60  ;;  %v4969_v54 = vpop.f32.mrb[47].mxu0  ;;  %v5134_v46 = vsel %vm5067_vm0, %v11015_v38, 0.0 }
 0x413   :  { %5135 = vadd.xlane.f32.xlu0 %v5134_v46 }
 0x414   :  { %12168 = vst [vmem:[#allocation23_spill] sm:$0xff] %v11018_v18  ;;  %v5137_v9 = vsel %vm5067_vm0, %v11018_v18, 0.0 }
 0x415   :  { %5138 = vadd.xlane.f32.xlu1 %v5137_v9 }
 0x416   :  { %v4072_v52 = vpop.f32.mrb[48].mxu1 }
 0x417   :  { %v4972_v55 = vpop.f32.mrb[48].mxu0  ;;  %v4074_v59 = vpop.f32.mrb[49].mxu1 }
 0x418   :  { %v11024_v44 = vadd.f32 %v4972_v55, %v4072_v52  ;;  %v4974_v58 = vpop.f32.mrb[49].mxu0  ;;  %v4075_v1 = vpop.f32.mrb[50].mxu1 }
 0x419   :  { %v4975_v15 = vpop.f32.mrb[50].mxu0  ;;  %v4077_v12 = vpop.f32.mrb[51].mxu1 }
 0x41a   :  { %12169 = vst [vmem:[#allocation24_spill] sm:$0xff] %v11024_v44  ;;  %v11026_v60 = vadd.f32 %v4975_v15, %v4075_v1  ;;  %v4977_v6 = vpop.f32.mrb[51].mxu0  ;;  %v5140_v7 = vsel %vm5067_vm0, %v11024_v44, 0.0 }
 0x41b   :  { %5141 = vadd.xlane.f32.xlu0 %v5140_v7 }
 0x41c   :  { %12170 = vst [vmem:[#allocation25_spill] sm:$0xff] %v11026_v60  ;;  %v5143_v5 = vsel %vm5067_vm0, %v11026_v60, 0.0 }
 0x41d   :  { %5144 = vadd.xlane.f32.xlu1 %v5143_v5 }
 0x41e   :  { %v4080_v30 = vpop.f32.mrb[52].mxu1 }
 0x41f   :  { %v4980_v21 = vpop.f32.mrb[52].mxu0  ;;  %v4082_v36 = vpop.f32.mrb[53].mxu1 }
 0x420   :  { %v11032_v37 = vadd.f32 %v4980_v21, %v4080_v30  ;;  %v4982_v14 = vpop.f32.mrb[53].mxu0  ;;  %v4083_v0 = vpop.f32.mrb[54].mxu1 }
 0x421   :  { %v4983_v56 = vpop.f32.mrb[54].mxu0  ;;  %v4085_v41 = vpop.f32.mrb[55].mxu1 }
 0x422   :  { %12171 = vst [vmem:[#allocation26_spill] sm:$0xff] %v11032_v37  ;;  %v11034_v62 = vadd.f32 %v4983_v56, %v4083_v0  ;;  %v4985_v47 = vpop.f32.mrb[55].mxu0  ;;  %v5146_v19 = vsel %vm5067_vm0, %v11032_v37, 0.0 }
 0x423   :  { %5147 = vadd.xlane.f32.xlu0 %v5146_v19 }
 0x424   :  { %12172 = vst [vmem:[#allocation27_spill] sm:$0xff] %v11034_v62  ;;  %v5149_v33 = vsel %vm5067_vm0, %v11034_v62, 0.0 }
 0x425   :  { %5150 = vadd.xlane.f32.xlu1 %v5149_v33 }
 0x426   :  { %v4088_v20 = vpop.f32.mrb[56].mxu1 }
 0x427   :  { %v4988_v39 = vpop.f32.mrb[56].mxu0  ;;  %v4090_v27 = vpop.f32.mrb[57].mxu1 }
 0x428   :  { %v11040_v57 = vadd.f32 %v4988_v39, %v4088_v20  ;;  %v4990_v34 = vpop.f32.mrb[57].mxu0  ;;  %v4091_v45 = vpop.f32.mrb[58].mxu1 }
 0x429   :  { %v4991_v26 = vpop.f32.mrb[58].mxu0  ;;  %v4093_v48 = vpop.f32.mrb[59].mxu1 }
 0x42a   :  { %12173 = vst [vmem:[#allocation28_spill] sm:$0xff] %v11040_v57  ;;  %v11042_v29 = vadd.f32 %v4991_v26, %v4091_v45  ;;  %v4993_v8 = vpop.f32.mrb[59].mxu0  ;;  %v5152_v35 = vsel %vm5067_vm0, %v11040_v57, 0.0 }
 0x42b   :  { %5153 = vadd.xlane.f32.xlu0 %v5152_v35 }
 0x42c   :  { %12174 = vst [vmem:[#allocation29_spill] sm:$0xff] %v11042_v29  ;;  %v5155_v51 = vsel %vm5067_vm0, %v11042_v29, 0.0 }
 0x42d   :  { %5156 = vadd.xlane.f32.xlu1 %v5155_v51 }
 0x42e   :  { %v4096_v40 = vpop.f32.mrb[60].mxu1 }
 0x42f   :  { %v4996_v54 = vpop.f32.mrb[60].mxu0  ;;  %v4098_v46 = vpop.f32.mrb[61].mxu1 }
 0x430   :  { %v11048_v9 = vadd.f32 %v4996_v54, %v4096_v40  ;;  %v4998_v52 = vpop.f32.mrb[61].mxu0  ;;  %v4099_v55 = vpop.f32.mrb[62].mxu1 }
 0x431   :  { %v4999_v59 = vpop.f32.mrb[62].mxu0  ;;  %v4101_v58 = vpop.f32.mrb[63].mxu1 }
 0x432   :  { %12175 = vst [vmem:[#allocation30_spill] sm:$0xff] %v11048_v9  ;;  %v11050_v1 = vadd.f32 %v4999_v59, %v4099_v55  ;;  %v5001_v15 = vpop.f32.mrb[63].mxu0  ;;  %v5158_v12 = vsel %vm5067_vm0, %v11048_v9, 0.0 }
 0x433   :  { %5159 = vadd.xlane.f32.xlu0 %v5158_v12 }
 0x434   :  { %12176 = vst [vmem:[#allocation31_spill] sm:$0xff] %v11050_v1  ;;  %v5161_v6 = vsel %vm5067_vm0, %v11050_v1, 0.0 }
 0x435   :  { %5162 = vadd.xlane.f32.xlu1 %v5161_v6 }
 0x436   :  { %v4104_v7 = vpop.f32.mrb[64].mxu1 }
 0x437   :  { %v5004_v5 = vpop.f32.mrb[64].mxu0  ;;  %v4106_v30 = vpop.f32.mrb[65].mxu1 }
 0x438   :  { %v11056_v21 = vadd.f32 %v5004_v5, %v4104_v7  ;;  %v5006_v36 = vpop.f32.mrb[65].mxu0  ;;  %v4107_v14 = vpop.f32.mrb[66].mxu1 }
 0x439   :  { %v5007_v0 = vpop.f32.mrb[66].mxu0  ;;  %v4109_v56 = vpop.f32.mrb[67].mxu1 }
 0x43a   :  { %12177 = vst [vmem:[#allocation32_spill] sm:$0xff] %v11056_v21  ;;  %v11058_v41 = vadd.f32 %v5007_v0, %v4107_v14  ;;  %v5009_v47 = vpop.f32.mrb[67].mxu0  ;;  %v5164_v19 = vsel %vm5067_vm0, %v11056_v21, 0.0 }
 0x43b   :  { %5165 = vadd.xlane.f32.xlu0 %v5164_v19 }
 0x43c   :  { %12178 = vst [vmem:[#allocation33_spill] sm:$0xff] %v11058_v41  ;;  %v5167_v33 = vsel %vm5067_vm0, %v11058_v41, 0.0 }
 0x43d   :  { %5168 = vadd.xlane.f32.xlu1 %v5167_v33 }
 0x43e   :  { %v4112_v20 = vpop.f32.mrb[68].mxu1 }
 0x43f   :  { %v5012_v39 = vpop.f32.mrb[68].mxu0  ;;  %v4114_v27 = vpop.f32.mrb[69].mxu1 }
 0x440   :  { %v11064_v34 = vadd.f32 %v5012_v39, %v4112_v20  ;;  %v5014_v45 = vpop.f32.mrb[69].mxu0  ;;  %v4115_v26 = vpop.f32.mrb[70].mxu1 }
 0x441   :  { %v5015_v48 = vpop.f32.mrb[70].mxu0  ;;  %v4117_v8 = vpop.f32.mrb[71].mxu1 }
 0x442   :  { %12179 = vst [vmem:[#allocation34_spill] sm:$0xff] %v11064_v34  ;;  %v11066_v35 = vadd.f32 %v5015_v48, %v4115_v26  ;;  %v5017_v51 = vpop.f32.mrb[71].mxu0  ;;  %v5170_v40 = vsel %vm5067_vm0, %v11064_v34, 0.0 }
 0x443   :  { %5171 = vadd.xlane.f32.xlu0 %v5170_v40 }
 0x444   :  { %12180 = vst [vmem:[#allocation35_spill] sm:$0xff] %v11066_v35  ;;  %v5173_v54 = vsel %vm5067_vm0, %v11066_v35, 0.0 }
 0x445   :  { %5174 = vadd.xlane.f32.xlu1 %v5173_v54 }
 0x446   :  { %v4120_v46 = vpop.f32.mrb[72].mxu1 }
 0x447   :  { %v5020_v52 = vpop.f32.mrb[72].mxu0  ;;  %v4122_v55 = vpop.f32.mrb[73].mxu1 }
 0x448   :  { %v11072_v59 = vadd.f32 %v5020_v52, %v4120_v46  ;;  %v5022_v58 = vpop.f32.mrb[73].mxu0  ;;  %v5070_v15 = vpop.xlane.xlu0 %5069 }
 0x449   :  { %v11074_v12 = vmul.f32 0.020408163, %v5070_v15  ;;  %v4123_v6 = vpop.f32.mrb[74].mxu1  ;;  %v5023_v7 = vpop.f32.mrb[74].mxu0 }
 0x44a   :  { %12181 = vst [vmem:[#allocation36_spill] sm:$0xff] %v11072_v59  ;;  %v11076_v5 = vadd.f32 %v5023_v7, %v4123_v6  ;;  %v4125_v30 = vpop.f32.mrb[75].mxu1  ;;  %v5025_v36 = vpop.f32.mrb[75].mxu0  ;;  %v5176_v14 = vsel %vm5067_vm0, %v11072_v59, 0.0 }
 0x44b   :  { %5177 = vadd.xlane.f32.xlu0 %v5176_v14  ;;  %v5261_v0 = vsub.f32 %v10905_v2, %v11074_v12 }
 0x44c   :  { %12182 = vst [vmem:[#allocation37_spill] sm:$0xff] %v11076_v5  ;;  %v5073_v56 = vpop.xlane.xlu0 %5072  ;;  %v5179_v47 = vsel %vm5067_vm0, %v11076_v5, 0.0 }
 0x44d   :  { %v11084_v19 = vmul.f32 0.020408163, %v5073_v56  ;;  %5180 = vadd.xlane.f32.xlu1 %v5179_v47  ;;  %v5309_v33 = vmul.f32 %v5261_v0, %v5261_v0 }
 0x44e   :  { %v4128_v20 = vpop.f32.mrb[76].mxu1 }
 0x44f   :  { %v5028_v39 = vpop.f32.mrb[76].mxu0  ;;  %v5357_v27 = vsel %vm5067_vm0, %v5309_v33, 0.0  ;;  %v4130_v45 = vpop.f32.mrb[77].mxu1  ;;  %v5262_v26 = vsub.f32 %v10908_v4, %v11084_v19 }
 0x450   :  { %v11089_v48 = vadd.f32 %v5028_v39, %v4128_v20  ;;  %v5030_v8 = vpop.f32.mrb[77].mxu0  ;;  %v5076_v51 = vpop.xlane.xlu1 %5075  ;;  %5358 = vadd.xlane.f32.xlu0 %v5357_v27 }
 0x451   :  { %v11091_v40 = vmul.f32 0.020408163, %v5076_v51  ;;  %v4131_v54 = vpop.f32.mrb[78].mxu1  ;;  %v5031_v46 = vpop.f32.mrb[78].mxu0  ;;  %v5310_v52 = vmul.f32 %v5262_v26, %v5262_v26 }
 0x452   :  { %12183 = vst [vmem:[#allocation38_spill] sm:$0xff] %v11089_v48  ;;  %v11093_v55 = vadd.f32 %v5031_v46, %v4131_v54  ;;  %v4133_v58 = vpop.f32.mrb[79].mxu1  ;;  %v5033_v15 = vpop.f32.mrb[79].mxu0  ;;  %v5182_v6 = vsel %vm5067_vm0, %v11089_v48, 0.0 }
 0x453   :  { %v5360_v7 = vsel %vm5067_vm0, %v5310_v52, 0.0  ;;  %v5263_v30 = vsub.f32 %v10915_v10, %v11091_v40 }
 0x454   :  { %12184 = vst [vmem:[#allocation39_spill] sm:$0xff] %v11093_v55  ;;  %v5079_v36 = vpop.xlane.xlu1 %5078  ;;  %5361 = vadd.xlane.f32.xlu1 %v5360_v7  ;;  %5183 = vadd.xlane.f32.xlu0 %v5182_v6  ;;  %v5185_v20 = vsel %vm5067_vm0, %v11093_v55, 0.0 }
 0x455   :  { %v11100_v14 = vmul.f32 0.020408163, %v5079_v36  ;;  %v5311_v0 = vmul.f32 %v5263_v30, %v5263_v30 }
 0x456   :  { %v4136_v56 = vpop.f32.mrb[80].mxu1 }
 0x457   :  { %v5036_v47 = vpop.f32.mrb[80].mxu0  ;;  %v5363_v33 = vsel %vm5067_vm0, %v5311_v0, 0.0  ;;  %v4138_v39 = vpop.f32.mrb[81].mxu1  ;;  %v5264_v27 = vsub.f32 %v10918_v11, %v11100_v14 }
 0x458   :  { %v11107_v45 = vadd.f32 %v5036_v47, %v4136_v56  ;;  %v5038_v26 = vpop.f32.mrb[81].mxu0  ;;  %v5082_v8 = vpop.xlane.xlu0 %5081  ;;  %5364 = vadd.xlane.f32.xlu0 %v5363_v33  ;;  %5186 = vadd.xlane.f32.xlu1 %v5185_v20 }
 0x459   :  { %v11109_v51 = vmul.f32 0.020408163, %v5082_v8  ;;  %v4139_v54 = vpop.f32.mrb[82].mxu1  ;;  %v5039_v46 = vpop.f32.mrb[82].mxu0  ;;  %v5312_v52 = vmul.f32 %v5264_v27, %v5264_v27 }
 0x45a   :  { %12185 = vst [vmem:[#allocation40_spill] sm:$0xff] %v11107_v45  ;;  %v11111_v58 = vadd.f32 %v5039_v46, %v4139_v54  ;;  %v5041_v15 = vpop.f32.mrb[83].mxu0  ;;  %v5085_v6 = vpop.xlane.xlu1 %5084  ;;  %v5188_v7 = vsel %vm5067_vm0, %v11107_v45, 0.0 }
 0x45b   :  { %v11115_v30 = vmul.f32 0.020408163, %v5085_v6  ;;  %v4141_v36 = vpop.f32.mrb[83].mxu1  ;;  %v5366_v0 = vsel %vm5067_vm0, %v5312_v52, 0.0  ;;  %v5265_v56 = vsub.f32 %v10925_v16, %v11109_v51 }
 0x45c   :  { %12186 = vst [vmem:[#allocation41_spill] sm:$0xff] %v11111_v58  ;;  %5367 = vadd.xlane.f32.xlu1 %v5366_v0  ;;  %5189 = vadd.xlane.f32.xlu0 %v5188_v7  ;;  %v5191_v26 = vsel %vm5067_vm0, %v11111_v58, 0.0 }
 0x45d   :  { %v5313_v47 = vmul.f32 %v5265_v56, %v5265_v56  ;;  %v5266_v33 = vsub.f32 %v10928_v17, %v11115_v30 }
 0x45e   :  { %v4144_v20 = vpop.f32.mrb[84].mxu1 }
 0x45f   :  { %v5044_v39 = vpop.f32.mrb[84].mxu0  ;;  %v5369_v27 = vsel %vm5067_vm0, %v5313_v47, 0.0  ;;  %v4146_v8 = vpop.f32.mrb[85].mxu1  ;;  %v5314_v54 = vmul.f32 %v5266_v33, %v5266_v33 }
 0x460   :  { %v11125_v46 = vadd.f32 %v5044_v39, %v4144_v20  ;;  %v5046_v52 = vpop.f32.mrb[85].mxu0  ;;  %v5088_v15 = vpop.xlane.xlu0 %5087  ;;  %5370 = vadd.xlane.f32.xlu0 %v5369_v27  ;;  %5192 = vadd.xlane.f32.xlu1 %v5191_v26 }
 0x461   :  { %v11127_v6 = vmul.f32 0.020408163, %v5088_v15  ;;  %v4147_v7 = vpop.f32.mrb[86].mxu1  ;;  %v5047_v36 = vpop.f32.mrb[86].mxu0  ;;  %v5372_v20 = vsel %vm5067_vm0, %v5314_v54, 0.0 }
 0x462   :  { %12187 = vst [vmem:[#allocation42_spill] sm:$0xff] %v11125_v46  ;;  %v11129_v0 = vadd.f32 %v5047_v36, %v4147_v7  ;;  %v5049_v56 = vpop.f32.mrb[87].mxu0  ;;  %v5091_v16 = vpop.xlane.xlu1 %5090  ;;  %v5194_v47 = vsel %vm5067_vm0, %v11125_v46, 0.0 }
 0x463   :  { %12188 = vst [vmem:[#allocation43_spill] sm:$0xff] %v11127_v6  ;;  %v11133_v17 = vmul.f32 0.020408163, %v5091_v16  ;;  %v4149_v33 = vpop.f32.mrb[87].mxu1  ;;  %v5267_v39 = vsub.f32 %v10935_v22, %v11127_v6 }
 0x464   :  { %12189 = vst [vmem:[#allocation44_spill] sm:$0xff] %v11129_v0  ;;  %5373 = vadd.xlane.f32.xlu1 %v5372_v20  ;;  %5195 = vadd.xlane.f32.xlu0 %v5194_v47  ;;  %v5197_v16 = vsel %vm5067_vm0, %v11129_v0, 0.0 }
 0x465   :  { %v5315_v27 = vmul.f32 %v5267_v39, %v5267_v39  ;;  %v5268_v26 = vsub.f32 %v10938_v23, %v11133_v17 }
 0x466   :  { %v4152_v8 = vpop.f32.mrb[88].mxu1 }
 0x467   :  { %v5052_v52 = vpop.f32.mrb[88].mxu0  ;;  %v5375_v15 = vsel %vm5067_vm0, %v5315_v27, 0.0  ;;  %v4154_v7 = vpop.f32.mrb[89].mxu1  ;;  %v5316_v36 = vmul.f32 %v5268_v26, %v5268_v26 }
 0x468   :  { %v11143_v56 = vadd.f32 %v5052_v52, %v4152_v8  ;;  %v5054_v54 = vpop.f32.mrb[89].mxu0  ;;  %v5094_v33 = vpop.xlane.xlu0 %5093  ;;  %5376 = vadd.xlane.f32.xlu0 %v5375_v15  ;;  %5198 = vadd.xlane.f32.xlu1 %v5197_v16 }
 0x469   :  { %v11145_v47 = vmul.f32 0.020408163, %v5094_v33  ;;  %v4155_v20 = vpop.f32.mrb[90].mxu1  ;;  %v5055_v39 = vpop.f32.mrb[90].mxu0  ;;  %v5378_v8 = vsel %vm5067_vm0, %v5316_v36, 0.0 }
 0x46a   :  { %12190 = vst [vmem:[#allocation45_spill] sm:$0xff] %v11143_v56  ;;  %v11147_v22 = vadd.f32 %v5055_v39, %v4155_v20  ;;  %v5057_v23 = vpop.f32.mrb[91].mxu0  ;;  %v5097_v10 = vpop.xlane.xlu1 %5096  ;;  %v5200_v27 = vsel %vm5067_vm0, %v11143_v56, 0.0 }
 0x46b   :  { %12191 = vst [vmem:[#allocation46_spill] sm:$0xff] %v11145_v47  ;;  %v11151_v11 = vmul.f32 0.020408163, %v5097_v10  ;;  %v4157_v26 = vpop.f32.mrb[91].mxu1  ;;  %v5269_v52 = vsub.f32 %v10945_v28, %v11145_v47 }
 0x46c   :  { %12192 = vst [vmem:[#allocation47_spill] sm:$0xff] %v11147_v22  ;;  %5379 = vadd.xlane.f32.xlu1 %v5378_v8  ;;  %5201 = vadd.xlane.f32.xlu0 %v5200_v27  ;;  %v5203_v10 = vsel %vm5067_vm0, %v11147_v22, 0.0 }
 0x46d   :  { %v5317_v15 = vmul.f32 %v5269_v52, %v5269_v52  ;;  %v5270_v16 = vsub.f32 %v10948_v31, %v11151_v11 }
 0x46e   :  { %v4160_v7 = vpop.f32.mrb[92].mxu1 }
 0x46f   :  { %v5060_v23 = vpop.f32.mrb[92].mxu0  ;;  %v5381_v54 = vsel %vm5067_vm0, %v5317_v15, 0.0  ;;  %v4162_v33 = vpop.f32.mrb[93].mxu1  ;;  %v5318_v20 = vmul.f32 %v5270_v16, %v5270_v16 }
 0x470   :  { %v11161_v39 = vadd.f32 %v5060_v23, %v4160_v7  ;;  %v5062_v36 = vpop.f32.mrb[93].mxu0  ;;  %v5100_v26 = vpop.xlane.xlu0 %5099  ;;  %5382 = vadd.xlane.f32.xlu0 %v5381_v54  ;;  %5204 = vadd.xlane.f32.xlu1 %v5203_v10 }
 0x471   :  { %v11163_v27 = vmul.f32 0.020408163, %v5100_v26  ;;  %v4163_v8 = vpop.f32.mrb[94].mxu1  ;;  %v5063_v52 = vpop.f32.mrb[94].mxu0  ;;  %v5384_v7 = vsel %vm5067_vm0, %v5318_v20, 0.0 }
 0x472   :  { %v11165_v28 = vadd.f32 %v5063_v52, %v4163_v8  ;;  %v5065_v31 = vpop.f32.mrb[95].mxu0  ;;  %v5103_v47 = vpop.xlane.xlu1 %5102  ;;  %v5206_v15 = vsel %vm5067_vm0, %v11161_v39, 0.0 }
 0x473   :  { %v11169_v6 = vmul.f32 0.020408163, %v5103_v47  ;;  %v4165_v16 = vpop.f32.mrb[95].mxu1  ;;  %v5271_v23 = vsub.f32 %v10955_v42, %v11163_v27 }
 0x474   :  { %5385 = vadd.xlane.f32.xlu1 %v5384_v7  ;;  %5207 = vadd.xlane.f32.xlu0 %v5206_v15  ;;  %v5209_v33 = vsel %vm5067_vm0, %v11165_v28, 0.0 }
 0x475   :  { %v5319_v54 = vmul.f32 %v5271_v23, %v5271_v23  ;;  %v5272_v10 = vsub.f32 %v10958_v49, %v11169_v6 }
 0x477   :  { %v5387_v31 = vsel %vm5067_vm0, %v5319_v54, 0.0  ;;  %v5320_v36 = vmul.f32 %v5272_v10, %v5272_v10 }
 0x478   :  { %v5106_v47 = vpop.xlane.xlu0 %5105  ;;  %5388 = vadd.xlane.f32.xlu0 %v5387_v31  ;;  %5210 = vadd.xlane.f32.xlu1 %v5209_v33 }
 0x479   :  { %v11179_v26 = vmul.f32 0.020408163, %v5106_v47  ;;  %v5390_v52 = vsel %vm5067_vm0, %v5320_v36, 0.0 }
 0x47a   :  { %v5109_v20 = vpop.xlane.xlu1 %5108 }
 0x47b   :  { %v11181_v8 = vmul.f32 0.020408163, %v5109_v20  ;;  %v5273_v15 = vsub.f32 %v10965_v61, %v11179_v26 }
 0x47c   :  { %5391 = vadd.xlane.f32.xlu1 %v5390_v52 }
 0x47d   :  { %v5321_v16 = vmul.f32 %v5273_v15, %v5273_v15  ;;  %v5274_v7 = vsub.f32 %v10968_v3, %v11181_v8 }
 0x47f   :  { %v5393_v23 = vsel %vm5067_vm0, %v5321_v16, 0.0  ;;  %v5322_v54 = vmul.f32 %v5274_v7, %v5274_v7 }
 0x480   :  { %v5112_v10 = vpop.xlane.xlu0 %5111  ;;  %5394 = vadd.xlane.f32.xlu0 %v5393_v23 }
 0x481   :  { %v11189_v31 = vmul.f32 0.020408163, %v5112_v10  ;;  %v5396_v33 = vsel %vm5067_vm0, %v5322_v54, 0.0 }
 0x482   :  { %v5115_v47 = vpop.xlane.xlu1 %5114  ;;  %5397 = vadd.xlane.f32.xlu1 %v5396_v33 }
 0x483   :  { %v11192_v36 = vmul.f32 0.020408163, %v5115_v47  ;;  %v5275_v20 = vsub.f32 %v10975_v24, %v11189_v31 }
 0x485   :  { %v5323_v52 = vmul.f32 %v5275_v20, %v5275_v20  ;;  %v5276_v15 = vsub.f32 %v10978_v32, %v11192_v36 }
 0x487   :  { %v5399_v16 = vsel %vm5067_vm0, %v5323_v52, 0.0  ;;  %v5324_v7 = vmul.f32 %v5276_v15, %v5276_v15 }
 0x488   :  { %v5118_v61 = vpop.xlane.xlu0 %5117  ;;  %5400 = vadd.xlane.f32.xlu0 %v5399_v16 }
 0x489   :  { %v11199_v23 = vmul.f32 0.020408163, %v5118_v61  ;;  %v5402_v54 = vsel %vm5067_vm0, %v5324_v7, 0.0 }
 0x48a   :  { %v5121_v10 = vpop.xlane.xlu1 %5120  ;;  %5403 = vadd.xlane.f32.xlu1 %v5402_v54 }
 0x48b   :  { %v11202_v33 = vmul.f32 0.020408163, %v5121_v10  ;;  %v5277_v47 = vsub.f32 %v10985_v50, %v11199_v23 }
 0x48d   :  { %v5325_v20 = vmul.f32 %v5277_v47, %v5277_v47  ;;  %v5278_v24 = vsub.f32 %v10988_v43, %v11202_v33 }
 0x48f   :  { %v5405_v52 = vsel %vm5067_vm0, %v5325_v20, 0.0  ;;  %v5326_v15 = vmul.f32 %v5278_v24, %v5278_v24 }
 0x490   :  { %v5124_v42 = vpop.xlane.xlu0 %5123  ;;  %5406 = vadd.xlane.f32.xlu0 %v5405_v52 }
 0x491   :  { %v11209_v61 = vmul.f32 0.020408163, %v5124_v42  ;;  %v5408_v16 = vsel %vm5067_vm0, %v5326_v15, 0.0 }
 0x492   :  { %v5127_v7 = vpop.xlane.xlu1 %5126  ;;  %5409 = vadd.xlane.f32.xlu1 %v5408_v16 }
 0x493   :  { %v11212_v54 = vmul.f32 0.020408163, %v5127_v7  ;;  %v5279_v10 = vsub.f32 %v10995_v13, %v11209_v61 }
 0x495   :  { %v5327_v47 = vmul.f32 %v5279_v10, %v5279_v10  ;;  %v5280_v50 = vsub.f32 %v10998_v53, %v11212_v54 }
 0x497   :  { %v5411_v20 = vsel %vm5067_vm0, %v5327_v47, 0.0  ;;  %v5328_v24 = vmul.f32 %v5280_v50, %v5280_v50 }
 0x498   :  { %v5130_v43 = vpop.xlane.xlu0 %5129  ;;  %5412 = vadd.xlane.f32.xlu0 %v5411_v20 }
 0x499   :  { %v11219_v42 = vmul.f32 0.020408163, %v5130_v43  ;;  %v5414_v52 = vsel %vm5067_vm0, %v5328_v24, 0.0 }
 0x49a   :  { %v5133_v15 = vpop.xlane.xlu1 %5132  ;;  %5415 = vadd.xlane.f32.xlu1 %v5414_v52 }
 0x49b   :  { %v11222_v16 = vmul.f32 0.020408163, %v5133_v15  ;;  %v5281_v7 = vsub.f32 %v11005_v25, %v11219_v42 }
 0x49d   :  { %v5329_v10 = vmul.f32 %v5281_v7, %v5281_v7  ;;  %v5282_v13 = vsub.f32 %v11008_v63, %v11222_v16 }
 0x49f   :  { %v5417_v47 = vsel %vm5067_vm0, %v5329_v10, 0.0  ;;  %v5330_v50 = vmul.f32 %v5282_v13, %v5282_v13 }
 0x4a0   :  { %v5136_v53 = vpop.xlane.xlu0 %5135  ;;  %5418 = vadd.xlane.f32.xlu0 %v5417_v47 }
 0x4a1   :  { %v11229_v43 = vmul.f32 0.020408163, %v5136_v53  ;;  %v5420_v20 = vsel %vm5067_vm0, %v5330_v50, 0.0 }
 0x4a2   :  { %v5139_v24 = vpop.xlane.xlu1 %5138  ;;  %5421 = vadd.xlane.f32.xlu1 %v5420_v20 }
 0x4a3   :  { %12193 = vst [vmem:[#allocation48_spill] sm:$0xff] %v11229_v43  ;;  %v11232_v52 = vmul.f32 0.020408163, %v5139_v24  ;;  %v5283_v15 = vsub.f32 %v11015_v38, %v11229_v43 }
 0x4a5   :  { %v5331_v7 = vmul.f32 %v5283_v15, %v5283_v15  ;;  %v5284_v25 = vsub.f32 %v11018_v18, %v11232_v52 }
 0x4a7   :  { %v5423_v10 = vsel %vm5067_vm0, %v5331_v7, 0.0  ;;  %v5332_v13 = vmul.f32 %v5284_v25, %v5284_v25 }
 0x4a8   :  { %v5142_v63 = vpop.xlane.xlu0 %5141  ;;  %5424 = vadd.xlane.f32.xlu0 %v5423_v10 }
 0x4a9   :  { %v11239_v53 = vmul.f32 0.020408163, %v5142_v63  ;;  %v5426_v47 = vsel %vm5067_vm0, %v5332_v13, 0.0 }
 0x4aa   :  { %v5145_v50 = vpop.xlane.xlu1 %5144  ;;  %5427 = vadd.xlane.f32.xlu1 %v5426_v47 }
 0x4ab   :  { %12194 = vst [vmem:[#allocation49_spill] sm:$0xff] %v11239_v53  ;;  %v11242_v20 = vmul.f32 0.020408163, %v5145_v50  ;;  %v5285_v24 = vsub.f32 %v11024_v44, %v11239_v53 }
 0x4ad   :  { %v5333_v15 = vmul.f32 %v5285_v24, %v5285_v24  ;;  %v5286_v38 = vsub.f32 %v11026_v60, %v11242_v20 }
 0x4af   :  { %v5429_v7 = vsel %vm5067_vm0, %v5333_v15, 0.0  ;;  %v5334_v25 = vmul.f32 %v5286_v38, %v5286_v38 }
 0x4b0   :  { %v5148_v18 = vpop.xlane.xlu0 %5147  ;;  %5430 = vadd.xlane.f32.xlu0 %v5429_v7 }
 0x4b1   :  { %v11249_v63 = vmul.f32 0.020408163, %v5148_v18  ;;  %v5432_v10 = vsel %vm5067_vm0, %v5334_v25, 0.0 }
 0x4b2   :  { %v5151_v13 = vpop.xlane.xlu1 %5150  ;;  %5433 = vadd.xlane.f32.xlu1 %v5432_v10 }
 0x4b3   :  { %12195 = vst [vmem:[#allocation50_spill] sm:$0xff] %v11249_v63  ;;  %v11252_v47 = vmul.f32 0.020408163, %v5151_v13  ;;  %v5287_v50 = vsub.f32 %v11032_v37, %v11249_v63 }
 0x4b5   :  { %v5335_v24 = vmul.f32 %v5287_v50, %v5287_v50  ;;  %v5288_v44 = vsub.f32 %v11034_v62, %v11252_v47 }
 0x4b7   :  { %v5435_v15 = vsel %vm5067_vm0, %v5335_v24, 0.0  ;;  %v5336_v38 = vmul.f32 %v5288_v44, %v5288_v44 }
 0x4b8   :  { %v5154_v60 = vpop.xlane.xlu0 %5153  ;;  %5436 = vadd.xlane.f32.xlu0 %v5435_v15 }
 0x4b9   :  { %v11259_v18 = vmul.f32 0.020408163, %v5154_v60  ;;  %v5438_v7 = vsel %vm5067_vm0, %v5336_v38, 0.0 }
 0x4ba   :  { %v5157_v25 = vpop.xlane.xlu1 %5156  ;;  %5439 = vadd.xlane.f32.xlu1 %v5438_v7 }
 0x4bb   :  { %12196 = vst [vmem:[#allocation51_spill] sm:$0xff] %v11259_v18  ;;  %v11262_v10 = vmul.f32 0.020408163, %v5157_v25  ;;  %v5289_v13 = vsub.f32 %v11040_v57, %v11259_v18 }
 0x4bd   :  { %12197 = vst [vmem:[#allocation52_spill] sm:$0xff] %v11262_v10  ;;  %v5337_v50 = vmul.f32 %v5289_v13, %v5289_v13  ;;  %v5290_v37 = vsub.f32 %v11042_v29, %v11262_v10 }
 0x4bf   :  { %v5441_v24 = vsel %vm5067_vm0, %v5337_v50, 0.0  ;;  %v5338_v44 = vmul.f32 %v5290_v37, %v5290_v37 }
 0x4c0   :  { %v5160_v62 = vpop.xlane.xlu0 %5159  ;;  %5442 = vadd.xlane.f32.xlu0 %v5441_v24 }
 0x4c1   :  { %v11269_v60 = vmul.f32 0.020408163, %v5160_v62  ;;  %v5444_v15 = vsel %vm5067_vm0, %v5338_v44, 0.0 }
 0x4c2   :  { %v5163_v38 = vpop.xlane.xlu1 %5162  ;;  %5445 = vadd.xlane.f32.xlu1 %v5444_v15 }
 0x4c3   :  { %12198 = vst [vmem:[#allocation53_spill] sm:$0xff] %v11269_v60  ;;  %v11272_v7 = vmul.f32 0.020408163, %v5163_v38  ;;  %v5291_v25 = vsub.f32 %v11048_v9, %v11269_v60 }
 0x4c5   :  { %12199 = vst [vmem:[#allocation54_spill] sm:$0xff] %v11272_v7  ;;  %v5339_v13 = vmul.f32 %v5291_v25, %v5291_v25  ;;  %v5292_v57 = vsub.f32 %v11050_v1, %v11272_v7 }
 0x4c7   :  { %v5447_v50 = vsel %vm5067_vm0, %v5339_v13, 0.0  ;;  %v5340_v37 = vmul.f32 %v5292_v57, %v5292_v57 }
 0x4c8   :  { %v5166_v29 = vpop.xlane.xlu0 %5165  ;;  %5448 = vadd.xlane.f32.xlu0 %v5447_v50 }
 0x4c9   :  { %v11279_v62 = vmul.f32 0.020408163, %v5166_v29  ;;  %v5450_v24 = vsel %vm5067_vm0, %v5340_v37, 0.0 }
 0x4ca   :  { %v5169_v44 = vpop.xlane.xlu1 %5168  ;;  %5451 = vadd.xlane.f32.xlu1 %v5450_v24 }
 0x4cb   :  { %12200 = vst [vmem:[#allocation55_spill] sm:$0xff] %v11279_v62  ;;  %v11282_v15 = vmul.f32 0.020408163, %v5169_v44  ;;  %v5293_v38 = vsub.f32 %v11056_v21, %v11279_v62 }
 0x4cd   :  { %12201 = vst [vmem:[#allocation56_spill] sm:$0xff] %v11282_v15  ;;  %v5341_v25 = vmul.f32 %v5293_v38, %v5293_v38  ;;  %v5294_v9 = vsub.f32 %v11058_v41, %v11282_v15 }
 0x4cf   :  { %v5453_v13 = vsel %vm5067_vm0, %v5341_v25, 0.0  ;;  %v5342_v57 = vmul.f32 %v5294_v9, %v5294_v9 }
 0x4d0   :  { %v5172_v1 = vpop.xlane.xlu0 %5171  ;;  %5454 = vadd.xlane.f32.xlu0 %v5453_v13 }
 0x4d1   :  { %v11289_v29 = vmul.f32 0.020408163, %v5172_v1  ;;  %v5456_v50 = vsel %vm5067_vm0, %v5342_v57, 0.0 }
 0x4d2   :  { %v5175_v37 = vpop.xlane.xlu1 %5174  ;;  %5457 = vadd.xlane.f32.xlu1 %v5456_v50 }
 0x4d3   :  { %12202 = vst [vmem:[#allocation57_spill] sm:$0xff] %v11289_v29  ;;  %v11292_v24 = vmul.f32 0.020408163, %v5175_v37  ;;  %v5295_v44 = vsub.f32 %v11064_v34, %v11289_v29 }
 0x4d5   :  { %12203 = vst [vmem:[#allocation58_spill] sm:$0xff] %v11292_v24  ;;  %v5343_v38 = vmul.f32 %v5295_v44, %v5295_v44  ;;  %v5296_v21 = vsub.f32 %v11066_v35, %v11292_v24 }
 0x4d7   :  { %v5459_v25 = vsel %vm5067_vm0, %v5343_v38, 0.0  ;;  %v5344_v9 = vmul.f32 %v5296_v21, %v5296_v21 }
 0x4d8   :  { %v5178_v41 = vpop.xlane.xlu0 %5177  ;;  %5460 = vadd.xlane.f32.xlu0 %v5459_v25 }
 0x4d9   :  { %v11299_v1 = vmul.f32 0.020408163, %v5178_v41  ;;  %v5462_v13 = vsel %vm5067_vm0, %v5344_v9, 0.0 }
 0x4da   :  { %v5181_v57 = vpop.xlane.xlu1 %5180  ;;  %5463 = vadd.xlane.f32.xlu1 %v5462_v13 }
 0x4db   :  { %12204 = vst [vmem:[#allocation59_spill] sm:$0xff] %v11299_v1  ;;  %v11302_v50 = vmul.f32 0.020408163, %v5181_v57  ;;  %v5297_v37 = vsub.f32 %v11072_v59, %v11299_v1 }
 0x4dd   :  { %12205 = vst [vmem:[#allocation60_spill] sm:$0xff] %v11302_v50  ;;  %v5359_v44 = vpop.xlane.xlu0 %5358  ;;  %v5345_v34 = vmul.f32 %v5297_v37, %v5297_v37  ;;  %v5298_v35 = vsub.f32 %v11076_v5, %v11302_v50 }
 0x4de   :  { %v5501_v5 = vmul.f32 0.020408163, %v5359_v44 }
 0x4df   :  { %v5465_v21 = vsel %vm5067_vm0, %v5345_v34, 0.0  ;;  %v5346_v38 = vmul.f32 %v5298_v35, %v5298_v35 }
 0x4e0   :  { %5466 = vadd.xlane.f32.xlu0 %v5465_v21 }
 0x4e1   :  { %v5362_v41 = vpop.xlane.xlu1 %5361  ;;  %v5184_v25 = vpop.xlane.xlu0 %5183  ;;  %v5468_v9 = vsel %vm5067_vm0, %v5346_v38, 0.0 }
 0x4e2   :  { %v11310_v32 = vmul.f32 0.020408163, %v5184_v25  ;;  %5469 = vadd.xlane.f32.xlu1 %v5468_v9  ;;  %v5502_v3 = vmul.f32 0.020408163, %v5362_v41  ;;  %v5549_v25 = vadd.f32 1e-05, %v5501_v5 }
 0x4e3   :  { %v5646_v41 = vld [vmem:[%s12077_s2 + $0x8] sm:$0xff] }
 0x4e4   :  { %12206 = vst [vmem:[#allocation61_spill] sm:$0xff] %v11310_v32  ;;  %v5299_v13 = vsub.f32 %v11089_v48, %v11310_v32  ;;  %v5550_v38 = vadd.f32 1e-05, %v5502_v3 }
 0x4e5   :  { %v5187_v57 = vpop.xlane.xlu1 %5186  ;;  %v5365_v3 = vpop.xlane.xlu0 %5364 }
 0x4e6   :  { %v11314_v59 = vmul.f32 0.020408163, %v5187_v57  ;;  %v5347_v37 = vmul.f32 %v5299_v13, %v5299_v13  ;;  %8348 = vrsqrt.f32 %v5550_v38  ;;  %v5645_v13 = vld [vmem:[%s12077_s2] sm:$0xff] }
 0x4e7   :  { %8350 = vrsqrt.f32 %v5549_v25 }
 0x4e8   :  { %12207 = vst [vmem:[#allocation62_spill] sm:$0xff] %v11314_v59  ;;  %v5471_v34 = vsel %vm5067_vm0, %v5347_v37, 0.0  ;;  %v5300_v35 = vsub.f32 %v11093_v55, %v11314_v59 }
 0x4e9   :  { %5472 = vadd.xlane.f32.xlu0 %v5471_v34  ;;  %v5368_v5 = vpop.xlane.xlu1 %5367  ;;  %v5190_v34 = vpop.xlane.xlu0 %5189 }
 0x4ea   :  { %v5348_v21 = vmul.f32 %v5300_v35, %v5300_v35  ;;  %v11326_v35 = vmul.f32 0.020408163, %v5190_v34  ;;  %v5504_v32 = vmul.f32 0.020408163, %v5368_v5  ;;  %v5648_v5 = vld [vmem:[%s12077_s2 + $0x18] sm:$0xff] }
 0x4ec   :  { %v5474_v9 = vsel %vm5067_vm0, %v5348_v21, 0.0  ;;  %12208 = vst [vmem:[#allocation63_spill] sm:$0xff] %v11326_v35  ;;  %v5301_v25 = vsub.f32 %v11107_v45, %v11326_v35 }
 0x4ed   :  { %5475 = vadd.xlane.f32.xlu1 %v5474_v9  ;;  %v5193_v21 = vpop.xlane.xlu1 %5192 }
 0x4ee   :  { %v11328_v38 = vmul.f32 0.020408163, %v5193_v21  ;;  %v5349_v9 = vmul.f32 %v5301_v25, %v5301_v25  ;;  %v5552_v21 = vadd.f32 1e-05, %v5504_v32  ;;  %v5741_v25 = vld [vmem:[%s12078_s3] sm:$0xff]  ;;  %v5647_v32 = vld [vmem:[%s12077_s2 + $0x10] sm:$0xff] }
 0x4f0   :  { %v8349_v48 = vpop.eup %8348  ;;  %12209 = vst [vmem:[#allocation64_spill] sm:$0xff] %v11328_v38  ;;  %v5302_v55 = vsub.f32 %v11111_v58, %v11328_v38 }
 0x4f1   :  { %v8351_v44 = vpop.eup %8350  ;;  %v5694_v57 = vmul.f32 %v8349_v48, %v5646_v41  ;;  %v5477_v48 = vsel %vm5067_vm0, %v5349_v9, 0.0 }
 0x4f2   :  { %v5693_v37 = vmul.f32 %v8351_v44, %v5645_v13  ;;  %v5350_v41 = vmul.f32 %v5302_v55, %v5302_v55  ;;  %v5503_v44 = vmul.f32 0.020408163, %v5365_v3  ;;  %v5742_v55 = vld [vmem:[%s12078_s3 + $0x8] sm:$0xff] }
 0x4f3   :  { %v5790_v45 = vmul.f32 %v5694_v57, %v11084_v19 }
 0x4f4   :  { %v5480_v13 = vsel %vm5067_vm0, %v5350_v41, 0.0  ;;  %v5551_v34 = vadd.f32 1e-05, %v5503_v44  ;;  %v5789_v49 = vmul.f32 %v5693_v37, %v11074_v12 }
 0x4f6   :  { %8352 = vrsqrt.f32 %v5551_v34  ;;  %v5837_v3 = vsub.f32 %v5741_v25, %v5789_v49 }
 0x4f7   :  { %8354 = vrsqrt.f32 %v5552_v21 }
 0x4fe   :  { %5892 = vperm.xlu1 %7699, %v5694_v57   ;;  %v5371_v57 = vpop.xlane.xlu0 %5370 }
 0x4ff   :  { %5887 = vperm.xlu0 %7698, %v5693_v37  }
 0x500   :  { %v8353_v9 = vpop.eup %8352 }
 0x501   :  { %v5695_v12 = vmul.f32 %v8353_v9, %v5647_v32  ;;  %v8355_v37 = vpop.eup %8354 }
 0x502   :  { %v5696_v19 = vmul.f32 %v8355_v37, %v5648_v5  ;;  %v5196_v41 = vpop.xlane.xlu0 %5195  ;;  %v5505_v37 = vmul.f32 0.020408163, %v5371_v57 }
 0x503   :  { %v11350_v49 = vmul.f32 0.020408163, %v5196_v41 }
 0x505   :  { %12210 = vst [vmem:[#allocation65_spill] sm:$0xff] %v11350_v49  ;;  %v5303_v44 = vsub.f32 %v11125_v46, %v11350_v49 }
 0x506   :  { %v11361_v9 = vpop.xlane.xlu0 %5376 }
 0x507   :  { %v5507_v7 = vmul.f32 0.020408163, %v11361_v9 }
 0x50a   :  { %v5202_v5 = vpop.xlane.xlu0 %5201 }
 0x51e   :  { %5478 = vadd.xlane.f32.xlu0 %v5477_v48  ;;  %v5838_v48 = vsub.f32 %v5742_v55, %v5790_v45  ;;  %v5374_v45 = vpop.xlane.xlu1 %5373 }
 0x522   :  { %5481 = vadd.xlane.f32.xlu1 %v5480_v13  ;;  %v5351_v13 = vmul.f32 %v5303_v44, %v5303_v44  ;;  %v5199_v34 = vpop.xlane.xlu1 %5198  ;;  %v5553_v44 = vadd.f32 1e-05, %v5505_v37  ;;  %v5743_v37 = vld [vmem:[%s12078_s3 + $0x10] sm:$0xff] }
 0x523   :  { %v11354_v21 = vmul.f32 0.020408163, %v5199_v34  ;;  %v5506_v34 = vmul.f32 0.020408163, %v5374_v45  ;;  %v5791_v45 = vmul.f32 %v5695_v12, %v11091_v40 }
 0x524   :  { %v5483_v25 = vsel %vm5067_vm0, %v5351_v13, 0.0  ;;  %v11366_v13 = vpop.xlane.xlu0 %5382  ;;  %8356 = vrsqrt.f32 %v5553_v44 }
 0x525   :  { %12211 = vst [vmem:[#allocation66_spill] sm:$0xff] %v11354_v21 }
 0x526   :  { %v11357_v55 = vpop.xlane.xlu1 %5379 }
 0x52a   :  { %v5205_v32 = vpop.xlane.xlu1 %5204 }
 0x52e   :  { %v11364_v46 = vpop.xlane.xlu1 %5385 }
 0x532   :  { %v11372_v58 = vpop.xlane.xlu1 %5210 }
 0x533   :  { %6175 = vperm.xlu1 %7699, %v5837_v3   ;;  %v5304_v3 = vsub.f32 %v11129_v0, %v11354_v21  ;;  %v5744_v0 = vld [vmem:[%s12078_s3 + $0x18] sm:$0xff] }
 0x534   :  { %6180 = vperm.xlu0 %7698, %v5838_v48  }
 0x535   :  { %v5352_v48 = vmul.f32 %v5304_v3, %v5304_v3  ;;  %v5554_v3 = vadd.f32 1e-05, %v5506_v34 }
 0x537   :  { %5897 = vperm.xlu1 %7699, %v5695_v12   ;;  %v5486_v41 = vsel %vm5067_vm0, %v5352_v48, 0.0  ;;  %8358 = vrsqrt.f32 %v5554_v3  ;;  %v11374_v48 = vpop.xlane.xlu0 %5207  ;;  %v5650_v12 = vld [vmem:[%s12077_s2 + $0x28] sm:$0xff] }
 0x53b   :  { %5902 = vperm.xlu1 %7699, %v5696_v19   ;;  %v11382_v49 = vpop.xlane.xlu0 %5388 }
 0x53f   :  { %v11389_v40 = vpop.xlane.xlu0 %5394 }
 0x553   :  { %5484 = vadd.xlane.f32.xlu0 %v5483_v25  ;;  %v5792_v25 = vmul.f32 %v5696_v19, %v11100_v14  ;;  %v11380_v14 = vpop.xlane.xlu1 %5391  ;;  %v5839_v19 = vsub.f32 %v5743_v37, %v5791_v45  ;;  %v11396_v45 = vpop.xlane.xlu0 %5400 }
 0x555   :  { %v5840_v57 = vsub.f32 %v5744_v0, %v5792_v25  ;;  %v5649_v0 = vld [vmem:[%s12077_s2 + $0x20] sm:$0xff] }
 0x557   :  { %v11387_v44 = vpop.xlane.xlu1 %5397  ;;  %v11402_v35 = vpop.xlane.xlu0 %5406 }
 0x55b   :  { %v11394_v3 = vpop.xlane.xlu1 %5403  ;;  %v11408_v21 = vpop.xlane.xlu0 %5412 }
 0x55f   :  { %5487 = vadd.xlane.f32.xlu1 %v5486_v41  ;;  %v8357_v41 = vpop.eup %8356  ;;  %v11398_v37 = vpop.xlane.xlu1 %5409 }
 0x560   :  { %v5697_v34 = vmul.f32 %v8357_v41, %v5649_v0  ;;  %v8359_v25 = vpop.eup %8358  ;;  %v11412_v38 = vpop.xlane.xlu0 %5418 }
 0x563   :  { %v11404_v41 = vpop.xlane.xlu1 %5415 }
 0x564   :  { %v11416_v29 = vpop.xlane.xlu0 %5424 }
 0x567   :  { %v11410_v1 = vpop.xlane.xlu1 %5421 }
 0x568   :  { %v11421_v62 = vpop.xlane.xlu0 %5430 }
 0x569   :  { %6190 = vperm.xlu0 %7698, %v5840_v57   ;;  %v5698_v57 = vmul.f32 %v8359_v25, %v5650_v12 }
 0x56b   :  { %v11414_v12 = vpop.xlane.xlu1 %5427  ;;  %v5794_v15 = vmul.f32 %v5698_v57, %v11115_v30 }
 0x56f   :  { %v11419_v59 = vpop.xlane.xlu1 %5433 }
 0x570   :  { %6185 = vperm.xlu1 %7699, %v5839_v19   ;;  %v11400_v19 = vmul.f32 0.020408163, %v5202_v5 }
 0x572   :  { %12212 = vst [vmem:[#allocation67_spill] sm:$0xff] %v11400_v19  ;;  %v5305_v0 = vsub.f32 %v11143_v56, %v11400_v19  ;;  %v11425_v56 = vmul.f32 0.020408163, %v5205_v32  ;;  %v11427_v19 = vpop.xlane.xlu0 %5436  ;;  %v5746_v32 = vld [vmem:[%s12078_s3 + $0x28] sm:$0xff] }
 0x573   :  { %v11423_v50 = vpop.xlane.xlu1 %5439 }
 0x574   :  { %5907 = vperm.xlu1 %7699, %v5697_v34   ;;  %v5353_v25 = vmul.f32 %v5305_v0, %v5305_v0  ;;  %12213 = vst [vmem:[#allocation68_spill] sm:$0xff] %v11425_v56  ;;  %v5306_v0 = vsub.f32 %v11147_v22, %v11425_v56  ;;  %v5842_v56 = vsub.f32 %v5746_v32, %v5794_v15 }
 0x576   :  { %v5489_v5 = vsel %vm5067_vm0, %v5353_v25, 0.0  ;;  %v11433_v24 = vpop.xlane.xlu0 %5442 }
 0x577   :  { %v11429_v60 = vpop.xlane.xlu1 %5445  ;;  %12214 = vst [vmem:[#allocation69_spill] sm:$0xff] %v11433_v24 }
 0x578   :  { %5912 = vperm.xlu1 %7699, %v5698_v57  }
 0x57a   :  { %v11437_v25 = vpop.xlane.xlu0 %5448 }
 0x57b   :  { %v11435_v18 = vpop.xlane.xlu1 %5451  ;;  %12215 = vst [vmem:[#allocation70_spill] sm:$0xff] %v11437_v25  ;;  %v5555_v25 = vadd.f32 1e-05, %v5507_v7  ;;  %v5745_v7 = vld [vmem:[%s12078_s3 + $0x20] sm:$0xff] }
 0x57d   :  { %8360 = vrsqrt.f32 %v5555_v25  ;;  %v5651_v25 = vld [vmem:[%s12077_s2 + $0x30] sm:$0xff] }
 0x57e   :  { %v11446_v53 = vpop.xlane.xlu0 %5454 }
 0x57f   :  { %v11440_v63 = vpop.xlane.xlu1 %5457 }
 0x582   :  { %v11452_v30 = vpop.xlane.xlu0 %5460 }
 0x583   :  { %v11449_v10 = vpop.xlane.xlu1 %5463  ;;  %12216 = vst [vmem:[#allocation71_spill] sm:$0xff] %v11452_v30 }
 0x586   :  { %v11456_v24 = vpop.xlane.xlu0 %5466 }
 0x587   :  { %v11454_v57 = vpop.xlane.xlu1 %5469  ;;  %12217 = vst [vmem:[#allocation72_spill] sm:$0xff] %v11456_v24  ;;  %v8361_v32 = vpop.eup %8360 }
 0x588   :  { %5490 = vadd.xlane.f32.xlu0 %v5489_v5  ;;  %v5354_v5 = vmul.f32 %v5306_v0, %v5306_v0  ;;  %v5508_v0 = vmul.f32 0.020408163, %v11357_v55 }
 0x58a   :  { %v5492_v22 = vsel %vm5067_vm0, %v5354_v5, 0.0  ;;  %v5556_v43 = vadd.f32 1e-05, %v5508_v0  ;;  %v11460_v5 = vpop.xlane.xlu0 %5472 }
 0x58b   :  { %v11458_v9 = vpop.xlane.xlu1 %5475  ;;  %12218 = vst [vmem:[#allocation73_spill] sm:$0xff] %v11460_v5  ;;  %v11473_v5 = vmul.f32 %v8361_v32, %v5651_v25 }
 0x58c   :  { %8362 = vrsqrt.f32 %v5556_v43 }
 0x58f   :  { %v5893_v15 = vpop.permute.xlu1 %5892 }
 0x59c   :  { %5493 = vadd.xlane.f32.xlu1 %v5492_v22  ;;  %v5793_v22 = vmul.f32 %v5697_v34, %v11109_v51  ;;  %v8363_v51 = vpop.eup %8362  ;;  %v11476_v34 = vmul.f32 0.020408163, %v11374_v48 }
 0x59e   :  { %6200 = vperm.xlu0 %7698, %v5842_v56   ;;  %v5888_v56 = vpop.permute.xlu0 %5887  ;;  %v5841_v55 = vsub.f32 %v5745_v7, %v5793_v22  ;;  %v5652_v22 = vld [vmem:[%s12077_s2 + $0x38] sm:$0xff]  ;;  %v5307_v32 = vsub.f32 %v11161_v39, %v11476_v34 }
 0x59f   :  { %v6125_v7 = vmul.f32 %v10905_v2, %v5888_v56  ;;  %v5700_v30 = vmul.f32 %v8363_v51, %v5652_v22  ;;  %v5514_v51 = vmul.f32 0.020408163, %v11387_v44 }
 0x5a0   :  { %v5355_v2 = vmul.f32 %v5307_v32, %v5307_v32 }
 0x5a1   :  { %v5796_v22 = vmul.f32 %v5700_v30, %v11133_v17  ;;  %v5516_v17 = vmul.f32 0.020408163, %v11394_v3 }
 0x5a2   :  { %v5495_v48 = vsel %vm5067_vm0, %v5355_v2, 0.0 }
 0x5ab   :  { %v11469_v0 = vpop.xlane.xlu0 %5478 }
 0x5ac   :  { %12219 = vst [vmem:[#allocation74_spill] sm:$0xff] %v11469_v0 }
 0x5ad   :  { %6195 = vperm.xlu1 %7699, %v5841_v55   ;;  %v6126_v55 = vmul.f32 %v10908_v4, %v5893_v15  ;;  %v5510_v4 = vmul.f32 0.020408163, %v11364_v46  ;;  %v5748_v46 = vld [vmem:[%s12078_s3 + $0x38] sm:$0xff] }
 0x5af   :  { %v11471_v43 = vpop.xlane.xlu1 %5481  ;;  %v5558_v56 = vadd.f32 1e-05, %v5510_v4  ;;  %v5750_v4 = vld [vmem:[%s12078_s3 + $0x48] sm:$0xff] }
 0x5b0   :  { %12220 = vst [vmem:[#allocation75_spill] sm:$0xff] %v11471_v43 }
 0x5b1   :  { %5917 = vperm.xlu1 %7699, %v11473_v5   ;;  %8364 = vrsqrt.f32 %v5558_v56 }
 0x5b3   :  { %v6181_v24 = vpop.permute.xlu0 %6180  ;;  %v6176_v0 = vpop.permute.xlu1 %6175 }
 0x5b4   :  { %v6414_v25 = vadd.f32 %v6181_v24, %v6126_v55  ;;  %v6413_v43 = vadd.f32 %v6176_v0, %v6125_v7  ;;  %v5512_v24 = vmul.f32 0.020408163, %v11380_v14  ;;  %v11498_v0 = vmul.f32 0.020408163, %v11372_v58  ;;  %v5654_v7 = vld [vmem:[%s12077_s2 + $0x48] sm:$0xff] }
 0x5b5   :  { %5922 = vperm.xlu1 %7699, %v5700_v30   ;;  %v5562_v55 = vadd.f32 1e-05, %v5514_v51  ;;  %v5844_v58 = vsub.f32 %v5748_v46, %v5796_v22  ;;  %v5518_v51 = vmul.f32 0.020408163, %v11398_v37  ;;  %v5513_v37 = vmul.f32 0.020408163, %v11389_v40 }
 0x5b6   :  { %6462 = vst.msk [vmem:[%s12079_s4 + $0x8] sm:$0xff] %vm5067_vm0, %v6414_v25  ;;  %6461 = vst.msk [vmem:[%s12079_s4] sm:$0xff] %vm5067_vm0, %v6413_v43  ;;  %v5560_v15 = vadd.f32 1e-05, %v5512_v24  ;;  %v5308_v14 = vsub.f32 %v11165_v28, %v11498_v0  ;;  %v5509_v25 = vmul.f32 0.020408163, %v11366_v13 }
 0x5b7   :  { %v5564_v24 = vadd.f32 1e-05, %v5516_v17  ;;  %v5898_v46 = vpop.permute.xlu1 %5897  ;;  %v5653_v40 = vld [vmem:[%s12077_s2 + $0x40] sm:$0xff] }
 0x5b8   :  { %8366 = vrsqrt.f32 %v5560_v15  ;;  %v5356_v44 = vmul.f32 %v5308_v14, %v5308_v14  ;;  %v5557_v56 = vadd.f32 1e-05, %v5509_v25  ;;  %v5658_v14 = vld [vmem:[%s12077_s2 + $0x68] sm:$0xff] }
 0x5b9   :  { %8368 = vrsqrt.f32 %v5562_v55 }
 0x5ba   :  { %v5498_v13 = vsel %vm5067_vm0, %v5356_v44, 0.0  ;;  %8370 = vrsqrt.f32 %v5557_v56  ;;  %v12221_v44 = vld [vmem:[#allocation43_spill] sm:$0xff] }
 0x5bb   :  { %v8365_v43 = vpop.eup %8364  ;;  %8372 = vrsqrt.f32 %v5564_v24  ;;  %v5903_v25 = vpop.permute.xlu1 %5902  ;;  %v5561_v24 = vadd.f32 1e-05, %v5513_v37 }
 0x5bc   :  { %v5702_v32 = vmul.f32 %v8365_v43, %v5654_v7  ;;  %v5752_v7 = vld [vmem:[%s12078_s3 + $0x58] sm:$0xff] }
 0x5bd   :  { %5496 = vadd.xlane.f32.xlu0 %v5495_v48  ;;  %v5656_v48 = vld [vmem:[%s12077_s2 + $0x58] sm:$0xff] }
 0x5be   :  { %v5798_v30 = vmul.f32 %v5702_v32, %v11151_v11  ;;  %v5511_v11 = vmul.f32 0.020408163, %v11382_v49 }
 0x5c0   :  { %v5846_v15 = vsub.f32 %v5750_v4, %v5798_v30  ;;  %v5559_v55 = vadd.f32 1e-05, %v5511_v11  ;;  %v5795_v30 = vmul.f32 %v11473_v5, %v12221_v44  ;;  %v5747_v4 = vld [vmem:[%s12078_s3 + $0x30] sm:$0xff]  ;;  %v5660_v5 = vld [vmem:[%s12077_s2 + $0x78] sm:$0xff] }
 0x5c2   :  { %v8367_v2 = vpop.eup %8366  ;;  %8374 = vrsqrt.f32 %v5559_v55  ;;  %v5522_v55 = vmul.f32 0.020408163, %v11410_v1  ;;  %v5756_v1 = vld [vmem:[%s12078_s3 + $0x78] sm:$0xff] }
 0x5c3   :  { %v5704_v3 = vmul.f32 %v8367_v2, %v5656_v48  ;;  %v8369_v43 = vpop.eup %8368 }
 0x5c4   :  { %v8371_v2 = vpop.eup %8370 }
 0x5c5   :  { %v5800_v22 = vmul.f32 %v5704_v3, %v11169_v6  ;;  %v5520_v6 = vmul.f32 0.020408163, %v11404_v41  ;;  %v8373_v56 = vpop.eup %8372  ;;  %v5754_v41 = vld [vmem:[%s12078_s3 + $0x68] sm:$0xff] }
 0x5c7   :  { %v5848_v49 = vsub.f32 %v5752_v7, %v5800_v22  ;;  %v5708_v7 = vmul.f32 %v8373_v56, %v5660_v5 }
 0x5cc   :  { %v8375_v37 = vpop.eup %8374 }
 0x5d3   :  { %6210 = vperm.xlu0 %7698, %v5844_v58   ;;  %v5566_v58 = vadd.f32 1e-05, %v5518_v51  ;;  %v5701_v51 = vmul.f32 %v8371_v2, %v5653_v40  ;;  %v5570_v40 = vadd.f32 1e-05, %v5522_v55 }
 0x5d5   :  { %8376 = vrsqrt.f32 %v5566_v58 }
 0x5d6   :  { %8378 = vrsqrt.f32 %v5561_v24 }
 0x5d7   :  { %5932 = vperm.xlu0 %7698, %v5702_v32   ;;  %v5706_v32 = vmul.f32 %v8369_v43, %v5658_v14  ;;  %v5515_v14 = vmul.f32 0.020408163, %v11396_v45  ;;  %v5804_v45 = vmul.f32 %v5708_v7, %v11192_v36 }
 0x5d9   :  { %5499 = vadd.xlane.f32.xlu1 %v5498_v13  ;;  %v5802_v48 = vmul.f32 %v5706_v32, %v11181_v8  ;;  %v12222_v13 = vld [vmem:[#allocation3_spill] sm:$0xff]  ;;  %v5843_v8 = vsub.f32 %v5747_v4, %v5795_v30  ;;  %v5563_v2 = vadd.f32 1e-05, %v5515_v14  ;;  %v12224_v4 = vld [vmem:[#allocation2_spill] sm:$0xff]  ;;  %v5852_v24 = vsub.f32 %v5756_v1, %v5804_v45  ;;  %v5659_v1 = vld [vmem:[%s12077_s2 + $0x70] sm:$0xff] }
 0x5da   :  { %v5662_v30 = vld [vmem:[%s12077_s2 + $0x88] sm:$0xff] }
 0x5db   :  { %6220 = vperm.xlu0 %7698, %v5846_v15   ;;  %v6128_v15 = vmul.f32 %v12222_v13, %v5903_v25  ;;  %v5850_v43 = vsub.f32 %v5754_v41, %v5802_v48  ;;  %v5655_v25 = vld [vmem:[%s12077_s2 + $0x50] sm:$0xff]  ;;  %v6127_v48 = vmul.f32 %v12224_v4, %v5898_v46  ;;  %v5524_v46 = vmul.f32 0.020408163, %v11414_v12 }
 0x5dc   :  { %v5703_v41 = vmul.f32 %v8375_v37, %v5655_v25  ;;  %v5526_v37 = vmul.f32 0.020408163, %v11419_v59  ;;  %v5753_v25 = vld [vmem:[%s12078_s3 + $0x60] sm:$0xff]  ;;  %v5666_v59 = vld [vmem:[%s12077_s2 + $0xa8] sm:$0xff] }
 0x5df   :  { %5942 = vperm.xlu0 %7698, %v5704_v3   ;;  %v5568_v3 = vadd.f32 1e-05, %v5520_v6  ;;  %v5749_v6 = vld [vmem:[%s12078_s3 + $0x40] sm:$0xff]  ;;  %v8377_v44 = vpop.eup %8376 }
 0x5e0   :  { %v11531_v17 = vpop.xlane.xlu0 %5484  ;;  %v5710_v13 = vmul.f32 %v8377_v44, %v5662_v30 }
 0x5e1   :  { %8380 = vrsqrt.f32 %v5568_v3  ;;  %v5799_v3 = vmul.f32 %v5703_v41, %v11163_v27  ;;  %v5664_v27 = vld [vmem:[%s12077_s2 + $0x98] sm:$0xff] }
 0x5e2   :  { %8382 = vrsqrt.f32 %v5563_v2  ;;  %v5574_v2 = vadd.f32 1e-05, %v5526_v37 }
 0x5e3   :  { %6230 = vperm.xlu0 %7698, %v5848_v49   ;;  %v12223_v49 = vld [vmem:[#allocation46_spill] sm:$0xff]  ;;  %8384 = vrsqrt.f32 %v5570_v40 }
 0x5e7   :  { %5952 = vperm.xlu0 %7698, %v5706_v32   ;;  %v5797_v32 = vmul.f32 %v5701_v51, %v12223_v49 }
 0x5e8   :  { %v6191_v11 = vpop.permute.xlu0 %6190 }
 0x5e9   :  { %v6416_v22 = vadd.f32 %v6191_v11, %v6128_v15  ;;  %v5845_v56 = vsub.f32 %v5749_v6, %v5797_v32  ;;  %v5517_v15 = vmul.f32 0.020408163, %v11402_v35  ;;  %v8379_v11 = vpop.eup %8378  ;;  %v5657_v35 = vld [vmem:[%s12077_s2 + $0x60] sm:$0xff]  ;;  %v5519_v32 = vmul.f32 0.020408163, %v11408_v21  ;;  %v5760_v21 = vld [vmem:[%s12078_s3 + $0x98] sm:$0xff] }
 0x5ea   :  { %6205 = vperm.xlu1 %7699, %v5843_v8   ;;  %v5751_v8 = vld [vmem:[%s12078_s3 + $0x50] sm:$0xff]  ;;  %v5705_v55 = vmul.f32 %v8379_v11, %v5657_v35  ;;  %v5523_v35 = vmul.f32 0.020408163, %v11416_v29  ;;  %v5764_v29 = vld [vmem:[%s12078_s3 + $0xb8] sm:$0xff] }
 0x5eb   :  { %6464 = vst.msk [vmem:[%s12079_s4 + $0x18] sm:$0xff] %vm5067_vm0, %v6416_v22  ;;  %6240 = vperm.xlu0 %7698, %v5850_v43   ;;  %v8381_v22 = vpop.eup %8380  ;;  %v5758_v43 = vld [vmem:[%s12078_s3 + $0x88] sm:$0xff]  ;;  %v5565_v12 = vadd.f32 1e-05, %v5517_v15  ;;  %v5847_v14 = vsub.f32 %v5751_v8, %v5799_v3  ;;  %v5661_v15 = vld [vmem:[%s12077_s2 + $0x80] sm:$0xff] }
 0x5ec   :  { %v11555_v58 = vpop.xlane.xlu1 %5487  ;;  %v5712_v49 = vmul.f32 %v8381_v22, %v5664_v27  ;;  %v5801_v6 = vmul.f32 %v5705_v55, %v11179_v26  ;;  %v8383_v45 = vpop.eup %8382  ;;  %v5567_v26 = vadd.f32 1e-05, %v5519_v32  ;;  %v5530_v22 = vmul.f32 0.020408163, %v11429_v60 }
 0x5ed   :  { %8386 = vrsqrt.f32 %v5565_v12  ;;  %v8385_v30 = vpop.eup %8384  ;;  %v5757_v12 = vld [vmem:[%s12078_s3 + $0x80] sm:$0xff]  ;;  %v5571_v60 = vadd.f32 1e-05, %v5523_v35 }
 0x5ee   :  { %5927 = vperm.xlu1 %7699, %v5701_v51   ;;  %v5806_v51 = vmul.f32 %v5710_v13, %v11202_v33  ;;  %v5808_v44 = vmul.f32 %v5712_v49, %v11212_v54  ;;  %v5849_v4 = vsub.f32 %v5753_v25, %v5801_v6  ;;  %v5714_v40 = vmul.f32 %v8385_v30, %v5666_v59  ;;  %v5759_v30 = vld [vmem:[%s12078_s3 + $0x90] sm:$0xff]  ;;  %v5665_v59 = vld [vmem:[%s12077_s2 + $0xa0] sm:$0xff] }
 0x5ef   :  { %5962 = vperm.xlu0 %7698, %v5708_v7   ;;  %v5572_v7 = vadd.f32 1e-05, %v5524_v46  ;;  %v5525_v6 = vmul.f32 0.020408163, %v11421_v62  ;;  %v5532_v25 = vmul.f32 0.020408163, %v11435_v18 }
 0x5f0   :  { %v6186_v36 = vpop.permute.xlu1 %6185  ;;  %v5854_v33 = vsub.f32 %v5758_v43, %v5806_v51  ;;  %v5856_v54 = vsub.f32 %v5760_v21, %v5808_v44 }
 0x5f1   :  { %v6415_v5 = vadd.f32 %v6186_v36, %v6127_v48  ;;  %8388 = vrsqrt.f32 %v5572_v7  ;;  %v5707_v48 = vmul.f32 %v8383_v45, %v5659_v1  ;;  %v5521_v36 = vmul.f32 0.020408163, %v11412_v38  ;;  %v5762_v38 = vld [vmem:[%s12078_s3 + $0xa8] sm:$0xff] }
 0x5f2   :  { %6215 = vperm.xlu1 %7699, %v5845_v56   ;;  %8390 = vrsqrt.f32 %v5567_v26  ;;  %v5528_v56 = vmul.f32 0.020408163, %v11423_v50  ;;  %v5766_v26 = vld [vmem:[%s12078_s3 + $0xc8] sm:$0xff]  ;;  %v5573_v18 = vadd.f32 1e-05, %v5525_v6 }
 0x5f3   :  { %6463 = vst.msk [vmem:[%s12079_s4 + $0x10] sm:$0xff] %vm5067_vm0, %v6415_v5  ;;  %6250 = vperm.xlu0 %7698, %v5852_v24   ;;  %8392 = vrsqrt.f32 %v5574_v2  ;;  %v5755_v24 = vld [vmem:[%s12078_s3 + $0x70] sm:$0xff]  ;;  %v5569_v50 = vadd.f32 1e-05, %v5521_v36  ;;  %v5580_v2 = vadd.f32 1e-05, %v5532_v25 }
 0x5f4   :  { %v5576_v3 = vadd.f32 1e-05, %v5528_v56  ;;  %v11641_v45 = vpop.permute.xlu1 %5907  ;;  %v5527_v56 = vmul.f32 0.020408163, %v11427_v19  ;;  %v5667_v19 = vld [vmem:[%s12077_s2 + $0xb0] sm:$0xff] }
 0x5f5   :  { %8394 = vrsqrt.f32 %v5569_v50 }
 0x5f6   :  { %5937 = vperm.xlu1 %7699, %v5703_v41   ;;  %v5803_v41 = vmul.f32 %v5707_v48, %v11189_v31  ;;  %v5668_v31 = vld [vmem:[%s12077_s2 + $0xb8] sm:$0xff]  ;;  %8396 = vrsqrt.f32 %v5576_v3 }
 0x5f7   :  { %5972 = vperm.xlu0 %7698, %v5710_v13   ;;  %v8387_v5 = vpop.eup %8386  ;;  %v5810_v13 = vmul.f32 %v5714_v40, %v11222_v16  ;;  %8398 = vrsqrt.f32 %v5571_v60  ;;  %v5669_v60 = vld [vmem:[%s12077_s2 + $0xc0] sm:$0xff] }
 0x5f8   :  { %v5851_v11 = vsub.f32 %v5755_v24, %v5803_v41  ;;  %v5709_v8 = vmul.f32 %v8387_v5, %v5661_v15  ;;  %v5534_v41 = vmul.f32 0.020408163, %v11440_v63  ;;  %v12225_v5 = vld [vmem:[#allocation5_spill] sm:$0xff] }
 0x5f9   :  { %v5858_v16 = vsub.f32 %v5762_v38, %v5810_v13  ;;  %v5761_v38 = vld [vmem:[%s12078_s3 + $0xa0] sm:$0xff]  ;;  %v5768_v63 = vld [vmem:[%s12078_s3 + $0xd8] sm:$0xff] }
 0x5fa   :  { %6225 = vperm.xlu1 %7699, %v5847_v14   ;;  %v5805_v43 = vmul.f32 %v5709_v8, %v11199_v23  ;;  %v5663_v14 = vld [vmem:[%s12077_s2 + $0x90] sm:$0xff]  ;;  %v5670_v23 = vld [vmem:[%s12077_s2 + $0xc8] sm:$0xff] }
 0x5fb   :  { %6260 = vperm.xlu0 %7698, %v5854_v33   ;;  %v8389_v46 = vpop.eup %8388  ;;  %v5578_v33 = vadd.f32 1e-05, %v5530_v22  ;;  %v12226_v22 = vld [vmem:[#allocation69_spill] sm:$0xff] }
 0x5fc   :  { %v5716_v51 = vmul.f32 %v8389_v46, %v5668_v31  ;;  %v8391_v27 = vpop.eup %8390 }
 0x5fd   :  { %v5711_v32 = vmul.f32 %v8391_v27, %v5663_v14  ;;  %8400 = vrsqrt.f32 %v5578_v33  ;;  %v5536_v27 = vmul.f32 0.020408163, %v11449_v10  ;;  %v5676_v10 = vld [vmem:[%s12077_s2 + $0xf8] sm:$0xff] }
 0x5fe   :  { %5947 = vperm.xlu1 %7699, %v5705_v55   ;;  %v5812_v7 = vmul.f32 %v5716_v51, %v11232_v52  ;;  %v8393_v55 = vpop.eup %8392  ;;  %8402 = vrsqrt.f32 %v5573_v18 }
 0x5ff   :  { %5982 = vperm.xlu0 %7698, %v5712_v49   ;;  %v5853_v49 = vsub.f32 %v5757_v12, %v5805_v43  ;;  %v5718_v37 = vmul.f32 %v8393_v55, %v5670_v23  ;;  %v5807_v44 = vmul.f32 %v5711_v32, %v11209_v61  ;;  %v8395_v1 = vpop.eup %8394  ;;  %v5672_v61 = vld [vmem:[%s12077_s2 + $0xd8] sm:$0xff]  ;;  %8404 = vrsqrt.f32 %v5580_v2  ;;  %v12227_v12 = vld [vmem:[#allocation48_spill] sm:$0xff] }
 0x600   :  { %v5860_v52 = vsub.f32 %v5764_v29, %v5812_v7  ;;  %v8397_v62 = vpop.eup %8396  ;;  %v5529_v43 = vmul.f32 0.020408163, %v12226_v22  ;;  %v5763_v55 = vld [vmem:[%s12078_s3 + $0xb0] sm:$0xff] }
 0x601   :  { %v5814_v21 = vmul.f32 %v5718_v37, %v11242_v20  ;;  %v5913_v20 = vpop.permute.xlu1 %5912  ;;  %v5720_v36 = vmul.f32 %v8397_v62, %v5672_v61  ;;  %v8399_v15 = vpop.eup %8398  ;;  %v12228_v29 = vld [vmem:[#allocation52_spill] sm:$0xff]  ;;  %v12231_v61 = vld [vmem:[#allocation49_spill] sm:$0xff] }
 0x602   :  { %6235 = vperm.xlu1 %7699, %v5849_v4   ;;  %v5855_v4 = vsub.f32 %v5759_v30, %v5807_v44  ;;  %v6130_v24 = vmul.f32 %v12225_v5, %v5913_v20  ;;  %v12229_v30 = vld [vmem:[#allocation70_spill] sm:$0xff]  ;;  %v12230_v62 = vld [vmem:[#allocation4_spill] sm:$0xff] }
 0x603   :  { %6270 = vperm.xlu0 %7698, %v5856_v54   ;;  %v5816_v31 = vmul.f32 %v5720_v36, %v11252_v47  ;;  %v12232_v20 = vld [vmem:[#allocation54_spill] sm:$0xff] }
 0x606   :  { %5957 = vperm.xlu1 %7699, %v5707_v48   ;;  %v5713_v48 = vmul.f32 %v8395_v1, %v5665_v59  ;;  %v5538_v59 = vmul.f32 0.020408163, %v11454_v57  ;;  %v5772_v57 = vld [vmem:[%s12078_s3 + $0xf8] sm:$0xff] }
 0x607   :  { %5992 = vperm.xlu0 %7698, %v5714_v40   ;;  %v5862_v40 = vsub.f32 %v5766_v26, %v5814_v21  ;;  %v8401_v50 = vpop.eup %8400  ;;  %v5531_v21 = vmul.f32 0.020408163, %v12229_v30  ;;  %v6129_v26 = vmul.f32 %v12230_v62, %v11641_v45  ;;  %v5678_v45 = vld [vmem:[%s12077_s2 + $0x108] sm:$0xff] }
 0x608   :  { %v5809_v13 = vmul.f32 %v5713_v48, %v11219_v42  ;;  %v5674_v42 = vld [vmem:[%s12077_s2 + $0xe8] sm:$0xff]  ;;  %v8403_v14 = vpop.eup %8402 }
 0x609   :  { %v5722_v35 = vmul.f32 %v8401_v50, %v5674_v42  ;;  %v8405_v33 = vpop.eup %8404  ;;  %v5717_v6 = vmul.f32 %v8403_v14, %v5669_v60  ;;  %v5579_v5 = vadd.f32 1e-05, %v5531_v21  ;;  %v12233_v50 = vld [vmem:[#allocation50_spill] sm:$0xff]  ;;  %v5767_v42 = vld [vmem:[%s12078_s3 + $0xd0] sm:$0xff] }
 0x60a   :  { %6245 = vperm.xlu1 %7699, %v5851_v11   ;;  %v5575_v11 = vadd.f32 1e-05, %v5527_v56  ;;  %v5857_v47 = vsub.f32 %v5761_v38, %v5809_v13  ;;  %v5724_v1 = vmul.f32 %v8405_v33, %v5676_v10  ;;  %v12238_v10 = vld [vmem:[#allocation58_spill] sm:$0xff] }
 0x60b   :  { %6280 = vperm.xlu0 %7698, %v5858_v16   ;;  %v5715_v16 = vmul.f32 %v8399_v15, %v5667_v19  ;;  %v5818_v23 = vmul.f32 %v5722_v35, %v12228_v29  ;;  %v5813_v18 = vmul.f32 %v5717_v6, %v12231_v61  ;;  %v5540_v19 = vmul.f32 0.020408163, %v11458_v9  ;;  %v5680_v9 = vld [vmem:[%s12077_s2 + $0x118] sm:$0xff]  ;;  %v12239_v61 = vld [vmem:[#allocation72_spill] sm:$0xff] }
 0x60c   :  { %8406 = vrsqrt.f32 %v5575_v11  ;;  %v12234_v11 = vld [vmem:[#allocation56_spill] sm:$0xff] }
 0x60d   :  { %v5811_v7 = vmul.f32 %v5715_v16, %v12227_v12 }
 0x60e   :  { %5967 = vperm.xlu1 %7699, %v5709_v8   ;;  %v5582_v8 = vadd.f32 1e-05, %v5534_v41 }
 0x60f   :  { %6002 = vperm.xlu0 %7698, %v5716_v51   ;;  %v5864_v51 = vsub.f32 %v5768_v63, %v5816_v31  ;;  %v5533_v31 = vmul.f32 0.020408163, %v11446_v53  ;;  %v5774_v53 = vld [vmem:[%s12078_s3 + $0x108] sm:$0xff] }
 0x610   :  { %8408 = vrsqrt.f32 %v5582_v8 }
 0x612   :  { %6255 = vperm.xlu1 %7699, %v5853_v49   ;;  %v5770_v49 = vld [vmem:[%s12078_s3 + $0xe8] sm:$0xff] }
 0x613   :  { %6290 = vperm.xlu0 %7698, %v5860_v52   ;;  %v5584_v52 = vadd.f32 1e-05, %v5536_v27  ;;  %v5866_v44 = vsub.f32 %v5770_v49, %v5818_v23  ;;  %v12237_v23 = vld [vmem:[#allocation51_spill] sm:$0xff]  ;;  %v5769_v49 = vld [vmem:[%s12078_s3 + $0xe0] sm:$0xff] }
 0x615   :  { %v11658_v54 = vpop.xlane.xlu0 %5490 }
 0x616   :  { %5977 = vperm.xlu1 %7699, %v5711_v32   ;;  %v5577_v32 = vadd.f32 1e-05, %v5529_v43  ;;  %v8407_v2 = vpop.eup %8406 }
 0x617   :  { %6012 = vperm.xlu0 %7698, %v5718_v37   ;;  %v5859_v37 = vsub.f32 %v5763_v55, %v5811_v7  ;;  %v12235_v7 = vld [vmem:[#allocation71_spill] sm:$0xff] }
 0x618   :  { %8410 = vrsqrt.f32 %v5577_v32  ;;  %v5535_v14 = vmul.f32 0.020408163, %v12235_v7  ;;  %v12236_v55 = vld [vmem:[#allocation75_spill] sm:$0xff] }
 0x619   :  { %8412 = vrsqrt.f32 %v5584_v52  ;;  %v5542_v29 = vmul.f32 0.020408163, %v12236_v55  ;;  %v5675_v52 = vld [vmem:[%s12077_s2 + $0xf0] sm:$0xff] }
 0x61a   :  { %6265 = vperm.xlu1 %7699, %v5855_v4   ;;  %v8409_v56 = vpop.eup %8408  ;;  %8414 = vrsqrt.f32 %v5579_v5 }
 0x61b   :  { %6300 = vperm.xlu0 %7698, %v5862_v40   ;;  %v5820_v40 = vmul.f32 %v5724_v1, %v12232_v20  ;;  %v5726_v38 = vmul.f32 %v8409_v56, %v5678_v45  ;;  %v5590_v30 = vadd.f32 1e-05, %v5542_v29  ;;  %v5778_v45 = vld [vmem:[%s12078_s3 + $0x128] sm:$0xff] }
 0x61d   :  { %v6201_v46 = vpop.permute.xlu0 %6200  ;;  %v5822_v8 = vmul.f32 %v5726_v38, %v12234_v11 }
 0x61e   :  { %v6418_v3 = vadd.f32 %v6201_v46, %v6130_v24  ;;  %5987 = vperm.xlu1 %7699, %v5713_v48   ;;  %v5765_v48 = vld [vmem:[%s12078_s3 + $0xc0] sm:$0xff]  ;;  %v5586_v24 = vadd.f32 1e-05, %v5538_v59  ;;  %v5868_v46 = vsub.f32 %v5772_v57, %v5820_v40  ;;  %v5771_v40 = vld [vmem:[%s12078_s3 + $0xf0] sm:$0xff] }
 0x61f   :  { %6022 = vperm.xlu0 %7698, %v5720_v36   ;;  %v5671_v36 = vld [vmem:[%s12077_s2 + $0xd0] sm:$0xff]  ;;  %v5861_v13 = vsub.f32 %v5765_v48, %v5813_v18  ;;  %v5870_v27 = vsub.f32 %v5774_v53, %v5822_v8  ;;  %v5537_v18 = vmul.f32 0.020408163, %v12239_v61  ;;  %v5773_v8 = vld [vmem:[%s12078_s3 + $0x100] sm:$0xff] }
 0x620   :  { %6466 = vst.msk [vmem:[%s12079_s4 + $0x28] sm:$0xff] %vm5067_vm0, %v6418_v3  ;;  %v5719_v15 = vmul.f32 %v8407_v2, %v5671_v36  ;;  %8416 = vrsqrt.f32 %v5586_v24  ;;  %v5544_v2 = vmul.f32 0.020408163, %v11555_v58  ;;  %v12241_v36 = vld [vmem:[#allocation60_spill] sm:$0xff]  ;;  %v5684_v58 = vld [vmem:[%s12077_s2 + $0x138] sm:$0xff] }
 0x621   :  { %v5585_v5 = vadd.f32 1e-05, %v5537_v18  ;;  %v5679_v53 = vld [vmem:[%s12077_s2 + $0x110] sm:$0xff] }
 0x622   :  { %6275 = vperm.xlu1 %7699, %v5857_v47   ;;  %v5815_v3 = vmul.f32 %v5719_v15, %v12233_v50  ;;  %v8411_v63 = vpop.eup %8410  ;;  %v5673_v47 = vld [vmem:[%s12077_s2 + $0xe0] sm:$0xff]  ;;  %v5592_v24 = vadd.f32 1e-05, %v5544_v2 }
 0x623   :  { %6310 = vperm.xlu0 %7698, %v5864_v51   ;;  %v5581_v51 = vadd.f32 1e-05, %v5533_v31  ;;  %v5721_v43 = vmul.f32 %v8411_v63, %v5673_v47  ;;  %v12243_v63 = vld [vmem:[#allocation55_spill] sm:$0xff]  ;;  %v12244_v47 = vld [vmem:[#allocation62_spill] sm:$0xff] }
 0x624   :  { %v5863_v22 = vsub.f32 %v5767_v42, %v5815_v3 }
 0x625   :  { %8418 = vrsqrt.f32 %v5581_v51  ;;  %v5817_v60 = vmul.f32 %v5721_v43, %v12237_v23 }
 0x626   :  { %5997 = vperm.xlu1 %7699, %v5715_v16   ;;  %v8413_v16 = vpop.eup %8412 }
 0x627   :  { %6032 = vperm.xlu0 %7698, %v5722_v35   ;;  %v5588_v35 = vadd.f32 1e-05, %v5540_v19  ;;  %v5728_v12 = vmul.f32 %v8413_v16, %v5680_v9  ;;  %v8415_v33 = vpop.eup %8414  ;;  %v5865_v21 = vsub.f32 %v5769_v49, %v5817_v60  ;;  %v12242_v19 = vld [vmem:[#allocation73_spill] sm:$0xff] }
 0x628   :  { %v5723_v59 = vmul.f32 %v8415_v33, %v5675_v52  ;;  %v5539_v50 = vmul.f32 0.020408163, %v12242_v19  ;;  %v12246_v33 = vld [vmem:[#allocation74_spill] sm:$0xff]  ;;  %v5690_v19 = vld [vmem:[%s12077_s2 + $0x168] sm:$0xff] }
 0x629   :  { %v11697_v25 = vpop.xlane.xlu1 %5493  ;;  %8420 = vrsqrt.f32 %v5588_v35  ;;  %v5824_v32 = vmul.f32 %v5728_v12, %v12238_v10  ;;  %v5541_v49 = vmul.f32 0.020408163, %v12246_v33 }
 0x62a   :  { %6285 = vperm.xlu1 %7699, %v5859_v37   ;;  %v8417_v37 = vpop.eup %8416  ;;  %v5546_v3 = vmul.f32 0.020408163, %v11697_v25  ;;  %v5780_v25 = vld [vmem:[%s12078_s3 + $0x138] sm:$0xff] }
 0x62b   :  { %6320 = vperm.xlu0 %7698, %v5866_v44   ;;  %v5682_v44 = vld [vmem:[%s12077_s2 + $0x128] sm:$0xff]  ;;  %v5589_v61 = vadd.f32 1e-05, %v5541_v49  ;;  %v12255_v49 = vld [vmem:[#allocation6_spill] sm:$0xff] }
 0x62d   :  { %v6196_v4 = vpop.permute.xlu1 %6195 }
 0x62e   :  { %v6417_v41 = vadd.f32 %v6196_v4, %v6129_v26  ;;  %6007 = vperm.xlu1 %7699, %v5717_v6   ;;  %v5776_v6 = vld [vmem:[%s12078_s3 + $0x118] sm:$0xff]  ;;  %v5730_v26 = vmul.f32 %v8417_v37, %v5682_v44  ;;  %v12248_v44 = vld [vmem:[#allocation64_spill] sm:$0xff] }
 0x62f   :  { %6042 = vperm.xlu0 %7698, %v5724_v1   ;;  %v5583_v1 = vadd.f32 1e-05, %v5535_v14  ;;  %v5872_v62 = vsub.f32 %v5776_v6, %v5824_v32  ;;  %v12240_v4 = vld [vmem:[#allocation53_spill] sm:$0xff]  ;;  %v8419_v20 = vpop.eup %8418  ;;  %v12245_v14 = vld [vmem:[#allocation7_spill] sm:$0xff]  ;;  %v5775_v6 = vld [vmem:[%s12078_s3 + $0x110] sm:$0xff] }
 0x630   :  { %6465 = vst.msk [vmem:[%s12079_s4 + $0x20] sm:$0xff] %vm5067_vm0, %v6417_v41  ;;  %v5819_v48 = vmul.f32 %v5723_v59, %v12240_v4  ;;  %v5826_v56 = vmul.f32 %v5730_v26, %v12241_v36  ;;  %v5677_v41 = vld [vmem:[%s12077_s2 + $0x100] sm:$0xff]  ;;  %v12247_v32 = vld [vmem:[#allocation57_spill] sm:$0xff] }
 0x631   :  { %8422 = vrsqrt.f32 %v5583_v1  ;;  %v12249_v4 = vld [vmem:[#allocation9_spill] sm:$0xff] }
 0x632   :  { %6295 = vperm.xlu1 %7699, %v5861_v13   ;;  %8424 = vrsqrt.f32 %v5590_v30  ;;  %v11769_v13 = vpop.permute.xlu1 %5917  ;;  %v5681_v30 = vld [vmem:[%s12077_s2 + $0x120] sm:$0xff] }
 0x633   :  { %6330 = vperm.xlu0 %7698, %v5868_v46   ;;  %v8421_v57 = vpop.eup %8420  ;;  %v5725_v46 = vmul.f32 %v8419_v20, %v5677_v41  ;;  %8426 = vrsqrt.f32 %v5585_v5  ;;  %v5777_v5 = vld [vmem:[%s12078_s3 + $0x120] sm:$0xff] }
 0x634   :  { %v5732_v31 = vmul.f32 %v8421_v57, %v5684_v58  ;;  %8428 = vrsqrt.f32 %v5592_v24  ;;  %v12250_v57 = vld [vmem:[#allocation59_spill] sm:$0xff]  ;;  %v12251_v24 = vld [vmem:[#allocation66_spill] sm:$0xff] }
 0x635   :  { %v5821_v42 = vmul.f32 %v5725_v46, %v12243_v63 }
 0x636   :  { %6017 = vperm.xlu1 %7699, %v5719_v15   ;;  %v5867_v15 = vsub.f32 %v5771_v40, %v5819_v48  ;;  %v5828_v16 = vmul.f32 %v5732_v31, %v12244_v47  ;;  %v5923_v51 = vpop.permute.xlu1 %5922 }
 0x637   :  { %6052 = vperm.xlu0 %7698, %v5726_v38   ;;  %v5874_v38 = vsub.f32 %v5778_v45, %v5826_v56  ;;  %v6132_v55 = vmul.f32 %v12245_v14, %v5923_v51  ;;  %v5543_v56 = vmul.f32 0.020408163, %v11531_v17  ;;  %v5683_v17 = vld [vmem:[%s12077_s2 + $0x130] sm:$0xff]  ;;  %v12253_v51 = vld [vmem:[#allocation61_spill] sm:$0xff] }
 0x638   :  { %v5876_v29 = vsub.f32 %v5780_v25, %v5828_v16  ;;  %v5545_v16 = vmul.f32 0.020408163, %v11658_v54  ;;  %v5685_v54 = vld [vmem:[%s12077_s2 + $0x140] sm:$0xff] }
 0x63a   :  { %6305 = vperm.xlu1 %7699, %v5863_v22   ;;  %v5686_v22 = vld [vmem:[%s12077_s2 + $0x148] sm:$0xff] }
 0x63b   :  { %6340 = vperm.xlu0 %7698, %v5870_v27   ;;  %v8423_v11 = vpop.eup %8422  ;;  %v5594_v27 = vadd.f32 1e-05, %v5546_v3 }
 0x63c   :  { %v8425_v9 = vpop.eup %8424  ;;  %v5727_v7 = vmul.f32 %v8423_v11, %v5679_v53 }
 0x63d   :  { %v5734_v23 = vmul.f32 %v8425_v9, %v5686_v22  ;;  %v8427_v37 = vpop.eup %8426 }
 0x63e   :  { %6027 = vperm.xlu1 %7699, %v5721_v43   ;;  %v5587_v43 = vadd.f32 1e-05, %v5539_v50  ;;  %v5823_v52 = vmul.f32 %v5727_v7, %v12247_v32  ;;  %v5729_v2 = vmul.f32 %v8427_v37, %v5681_v30  ;;  %v5591_v50 = vadd.f32 1e-05, %v5543_v56  ;;  %v12256_v32 = vld [vmem:[#allocation13_spill] sm:$0xff]  ;;  %v12259_v56 = vld [vmem:[#allocation8_spill] sm:$0xff] }
 0x63f   :  { %6062 = vperm.xlu0 %7698, %v5728_v12   ;;  %v5869_v12 = vsub.f32 %v5773_v8, %v5821_v42  ;;  %v5830_v1 = vmul.f32 %v5734_v23, %v12248_v44  ;;  %v12252_v42 = vld [vmem:[#allocation11_spill] sm:$0xff] }
 0x640   :  { %8430 = vrsqrt.f32 %v5587_v43  ;;  %v5871_v18 = vsub.f32 %v5775_v6, %v5823_v52  ;;  %v5825_v45 = vmul.f32 %v5729_v2, %v12250_v57  ;;  %v5779_v43 = vld [vmem:[%s12078_s3 + $0x130] sm:$0xff] }
 0x641   :  { %8432 = vrsqrt.f32 %v5594_v27  ;;  %v12254_v27 = vld [vmem:[#allocation68_spill] sm:$0xff] }
 0x642   :  { %6315 = vperm.xlu1 %7699, %v5865_v21   ;;  %v8429_v21 = vpop.eup %8428  ;;  %8434 = vrsqrt.f32 %v5589_v61  ;;  %v5873_v3 = vsub.f32 %v5777_v5, %v5825_v45 }
 0x643   :  { %6350 = vperm.xlu0 %7698, %v5872_v62   ;;  %v5782_v62 = vld [vmem:[%s12078_s3 + $0x148] sm:$0xff]  ;;  %8436 = vrsqrt.f32 %v5591_v50 }
 0x644   :  { %v5878_v20 = vsub.f32 %v5782_v62, %v5830_v1  ;;  %v12257_v62 = vld [vmem:[#allocation63_spill] sm:$0xff] }
 0x646   :  { %6037 = vperm.xlu1 %7699, %v5723_v59  }
 0x647   :  { %6072 = vperm.xlu0 %7698, %v5730_v26   ;;  %v5688_v26 = vld [vmem:[%s12077_s2 + $0x158] sm:$0xff] }
 0x648   :  { %v5736_v40 = vmul.f32 %v8429_v21, %v5688_v26 }
 0x64a   :  { %6325 = vperm.xlu1 %7699, %v5867_v15   ;;  %v11781_v35 = vpop.xlane.xlu0 %5496  ;;  %v8431_v58 = vpop.eup %8430  ;;  %v5832_v15 = vmul.f32 %v5736_v40, %v12251_v24  ;;  %v5692_v24 = vld [vmem:[%s12077_s2 + $0x178] sm:$0xff] }
 0x64b   :  { %6360 = vperm.xlu0 %7698, %v5874_v38   ;;  %v5731_v63 = vmul.f32 %v8431_v58, %v5683_v17  ;;  %v5547_v30 = vmul.f32 0.020408163, %v11781_v35  ;;  %v5687_v35 = vld [vmem:[%s12077_s2 + $0x150] sm:$0xff]  ;;  %v12260_v17 = vld [vmem:[#allocation65_spill] sm:$0xff] }
 0x64d   :  { %v5827_v25 = vmul.f32 %v5731_v63, %v12253_v51 }
 0x64e   :  { %6047 = vperm.xlu1 %7699, %v5725_v46   ;;  %v8433_v46 = vpop.eup %8432 }
 0x64f   :  { %6082 = vperm.xlu0 %7698, %v5732_v31   ;;  %v5784_v31 = vld [vmem:[%s12078_s3 + $0x158] sm:$0xff]  ;;  %v5738_v47 = vmul.f32 %v8433_v46, %v5690_v19  ;;  %v8435_v22 = vpop.eup %8434  ;;  %v5689_v19 = vld [vmem:[%s12077_s2 + $0x160] sm:$0xff] }
 0x650   :  { %v5880_v8 = vsub.f32 %v5784_v31, %v5832_v15  ;;  %v5733_v33 = vmul.f32 %v8435_v22, %v5685_v54  ;;  %v8437_v61 = vpop.eup %8436  ;;  %v5783_v31 = vld [vmem:[%s12078_s3 + $0x150] sm:$0xff]  ;;  %v12263_v54 = vld [vmem:[#allocation67_spill] sm:$0xff] }
 0x652   :  { %v6211_v60 = vpop.permute.xlu0 %6210  ;;  %6335 = vperm.xlu1 %7699, %v5869_v12   ;;  %v5834_v12 = vmul.f32 %v5738_v47, %v12254_v27  ;;  %v5829_v26 = vmul.f32 %v5733_v33, %v12257_v62 }
 0x653   :  { %v6420_v10 = vadd.f32 %v6211_v60, %v6132_v55  ;;  %6370 = vperm.xlu0 %7698, %v5876_v29   ;;  %v5786_v29 = vld [vmem:[%s12078_s3 + $0x168] sm:$0xff]  ;;  %v5875_v60 = vsub.f32 %v5779_v43, %v5827_v25 }
 0x654   :  { %v5882_v6 = vsub.f32 %v5786_v29, %v5834_v12 }
 0x655   :  { %6468 = vst.msk [vmem:[%s12079_s4 + $0x38] sm:$0xff] %vm5067_vm0, %v6420_v10  ;;  %v6131_v10 = vmul.f32 %v12255_v49, %v11769_v13  ;;  %v5781_v13 = vld [vmem:[%s12078_s3 + $0x140] sm:$0xff]  ;;  %v12264_v49 = vld [vmem:[#allocation19_spill] sm:$0xff] }
 0x656   :  { %v5933_v59 = vpop.permute.xlu0 %5932  ;;  %6057 = vperm.xlu1 %7699, %v5727_v7   ;;  %v5593_v7 = vadd.f32 1e-05, %v5545_v16  ;;  %v12261_v16 = vld [vmem:[#allocation17_spill] sm:$0xff] }
 0x657   :  { %6092 = vperm.xlu0 %7698, %v5734_v23   ;;  %v6134_v48 = vmul.f32 %v12249_v4, %v5933_v59  ;;  %v5595_v4 = vadd.f32 1e-05, %v5547_v30 }
 0x658   :  { %8438 = vrsqrt.f32 %v5593_v7 }
 0x65a   :  { %v6221_v36 = vpop.permute.xlu0 %6220  ;;  %6345 = vperm.xlu1 %7699, %v5871_v18  }
 0x65b   :  { %v6422_v41 = vadd.f32 %v6221_v36, %v6134_v48  ;;  %6380 = vperm.xlu0 %7698, %v5878_v20   ;;  %v5877_v48 = vsub.f32 %v5781_v13, %v5829_v26  ;;  %v5735_v20 = vmul.f32 %v8437_v61, %v5687_v35  ;;  %v12266_v61 = vld [vmem:[#allocation21_spill] sm:$0xff]  ;;  %v12267_v13 = vld [vmem:[#allocation14_spill] sm:$0xff] }
 0x65d   :  { %6470 = vst.msk [vmem:[%s12079_s4 + $0x48] sm:$0xff] %vm5067_vm0, %v6422_v41  ;;  %v5831_v46 = vmul.f32 %v5735_v20, %v12260_v17 }
 0x65e   :  { %v5943_v38 = vpop.permute.xlu0 %5942  ;;  %6067 = vperm.xlu1 %7699, %v5729_v2  }
 0x65f   :  { %6102 = vperm.xlu0 %7698, %v5736_v40   ;;  %v6136_v11 = vmul.f32 %v12252_v42, %v5943_v38  ;;  %v12258_v40 = vld [vmem:[#allocation15_spill] sm:$0xff]  ;;  %v5788_v42 = vld [vmem:[%s12078_s3 + $0x178] sm:$0xff] }
 0x662   :  { %v6231_v53 = vpop.permute.xlu0 %6230  ;;  %6355 = vperm.xlu1 %7699, %v5873_v3   ;;  %v8439_v15 = vpop.eup %8438 }
 0x663   :  { %v6424_v9 = vadd.f32 %v6231_v53, %v6136_v11  ;;  %6390 = vperm.xlu0 %7698, %v5880_v8   ;;  %v5879_v11 = vsub.f32 %v5783_v31, %v5831_v46  ;;  %v12270_v46 = vld [vmem:[#allocation25_spill] sm:$0xff]  ;;  %v12271_v31 = vld [vmem:[#allocation18_spill] sm:$0xff] }
 0x665   :  { %6472 = vst.msk [vmem:[%s12079_s4 + $0x58] sm:$0xff] %vm5067_vm0, %v6424_v9  ;;  %v12262_v9 = vld [vmem:[#allocation10_spill] sm:$0xff] }
 0x666   :  { %v5953_v14 = vpop.permute.xlu0 %5952  ;;  %6077 = vperm.xlu1 %7699, %v5731_v63   ;;  %v5500_v55 = vpop.xlane.xlu1 %5499 }
 0x667   :  { %v5548_v23 = vmul.f32 0.020408163, %v5500_v55  ;;  %6112 = vperm.xlu0 %7698, %v5738_v47   ;;  %v6138_v52 = vmul.f32 %v12256_v32, %v5953_v14  ;;  %v5737_v47 = vmul.f32 %v8439_v15, %v5689_v19  ;;  %v5691_v55 = vld [vmem:[%s12077_s2 + $0x170] sm:$0xff] }
 0x668   :  { %v12265_v32 = vld [vmem:[#allocation12_spill] sm:$0xff] }
 0x669   :  { %v5596_v37 = vadd.f32 1e-05, %v5548_v23  ;;  %v5833_v7 = vmul.f32 %v5737_v47, %v12263_v54  ;;  %v12274_v54 = vld [vmem:[#allocation29_spill] sm:$0xff] }
 0x66a   :  { %v6241_v44 = vpop.permute.xlu0 %6240  ;;  %6365 = vperm.xlu1 %7699, %v5875_v60   ;;  %v6206_v1 = vpop.permute.xlu1 %6205 }
 0x66b   :  { %8440 = vrsqrt.f32 %v5596_v37  ;;  %v6426_v21 = vadd.f32 %v6241_v44, %v6138_v52  ;;  %v6419_v59 = vadd.f32 %v6206_v1, %v6131_v10  ;;  %6400 = vperm.xlu0 %7698, %v5882_v6  }
 0x66c   :  { %8442 = vrsqrt.f32 %v5595_v4 }
 0x66d   :  { %6474 = vst.msk [vmem:[%s12079_s4 + $0x68] sm:$0xff] %vm5067_vm0, %v6426_v21  ;;  %6467 = vst.msk [vmem:[%s12079_s4 + $0x30] sm:$0xff] %vm5067_vm0, %v6419_v59  ;;  %v5787_v21 = vld [vmem:[%s12078_s3 + $0x170] sm:$0xff] }
 0x66e   :  { %v5963_v18 = vpop.permute.xlu0 %5962  ;;  %6087 = vperm.xlu1 %7699, %v5733_v33   ;;  %v5928_v2 = vpop.permute.xlu1 %5927 }
 0x66f   :  { %v6140_v36 = vmul.f32 %v12258_v40, %v5963_v18  ;;  %v6133_v41 = vmul.f32 %v12259_v56, %v5928_v2 }
 0x672   :  { %v6251_v57 = vpop.permute.xlu0 %6250  ;;  %6375 = vperm.xlu1 %7699, %v5877_v48   ;;  %v6216_v45 = vpop.permute.xlu1 %6215 }
 0x673   :  { %v6428_v58 = vadd.f32 %v6251_v57, %v6140_v36  ;;  %v6421_v5 = vadd.f32 %v6216_v45, %v6133_v41  ;;  %v12268_v36 = vld [vmem:[#allocation23_spill] sm:$0xff]  ;;  %v12269_v41 = vld [vmem:[#allocation16_spill] sm:$0xff] }
 0x675   :  { %v8441_v38 = vpop.eup %8440  ;;  %6476 = vst.msk [vmem:[%s12079_s4 + $0x78] sm:$0xff] %vm5067_vm0, %v6428_v58  ;;  %6469 = vst.msk [vmem:[%s12079_s4 + $0x40] sm:$0xff] %vm5067_vm0, %v6421_v5 }
 0x676   :  { %v5973_v50 = vpop.permute.xlu0 %5972  ;;  %6097 = vperm.xlu1 %7699, %v5735_v20   ;;  %v5938_v3 = vpop.permute.xlu1 %5937  ;;  %v5740_v63 = vmul.f32 %v8441_v38, %v5692_v24 }
 0x677   :  { %v6142_v53 = vmul.f32 %v12261_v16, %v5973_v50  ;;  %v6135_v51 = vmul.f32 %v12262_v9, %v5938_v3  ;;  %v8443_v14 = vpop.eup %8442 }
 0x678   :  { %6122 = vperm.xlu0 %7698, %v5740_v63   ;;  %v5836_v8 = vmul.f32 %v5740_v63, %v11498_v0  ;;  %v5785_v0 = vld [vmem:[%s12078_s3 + $0x160] sm:$0xff]  ;;  %v5739_v33 = vmul.f32 %v8443_v14, %v5691_v55 }
 0x679   :  { %v5881_v60 = vsub.f32 %v5785_v0, %v5833_v7  ;;  %v12275_v14 = vld [vmem:[#allocation22_spill] sm:$0xff] }
 0x67a   :  { %v6261_v25 = vpop.permute.xlu0 %6260  ;;  %6385 = vperm.xlu1 %7699, %v5879_v11   ;;  %v6226_v22 = vpop.permute.xlu1 %6225  ;;  %v5884_v43 = vsub.f32 %v5788_v42, %v5836_v8  ;;  %v5835_v30 = vmul.f32 %v5739_v33, %v11476_v34 }
 0x67b   :  { %v6430_v27 = vadd.f32 %v6261_v25, %v6142_v53  ;;  %v6423_v12 = vadd.f32 %v6226_v22, %v6135_v51  ;;  %v12273_v53 = vld [vmem:[#allocation20_spill] sm:$0xff] }
 0x67c   :  { %6410 = vperm.xlu0 %7698, %v5884_v43   ;;  %v5883_v26 = vsub.f32 %v5787_v21, %v5835_v30 }
 0x67d   :  { %6478 = vst.msk [vmem:[%s12079_s4 + $0x88] sm:$0xff] %vm5067_vm0, %v6430_v27  ;;  %6471 = vst.msk [vmem:[%s12079_s4 + $0x50] sm:$0xff] %vm5067_vm0, %v6423_v12 }
 0x67e   :  { %v5983_v29 = vpop.permute.xlu0 %5982  ;;  %6107 = vperm.xlu1 %7699, %v5737_v47   ;;  %v5948_v23 = vpop.permute.xlu1 %5947  ;;  %v12272_v47 = vld [vmem:[#allocation27_spill] sm:$0xff] }
 0x67f   :  { %v6144_v10 = vmul.f32 %v12264_v49, %v5983_v29  ;;  %v6137_v52 = vmul.f32 %v12265_v32, %v5948_v23 }
 0x682   :  { %v6271_v37 = vpop.permute.xlu0 %6270  ;;  %6395 = vperm.xlu1 %7699, %v5881_v60   ;;  %v6236_v6 = vpop.permute.xlu1 %6235 }
 0x683   :  { %v6432_v44 = vadd.f32 %v6271_v37, %v6144_v10  ;;  %v6425_v1 = vadd.f32 %v6236_v6, %v6137_v52  ;;  %v12276_v10 = vld [vmem:[#allocation31_spill] sm:$0xff]  ;;  %v12277_v52 = vld [vmem:[#allocation24_spill] sm:$0xff] }
 0x685   :  { %6480 = vst.msk [vmem:[%s12079_s4 + $0x98] sm:$0xff] %vm5067_vm0, %v6432_v44  ;;  %6473 = vst.msk [vmem:[%s12079_s4 + $0x60] sm:$0xff] %vm5067_vm0, %v6425_v1 }
 0x686   :  { %v5993_v59 = vpop.permute.xlu0 %5992  ;;  %6117 = vperm.xlu1 %7699, %v5739_v33   ;;  %v5958_v62 = vpop.permute.xlu1 %5957 }
 0x687   :  { %v6146_v34 = vmul.f32 %v12266_v61, %v5993_v59  ;;  %v6139_v35 = vmul.f32 %v12267_v13, %v5958_v62  ;;  %v12278_v62 = vld [vmem:[#allocation33_spill] sm:$0xff]  ;;  %v12279_v61 = vld [vmem:[#allocation26_spill] sm:$0xff] }
 0x68a   :  { %v6281_v18 = vpop.permute.xlu0 %6280  ;;  %6405 = vperm.xlu1 %7699, %v5883_v26   ;;  %v6246_v2 = vpop.permute.xlu1 %6245 }
 0x68b   :  { %v6434_v4 = vadd.f32 %v6281_v18, %v6146_v34  ;;  %v6427_v48 = vadd.f32 %v6246_v2, %v6139_v35 }
 0x68d   :  { %6482 = vst.msk [vmem:[%s12079_s4 + $0xa8] sm:$0xff] %vm5067_vm0, %v6434_v4  ;;  %6475 = vst.msk [vmem:[%s12079_s4 + $0x70] sm:$0xff] %vm5067_vm0, %v6427_v48 }
 0x68e   :  { %v6003_v20 = vpop.permute.xlu0 %6002  ;;  %v5968_v40 = vpop.permute.xlu1 %5967 }
 0x68f   :  { %v6148_v56 = vmul.f32 %v12268_v36, %v6003_v20  ;;  %v6141_v57 = vmul.f32 %v12269_v41, %v5968_v40  ;;  %v12280_v20 = vld [vmem:[#allocation35_spill] sm:$0xff]  ;;  %v12281_v36 = vld [vmem:[#allocation28_spill] sm:$0xff] }
 0x692   :  { %v6291_v45 = vpop.permute.xlu0 %6290  ;;  %v6256_v58 = vpop.permute.xlu1 %6255 }
 0x693   :  { %v6436_v5 = vadd.f32 %v6291_v45, %v6148_v56  ;;  %v6429_v24 = vadd.f32 %v6256_v58, %v6141_v57 }
 0x695   :  { %6484 = vst.msk [vmem:[%s12079_s4 + $0xb8] sm:$0xff] %vm5067_vm0, %v6436_v5  ;;  %6477 = vst.msk [vmem:[%s12079_s4 + $0x80] sm:$0xff] %vm5067_vm0, %v6429_v24 }
 0x696   :  { %v6013_v15 = vpop.permute.xlu0 %6012  ;;  %v5978_v17 = vpop.permute.xlu1 %5977 }
 0x697   :  { %v6150_v38 = vmul.f32 %v12270_v46, %v6013_v15  ;;  %v6143_v19 = vmul.f32 %v12271_v31, %v5978_v17  ;;  %v12282_v15 = vld [vmem:[#allocation37_spill] sm:$0xff]  ;;  %v12283_v46 = vld [vmem:[#allocation30_spill] sm:$0xff] }
 0x69a   :  { %v6301_v50 = vpop.permute.xlu0 %6300  ;;  %v6266_v3 = vpop.permute.xlu1 %6265 }
 0x69b   :  { %v6438_v63 = vadd.f32 %v6301_v50, %v6150_v38  ;;  %v6431_v42 = vadd.f32 %v6266_v3, %v6143_v19 }
 0x69d   :  { %6486 = vst.msk [vmem:[%s12079_s4 + $0xc8] sm:$0xff] %vm5067_vm0, %v6438_v63  ;;  %6479 = vst.msk [vmem:[%s12079_s4 + $0x90] sm:$0xff] %vm5067_vm0, %v6431_v42 }
 0x69e   :  { %v6023_v11 = vpop.permute.xlu0 %6022  ;;  %v5988_v8 = vpop.permute.xlu1 %5987 }
 0x69f   :  { %v6152_v16 = vmul.f32 %v12272_v47, %v6023_v11  ;;  %v6145_v9 = vmul.f32 %v12273_v53, %v5988_v8  ;;  %v12284_v11 = vld [vmem:[#allocation39_spill] sm:$0xff]  ;;  %v12285_v47 = vld [vmem:[#allocation32_spill] sm:$0xff] }
 0x6a2   :  { %v6311_v51 = vpop.permute.xlu0 %6310  ;;  %v6276_v25 = vpop.permute.xlu1 %6275 }
 0x6a3   :  { %v6440_v22 = vadd.f32 %v6311_v51, %v6152_v16  ;;  %v6433_v43 = vadd.f32 %v6276_v25, %v6145_v9 }
 0x6a5   :  { %6488 = vst.msk [vmem:[%s12079_s4 + $0xd8] sm:$0xff] %vm5067_vm0, %v6440_v22  ;;  %6481 = vst.msk [vmem:[%s12079_s4 + $0xa0] sm:$0xff] %vm5067_vm0, %v6433_v43 }
 0x6a6   :  { %v6033_v27 = vpop.permute.xlu0 %6032  ;;  %v5998_v12 = vpop.permute.xlu1 %5997 }
 0x6a7   :  { %v6154_v7 = vmul.f32 %v12274_v54, %v6033_v27  ;;  %v6147_v0 = vmul.f32 %v12275_v14, %v5998_v12  ;;  %v12286_v27 = vld [vmem:[#allocation41_spill] sm:$0xff]  ;;  %v12287_v54 = vld [vmem:[#allocation34_spill] sm:$0xff] }
 0x6aa   :  { %v6321_v55 = vpop.permute.xlu0 %6320  ;;  %v6286_v29 = vpop.permute.xlu1 %6285 }
 0x6ab   :  { %v6442_v23 = vadd.f32 %v6321_v55, %v6154_v7  ;;  %v6435_v60 = vadd.f32 %v6286_v29, %v6147_v0 }
 0x6ad   :  { %6490 = vst.msk [vmem:[%s12079_s4 + $0xe8] sm:$0xff] %vm5067_vm0, %v6442_v23  ;;  %6483 = vst.msk [vmem:[%s12079_s4 + $0xb0] sm:$0xff] %vm5067_vm0, %v6435_v60 }
 0x6ae   :  { %v6043_v33 = vpop.permute.xlu0 %6042  ;;  %v6008_v49 = vpop.permute.xlu1 %6007 }
 0x6af   :  { %v6156_v32 = vmul.f32 %v12276_v10, %v6043_v33  ;;  %v6149_v37 = vmul.f32 %v12277_v52, %v6008_v49  ;;  %v12288_v33 = vld [vmem:[#allocation44_spill] sm:$0xff] }
 0x6b0   :  { %v12289_v10 = vld [vmem:[#allocation36_spill] sm:$0xff] }
 0x6b2   :  { %v6331_v6 = vpop.permute.xlu0 %6330  ;;  %v6296_v44 = vpop.permute.xlu1 %6295 }
 0x6b3   :  { %v6444_v1 = vadd.f32 %v6331_v6, %v6156_v32  ;;  %v6437_v30 = vadd.f32 %v6296_v44, %v6149_v37 }
 0x6b5   :  { %6492 = vst.msk [vmem:[%s12079_s4 + $0xf8] sm:$0xff] %vm5067_vm0, %v6444_v1  ;;  %6485 = vst.msk [vmem:[%s12079_s4 + $0xc0] sm:$0xff] %vm5067_vm0, %v6437_v30 }
 0x6b6   :  { %v6053_v21 = vpop.permute.xlu0 %6052  ;;  %v6018_v59 = vpop.permute.xlu1 %6017 }
 0x6b7   :  { %v6158_v26 = vmul.f32 %v12278_v62, %v6053_v21  ;;  %v6151_v34 = vmul.f32 %v12279_v61, %v6018_v59  ;;  %v12290_v21 = vld [vmem:[#allocation47_spill] sm:$0xff]  ;;  %v12291_v62 = vld [vmem:[#allocation38_spill] sm:$0xff] }
 0x6ba   :  { %v6341_v13 = vpop.permute.xlu0 %6340  ;;  %v6306_v35 = vpop.permute.xlu1 %6305 }
 0x6bb   :  { %v6446_v18 = vadd.f32 %v6341_v13, %v6158_v26  ;;  %v6439_v2 = vadd.f32 %v6306_v35, %v6151_v34 }
 0x6bd   :  { %6494 = vst.msk [vmem:[%s12079_s4 + $0x108] sm:$0xff] %vm5067_vm0, %v6446_v18  ;;  %6487 = vst.msk [vmem:[%s12079_s4 + $0xd0] sm:$0xff] %vm5067_vm0, %v6439_v2  ;;  %v12292_v2 = vld [vmem:[#allocation40_spill] sm:$0xff] }
 0x6be   :  { %v6063_v4 = vpop.permute.xlu0 %6062  ;;  %v6028_v48 = vpop.permute.xlu1 %6027 }
 0x6bf   :  { %v6160_v40 = vmul.f32 %v12280_v20, %v6063_v4  ;;  %v6153_v56 = vmul.f32 %v12281_v36, %v6028_v48 }
 0x6c2   :  { %v6351_v41 = vpop.permute.xlu0 %6350  ;;  %v6316_v57 = vpop.permute.xlu1 %6315 }
 0x6c3   :  { %v6448_v45 = vadd.f32 %v6351_v41, %v6160_v40  ;;  %v6441_v58 = vadd.f32 %v6316_v57, %v6153_v56  ;;  %v12293_v56 = vld [vmem:[#allocation42_spill] sm:$0xff] }
 0x6c5   :  { %6496 = vst.msk [vmem:[%s12079_s4 + $0x118] sm:$0xff] %vm5067_vm0, %v6448_v45  ;;  %6489 = vst.msk [vmem:[%s12079_s4 + $0xe0] sm:$0xff] %vm5067_vm0, %v6441_v58 }
 0x6c6   :  { %v6073_v5 = vpop.permute.xlu0 %6072  ;;  %v6038_v24 = vpop.permute.xlu1 %6037 }
 0x6c7   :  { %v6162_v17 = vmul.f32 %v12282_v15, %v6073_v5  ;;  %v6155_v38 = vmul.f32 %v12283_v46, %v6038_v24 }
 0x6ca   :  { %v6361_v31 = vpop.permute.xlu0 %6360  ;;  %v6326_v19 = vpop.permute.xlu1 %6325 }
 0x6cb   :  { %v6450_v50 = vadd.f32 %v6361_v31, %v6162_v17  ;;  %v6443_v3 = vadd.f32 %v6326_v19, %v6155_v38  ;;  %v12294_v17 = vld [vmem:[#allocation45_spill] sm:$0xff] }
 0x6cd   :  { %6498 = vst.msk [vmem:[%s12079_s4 + $0x128] sm:$0xff] %vm5067_vm0, %v6450_v50  ;;  %6491 = vst.msk [vmem:[%s12079_s4 + $0xf0] sm:$0xff] %vm5067_vm0, %v6443_v3 }
 0x6ce   :  { %v6083_v63 = vpop.permute.xlu0 %6082  ;;  %v6048_v42 = vpop.permute.xlu1 %6047 }
 0x6cf   :  { %v6164_v8 = vmul.f32 %v12284_v11, %v6083_v63  ;;  %v6157_v16 = vmul.f32 %v12285_v47, %v6048_v42 }
 0x6d2   :  { %v6371_v53 = vpop.permute.xlu0 %6370  ;;  %v6336_v9 = vpop.permute.xlu1 %6335 }
 0x6d3   :  { %v6452_v51 = vadd.f32 %v6371_v53, %v6164_v8  ;;  %v6445_v25 = vadd.f32 %v6336_v9, %v6157_v16 }
 0x6d5   :  { %6500 = vst.msk [vmem:[%s12079_s4 + $0x138] sm:$0xff] %vm5067_vm0, %v6452_v51  ;;  %6493 = vst.msk [vmem:[%s12079_s4 + $0x100] sm:$0xff] %vm5067_vm0, %v6445_v25 }
 0x6d6   :  { %v6093_v22 = vpop.permute.xlu0 %6092  ;;  %v6058_v43 = vpop.permute.xlu1 %6057 }
 0x6d7   :  { %v6166_v12 = vmul.f32 %v12286_v27, %v6093_v22  ;;  %v6159_v7 = vmul.f32 %v12287_v54, %v6058_v43 }
 0x6da   :  { %v6381_v14 = vpop.permute.xlu0 %6380  ;;  %v6346_v0 = vpop.permute.xlu1 %6345 }
 0x6db   :  { %v6454_v55 = vadd.f32 %v6381_v14, %v6166_v12  ;;  %v6447_v29 = vadd.f32 %v6346_v0, %v6159_v7 }
 0x6dd   :  { %6502 = vst.msk [vmem:[%s12079_s4 + $0x148] sm:$0xff] %vm5067_vm0, %v6454_v55  ;;  %6495 = vst.msk [vmem:[%s12079_s4 + $0x110] sm:$0xff] %vm5067_vm0, %v6447_v29 }
 0x6de   :  { %v6103_v23 = vpop.permute.xlu0 %6102  ;;  %v6068_v60 = vpop.permute.xlu1 %6067 }
 0x6df   :  { %v6168_v49 = vmul.f32 %v12288_v33, %v6103_v23  ;;  %v6161_v32 = vmul.f32 %v12289_v10, %v6068_v60 }
 0x6e2   :  { %v6391_v52 = vpop.permute.xlu0 %6390  ;;  %v6356_v37 = vpop.permute.xlu1 %6355 }
 0x6e3   :  { %v6456_v6 = vadd.f32 %v6391_v52, %v6168_v49  ;;  %v6449_v44 = vadd.f32 %v6356_v37, %v6161_v32 }
 0x6e5   :  { %6504 = vst.msk [vmem:[%s12079_s4 + $0x158] sm:$0xff] %vm5067_vm0, %v6456_v6  ;;  %6497 = vst.msk [vmem:[%s12079_s4 + $0x120] sm:$0xff] %vm5067_vm0, %v6449_v44 }
 0x6e6   :  { %v6113_v1 = vpop.permute.xlu0 %6112  ;;  %v6078_v30 = vpop.permute.xlu1 %6077 }
 0x6e7   :  { %v6170_v59 = vmul.f32 %v12290_v21, %v6113_v1  ;;  %v6163_v26 = vmul.f32 %v12291_v62, %v6078_v30 }
 0x6ea   :  { %v6401_v61 = vpop.permute.xlu0 %6400  ;;  %v6366_v34 = vpop.permute.xlu1 %6365 }
 0x6eb   :  { %v6458_v13 = vadd.f32 %v6401_v61, %v6170_v59  ;;  %v6451_v35 = vadd.f32 %v6366_v34, %v6163_v26 }
 0x6ed   :  { %6506 = vst.msk [vmem:[%s12079_s4 + $0x168] sm:$0xff] %vm5067_vm0, %v6458_v13  ;;  %6499 = vst.msk [vmem:[%s12079_s4 + $0x130] sm:$0xff] %vm5067_vm0, %v6451_v35 }
 0x6ee   :  { %v6088_v18 = vpop.permute.xlu1 %6087 }
 0x6ef   :  { %v6165_v4 = vmul.f32 %v12292_v2, %v6088_v18 }
 0x6f2   :  { %v6376_v48 = vpop.permute.xlu1 %6375 }
 0x6f3   :  { %v6453_v20 = vadd.f32 %v6376_v48, %v6165_v4 }
 0x6f5   :  { %6501 = vst.msk [vmem:[%s12079_s4 + $0x140] sm:$0xff] %vm5067_vm0, %v6453_v20 }
 0x6f6   :  { %v6098_v40 = vpop.permute.xlu1 %6097 }
 0x6f7   :  { %v6123_v36 = vpop.permute.xlu0 %6122  ;;  %v6167_v41 = vmul.f32 %v12293_v56, %v6098_v40 }
 0x6f8   :  { %v6172_v57 = vmul.f32 %v11165_v28, %v6123_v36 }
 0x6fa   :  { %v6386_v45 = vpop.permute.xlu1 %6385 }
 0x6fb   :  { %v6455_v58 = vadd.f32 %v6386_v45, %v6167_v41  ;;  %v6411_v5 = vpop.permute.xlu0 %6410 }
 0x6fc   :  { %v6460_v24 = vadd.f32 %v6411_v5, %v6172_v57 }
 0x6fd   :  { %6503 = vst.msk [vmem:[%s12079_s4 + $0x150] sm:$0xff] %vm5067_vm0, %v6455_v58 }
 0x6fe   :  { %6508 = vst.msk [vmem:[%s12079_s4 + $0x178] sm:$0xff] %vm5067_vm0, %v6460_v24  ;;  %v6108_v15 = vpop.permute.xlu1 %6107 }
 0x6ff   :  { %v6169_v46 = vmul.f32 %v12294_v17, %v6108_v15 }
 0x702   :  { %v6396_v38 = vpop.permute.xlu1 %6395 }
 0x703   :  { %v6457_v31 = vadd.f32 %v6396_v38, %v6169_v46 }
 0x705   :  { %6505 = vst.msk [vmem:[%s12079_s4 + $0x160] sm:$0xff] %vm5067_vm0, %v6457_v31 }
 0x706   :  { %v6118_v28 = vpop.permute.xlu1 %6117 }
 0x707   :  { %v6171_v19 = vmul.f32 %v11161_v39, %v6118_v28 }
 0x70a   :  { %v6406_v50 = vpop.permute.xlu1 %6405 }
 0x70b   :  { %v6459_v3 = vadd.f32 %v6406_v50, %v6171_v19 }
 0x70d   :  { %6507 = vst.msk [vmem:[%s12079_s4 + $0x170] sm:$0xff] %vm5067_vm0, %v6459_v3 }

</bundles_post_ra>
